<compile_context>
chip_gen: v7x
topology: tpu7x:2x2x1
jax: 0.10.0
libtpu: 0.0.40
codegen_flags: <defaults>
</compile_context>

<pallas_src>
import jax
import jax.numpy as jnp
from jax.experimental import pallas as pl
from jax.experimental.pallas import tpu as pltpu


# ---------------------------------------------------------------------------
# Fused kernel: one grid step == one batch element, both convs.
# ---------------------------------------------------------------------------
def _conv_ode_fused_kernel(t_ref, x_ref, w1_ref, b1_ref, m1_ref,
                           w2_ref, b2_ref, m2_ref, o_ref,
                           xpad_ref, hpad_ref, col1_ref, col2_ref):
    """Refs:
      t_ref:   (1, 1)          SMEM scalar t
      x_ref:   (1, H, W, Cin)  one batch of the input, NHWC
      w1_ref:  (9*Cin, F)      conv1 image-channel weights, tap-major
      b1_ref:  (1, F)          conv1 bias
      m1_ref:  (H*W, F)        conv1 time-channel map (multiply by t)
      w2_ref:  (C, 9*F)        conv2 image-channel weights, tap-major
      b2_ref:  (C, 1)          conv2 bias
      m2_ref:  (C, H*W)        conv2 time-channel map (multiply by t)
      o_ref:   (1, C, H*W)     output block (lane-dense, reshapes to NCHW)
      scratch: xpad (H+2,W+2,Cin), hpad (H+2,W+2,F), col1 (H*W,9Cin), col2 (H*W,9F)
    """
    _, H, W, Cin = x_ref.shape
    F = w1_ref.shape[1]
    HW = H * W
    t = t_ref[0, 0]

    # ---- conv1: zero-pad x into VMEM scratch (no jnp.pad / HBM copy) ----------
    xpad_ref[...] = jnp.zeros(xpad_ref.shape, xpad_ref.dtype)
    xpad_ref[1:H + 1, 1:W + 1, :] = x_ref[0]

    # im2col: col1[p, (kh*3+kw)*Cin + c] = xpad[i+kh, j+kw, c],  p = i*W + j
    for kh in range(3):
        for kw in range(3):
            tap = kh * 3 + kw
            patch = xpad_ref[kh:kh + H, kw:kw + W, :]          # (H, W, Cin)
            col1_ref[:, tap * Cin:(tap + 1) * Cin] = patch.reshape(HW, Cin)

    # Single MXU matmul; bias + analytic time-channel contribution added directly.
    h = (jnp.dot(col1_ref[...], w1_ref[...],
                 preferred_element_type=jnp.float32)
         + t * m1_ref[...] + b1_ref[...])                       # (HW, F) fp32

    # ---- conv2: intermediate h never leaves VMEM ------------------------------
    hpad_ref[...] = jnp.zeros(hpad_ref.shape, hpad_ref.dtype)
    hpad_ref[1:H + 1, 1:W + 1, :] = h.reshape(H, W, F)

    for kh in range(3):
        for kw in range(3):
            tap = kh * 3 + kw
            patch = hpad_ref[kh:kh + H, kw:kw + W, :]           # (H, W, F)
            col2_ref[:, tap * F:(tap + 1) * F] = patch.reshape(HW, F)

    # (C, 9F) x (HW, 9F)^T -> (C, HW): output is lane-dense (H*W on the lane axis).
    y2 = jax.lax.dot_general(
        w2_ref[...], col2_ref[...],
        dimension_numbers=(((1,), (1,)), ((), ())),
        preferred_element_type=jnp.float32)                     # (C, HW)

    o_ref[0] = (y2 + t * m2_ref[...] + b2_ref[...]).astype(o_ref.dtype)


# ---------------------------------------------------------------------------
# Wrapper
# ---------------------------------------------------------------------------
def conv_ode_func_forward(t, x_nchw, kparams):
    """ConvODEFunc.forward(t, x) with time_dependent=True. Input/output NCHW."""
    B, C, H, W = x_nchw.shape
    F = kparams["w1m"].shape[1]

    x_nhwc = jnp.transpose(x_nchw, (0, 2, 3, 1))        # tiny boundary transpose
    t_arr = jnp.reshape(jnp.asarray(t, jnp.float32), (1, 1))

    out = pl.pallas_call(
        _conv_ode_fused_kernel,
        out_shape=jax.ShapeDtypeStruct((B, C, H * W), x_nchw.dtype),
        grid=(B,),
        in_specs=[
            pl.BlockSpec(memory_space=pltpu.MemorySpace.SMEM),        # t scalar
            pl.BlockSpec((1, H, W, C), lambda b: (b, 0, 0, 0)),       # x (NHWC)
            pl.BlockSpec((9 * C, F), lambda b: (0, 0)),               # w1m
            pl.BlockSpec((1, F), lambda b: (0, 0)),                   # b1
            pl.BlockSpec((H * W, F), lambda b: (0, 0)),               # m1
            pl.BlockSpec((C, 9 * F), lambda b: (0, 0)),               # w2t
            pl.BlockSpec((C, 1), lambda b: (0, 0)),                   # b2
            pl.BlockSpec((C, H * W), lambda b: (0, 0)),               # m2
        ],
        out_specs=pl.BlockSpec((1, C, H * W), lambda b: (b, 0, 0)),
        scratch_shapes=[
            pltpu.VMEM((H + 2, W + 2, C), jnp.float32),   # padded x
            pltpu.VMEM((H + 2, W + 2, F), jnp.float32),   # padded intermediate h
            pltpu.VMEM((H * W, 9 * C), jnp.float32),      # im2col for conv1
            pltpu.VMEM((H * W, 9 * F), jnp.float32),      # im2col for conv2
        ],
        compiler_params=pltpu.CompilerParams(
            dimension_semantics=("parallel",)),           # v7x: batch across both TCs
    )(t_arr, x_nhwc, kparams["w1m"], kparams["b1m"], kparams["m1"],
      kparams["w2t"], kparams["b2m"], kparams["m2"])

    return out.reshape(B, C, H, W)                        # pure reshape, already NCHW


# ---------------------------------------------------------------------------
# Parameter construction (weight reshuffles hoisted out of the forward path)
# ---------------------------------------------------------------------------
def init_raw_params(key, in_channels, num_filters, augment_dim=0):
    channels = in_channels + augment_dim
    k1, k2, k3, k4 = jax.random.split(key, 4)
    # Conv2dTime adds one extra (time) input channel to each conv.
    w1 = jax.random.normal(k1, (num_filters, channels + 1, 3, 3), jnp.float32) * 0.1
    b1 = jax.random.normal(k2, (num_filters,), jnp.float32) * 0.1
    w2 = jax.random.normal(k3, (channels, num_filters + 1, 3, 3), jnp.float32) * 0.1
    b2 = jax.random.normal(k4, (channels,), jnp.float32) * 0.1
    return {"w1": w1, "b1": b1, "w2": w2, "b2": b2}


def _time_tap_map(w_time, H, W):
    """Exact contribution map of the constant-t time channel through a 3x3 'same'
    conv with zero padding:  M[co, i, j] = sum of w_time[co, kh, kw] over taps that
    land inside the (unpadded) image at output pixel (i, j)."""
    k = jnp.arange(3)
    i = jnp.arange(H)
    j = jnp.arange(W)
    rvalid = ((i[None, :] + k[:, None] >= 1) &
              (i[None, :] + k[:, None] <= H)).astype(w_time.dtype)   # (3, H)
    cvalid = ((j[None, :] + k[:, None] >= 1) &
              (j[None, :] + k[:, None] <= W)).astype(w_time.dtype)   # (3, W)
    return jnp.einsum("cab,ai,bj->cij", w_time, rvalid, cvalid)      # (Cout, H, W)


def prepare_kernel_params(raw, H, W):
    w1, b1, w2, b2 = raw["w1"], raw["b1"], raw["w2"], raw["b2"]
    F = w1.shape[0]
    Cin = w1.shape[1] - 1          # image channels of conv1 (time channel dropped)
    C = w2.shape[0]

    # conv1 image weights -> (9*Cin, F), row = (kh*3+kw)*Cin + c
    w1m = jnp.transpose(w1[:, 1:], (2, 3, 1, 0)).reshape(9 * Cin, F)
    # conv2 image weights -> (C, 9*F), col = (kh*3+kw)*F + f
    w2t = jnp.transpose(w2[:, 1:], (0, 2, 3, 1)).reshape(C, 9 * F)

    m1 = jnp.transpose(_time_tap_map(w1[:, 0], H, W), (1, 2, 0)).reshape(H * W, F)
    m2 = _time_tap_map(w2[:, 0], H, W).reshape(C, H * W)

    return {"w1m": w1m, "b1m": b1.reshape(1, F), "m1": m1,
            "w2t": w2t, "b2m": b2.reshape(C, 1), "m2": m2}


# ---------------------------------------------------------------------------
# Pure-JAX reference (lax conv) for the correctness check
# ---------------------------------------------------------------------------
def _reference_forward(t, x_nchw, raw):
    B, C, H, W = x_nchw.shape
    t_img = jnp.full((B, 1, H, W), t, dtype=x_nchw.dtype)

    def conv(x, w, b):
        y = jax.lax.conv_general_dilated(
            x, w, window_strides=(1, 1), padding=((1, 1), (1, 1)),
            dimension_numbers=("NCHW", "OIHW", "NCHW"))
        return y + b[None, :, None, None]

    h = conv(jnp.concatenate([t_img, x_nchw], axis=1), raw["w1"], raw["b1"])
    h = conv(jnp.concatenate([t_img, h], axis=1), raw["w2"], raw["b2"])
    return h


if __name__ == "__main__":
    key = jax.random.PRNGKey(0)
    k_x, k_p = jax.random.split(key)

    in_channels, num_filters = 4, 8
    B, H, W = 2, 16, 16
    x = jax.random.normal(k_x, (B, in_channels, H, W), jnp.float32)
    t = jnp.float32(0.5)

    raw = init_raw_params(k_p, in_channels, num_filters)
    kparams = prepare_kernel_params(raw, H, W)

    # TODO(synk): self.nfe (host-side call counter) and the unused non_linearity
    # member have no kernel equivalent; forward() math does not use them.

    fwd = jax.jit(conv_ode_func_forward)
    out = jax.block_until_ready(fwd(t, x, kparams))

    ref = _reference_forward(t, x, raw)
    assert out.shape == (B, in_channels, H, W)
    assert jnp.allclose(out, ref, atol=1e-4, rtol=1e-4), "mismatch vs reference"

    print("KERNEL_OK")
</pallas_src>

<mosaic_0001>
module attributes {stable_mosaic.version = 11 : i64} {
  func.func @_conv_ode_fused_kernel(%arg0: i32, %arg1: memref<1x1xf32, #tpu.memory_space<smem>>, %arg2: memref<1x16x16x4xf32, #tpu.memory_space<vmem>>, %arg3: memref<36x8xf32, #tpu.memory_space<vmem>>, %arg4: memref<1x8xf32, #tpu.memory_space<vmem>>, %arg5: memref<256x8xf32, #tpu.memory_space<vmem>>, %arg6: memref<4x72xf32, #tpu.memory_space<vmem>>, %arg7: memref<4x1xf32, #tpu.memory_space<vmem>>, %arg8: memref<4x256xf32, #tpu.memory_space<vmem>>, %arg9: memref<1x4x256xf32, #tpu.memory_space<vmem>>, %arg10: memref<18x18x4xf32, #tpu.memory_space<vmem>>, %arg11: memref<18x18x8xf32, #tpu.memory_space<vmem>>, %arg12: memref<256x36xf32, #tpu.memory_space<vmem>>, %arg13: memref<256x72xf32, #tpu.memory_space<vmem>>) attributes {dimension_semantics = [#tpu.dimension_semantics<parallel>], iteration_bounds = array<i64: 2>, scalar_prefetch = 0 : i64, scratch_operands = 4 : i64, tpu.core_type = #tpu.core_type<tc>, window_params = [{transform_indices = @transform_0, window_bounds = array<i64: 1, 1>}, {transform_indices = @transform_1, window_bounds = array<i64: 1, 16, 16, 4>}, {pipeline_mode = #tpu.pipeline_mode<synchronous>, transform_indices = @transform_2, window_bounds = array<i64: 36, 8>}, {pipeline_mode = #tpu.pipeline_mode<synchronous>, transform_indices = @transform_3, window_bounds = array<i64: 1, 8>}, {pipeline_mode = #tpu.pipeline_mode<synchronous>, transform_indices = @transform_4, window_bounds = array<i64: 256, 8>}, {pipeline_mode = #tpu.pipeline_mode<synchronous>, transform_indices = @transform_5, window_bounds = array<i64: 4, 72>}, {pipeline_mode = #tpu.pipeline_mode<synchronous>, transform_indices = @transform_6, window_bounds = array<i64: 4, 1>}, {pipeline_mode = #tpu.pipeline_mode<synchronous>, transform_indices = @transform_7, window_bounds = array<i64: 4, 256>}, {transform_indices = @transform_8, window_bounds = array<i64: 1, 4, 256>}]} {
    %c0 = arith.constant 0 : index
    %c0_0 = arith.constant 0 : index
    %0 = memref.load %arg1[%c0, %c0_0] : memref<1x1xf32, #tpu.memory_space<smem>>
    %cst = arith.constant 0.000000e+00 : f32
    %1 = vector.broadcast %cst : f32 to vector<18x18x4xf32>
    %c0_1 = arith.constant 0 : index
    %c0_2 = arith.constant 0 : index
    %c0_3 = arith.constant 0 : index
    %2 = vector.load %arg10[%c0_1, %c0_2, %c0_3] : memref<18x18x4xf32, #tpu.memory_space<vmem>>, vector<18x18x4xf32>
    tpu.vector_store %arg10[%c0_1, %c0_2, %c0_3], %1 {strides = array<i32>} : memref<18x18x4xf32, #tpu.memory_space<vmem>>, vector<18x18x4xf32>,
    %c0_4 = arith.constant 0 : index
    %c0_5 = arith.constant 0 : index
    %c0_6 = arith.constant 0 : index
    %c0_7 = arith.constant 0 : index
    %3 = vector.load %arg2[%c0_4, %c0_5, %c0_6, %c0_7] : memref<1x16x16x4xf32, #tpu.memory_space<vmem>>, vector<1x16x16x4xf32>
    %4 = vector.shape_cast %3 : vector<1x16x16x4xf32> to vector<16x16x4xf32>
    %c1 = arith.constant 1 : index
    %c1_8 = arith.constant 1 : index
    %c0_9 = arith.constant 0 : index
    %5 = vector.load %arg10[%c1, %c1_8, %c0_9] : memref<18x18x4xf32, #tpu.memory_space<vmem>>, vector<16x16x4xf32>
    tpu.vector_store %arg10[%c1, %c1_8, %c0_9], %4 {strides = array<i32>} : memref<18x18x4xf32, #tpu.memory_space<vmem>>, vector<16x16x4xf32>,
    %c0_10 = arith.constant 0 : index
    %c0_11 = arith.constant 0 : index
    %c0_12 = arith.constant 0 : index
    %6 = vector.load %arg10[%c0_10, %c0_11, %c0_12] : memref<18x18x4xf32, #tpu.memory_space<vmem>>, vector<16x16x4xf32>
    %7 = vector.shape_cast %6 : vector<16x16x4xf32> to vector<256x4xf32>
    %c0_13 = arith.constant 0 : index
    %c0_14 = arith.constant 0 : index
    %8 = vector.load %arg12[%c0_13, %c0_14] : memref<256x36xf32, #tpu.memory_space<vmem>>, vector<256x4xf32>
    tpu.vector_store %arg12[%c0_13, %c0_14], %7 {strides = array<i32>} : memref<256x36xf32, #tpu.memory_space<vmem>>, vector<256x4xf32>,
    %c0_15 = arith.constant 0 : index
    %c1_16 = arith.constant 1 : index
    %c0_17 = arith.constant 0 : index
    %9 = vector.load %arg10[%c0_15, %c1_16, %c0_17] : memref<18x18x4xf32, #tpu.memory_space<vmem>>, vector<16x16x4xf32>
    %10 = vector.shape_cast %9 : vector<16x16x4xf32> to vector<256x4xf32>
    %c0_18 = arith.constant 0 : index
    %c4 = arith.constant 4 : index
    %11 = vector.load %arg12[%c0_18, %c4] : memref<256x36xf32, #tpu.memory_space<vmem>>, vector<256x4xf32>
    tpu.vector_store %arg12[%c0_18, %c4], %10 {strides = array<i32>} : memref<256x36xf32, #tpu.memory_space<vmem>>, vector<256x4xf32>,
    %c0_19 = arith.constant 0 : index
    %c2 = arith.constant 2 : index
    %c0_20 = arith.constant 0 : index
    %12 = vector.load %arg10[%c0_19, %c2, %c0_20] : memref<18x18x4xf32, #tpu.memory_space<vmem>>, vector<16x16x4xf32>
    %13 = vector.shape_cast %12 : vector<16x16x4xf32> to vector<256x4xf32>
    %c0_21 = arith.constant 0 : index
    %c8 = arith.constant 8 : index
    %14 = vector.load %arg12[%c0_21, %c8] : memref<256x36xf32, #tpu.memory_space<vmem>>, vector<256x4xf32>
    tpu.vector_store %arg12[%c0_21, %c8], %13 {strides = array<i32>} : memref<256x36xf32, #tpu.memory_space<vmem>>, vector<256x4xf32>,
    %c1_22 = arith.constant 1 : index
    %c0_23 = arith.constant 0 : index
    %c0_24 = arith.constant 0 : index
    %15 = vector.load %arg10[%c1_22, %c0_23, %c0_24] : memref<18x18x4xf32, #tpu.memory_space<vmem>>, vector<16x16x4xf32>
    %16 = vector.shape_cast %15 : vector<16x16x4xf32> to vector<256x4xf32>
    %c0_25 = arith.constant 0 : index
    %c12 = arith.constant 12 : index
    %17 = vector.load %arg12[%c0_25, %c12] : memref<256x36xf32, #tpu.memory_space<vmem>>, vector<256x4xf32>
    tpu.vector_store %arg12[%c0_25, %c12], %16 {strides = array<i32>} : memref<256x36xf32, #tpu.memory_space<vmem>>, vector<256x4xf32>,
    %c1_26 = arith.constant 1 : index
    %c1_27 = arith.constant 1 : index
    %c0_28 = arith.constant 0 : index
    %18 = vector.load %arg10[%c1_26, %c1_27, %c0_28] : memref<18x18x4xf32, #tpu.memory_space<vmem>>, vector<16x16x4xf32>
    %19 = vector.shape_cast %18 : vector<16x16x4xf32> to vector<256x4xf32>
    %c0_29 = arith.constant 0 : index
    %c16 = arith.constant 16 : index
    %20 = vector.load %arg12[%c0_29, %c16] : memref<256x36xf32, #tpu.memory_space<vmem>>, vector<256x4xf32>
    tpu.vector_store %arg12[%c0_29, %c16], %19 {strides = array<i32>} : memref<256x36xf32, #tpu.memory_space<vmem>>, vector<256x4xf32>,
    %c1_30 = arith.constant 1 : index
    %c2_31 = arith.constant 2 : index
    %c0_32 = arith.constant 0 : index
    %21 = vector.load %arg10[%c1_30, %c2_31, %c0_32] : memref<18x18x4xf32, #tpu.memory_space<vmem>>, vector<16x16x4xf32>
    %22 = vector.shape_cast %21 : vector<16x16x4xf32> to vector<256x4xf32>
    %c0_33 = arith.constant 0 : index
    %c20 = arith.constant 20 : index
    %23 = vector.load %arg12[%c0_33, %c20] : memref<256x36xf32, #tpu.memory_space<vmem>>, vector<256x4xf32>
    tpu.vector_store %arg12[%c0_33, %c20], %22 {strides = array<i32>} : memref<256x36xf32, #tpu.memory_space<vmem>>, vector<256x4xf32>,
    %c2_34 = arith.constant 2 : index
    %c0_35 = arith.constant 0 : index
    %c0_36 = arith.constant 0 : index
    %24 = vector.load %arg10[%c2_34, %c0_35, %c0_36] : memref<18x18x4xf32, #tpu.memory_space<vmem>>, vector<16x16x4xf32>
    %25 = vector.shape_cast %24 : vector<16x16x4xf32> to vector<256x4xf32>
    %c0_37 = arith.constant 0 : index
    %c24 = arith.constant 24 : index
    %26 = vector.load %arg12[%c0_37, %c24] : memref<256x36xf32, #tpu.memory_space<vmem>>, vector<256x4xf32>
    tpu.vector_store %arg12[%c0_37, %c24], %25 {strides = array<i32>} : memref<256x36xf32, #tpu.memory_space<vmem>>, vector<256x4xf32>,
    %c2_38 = arith.constant 2 : index
    %c1_39 = arith.constant 1 : index
    %c0_40 = arith.constant 0 : index
    %27 = vector.load %arg10[%c2_38, %c1_39, %c0_40] : memref<18x18x4xf32, #tpu.memory_space<vmem>>, vector<16x16x4xf32>
    %28 = vector.shape_cast %27 : vector<16x16x4xf32> to vector<256x4xf32>
    %c0_41 = arith.constant 0 : index
    %c28 = arith.constant 28 : index
    %29 = vector.load %arg12[%c0_41, %c28] : memref<256x36xf32, #tpu.memory_space<vmem>>, vector<256x4xf32>
    tpu.vector_store %arg12[%c0_41, %c28], %28 {strides = array<i32>} : memref<256x36xf32, #tpu.memory_space<vmem>>, vector<256x4xf32>,
    %c2_42 = arith.constant 2 : index
    %c2_43 = arith.constant 2 : index
    %c0_44 = arith.constant 0 : index
    %30 = vector.load %arg10[%c2_42, %c2_43, %c0_44] : memref<18x18x4xf32, #tpu.memory_space<vmem>>, vector<16x16x4xf32>
    %31 = vector.shape_cast %30 : vector<16x16x4xf32> to vector<256x4xf32>
    %c0_45 = arith.constant 0 : index
    %c32 = arith.constant 32 : index
    %32 = vector.load %arg12[%c0_45, %c32] : memref<256x36xf32, #tpu.memory_space<vmem>>, vector<256x4xf32>
    tpu.vector_store %arg12[%c0_45, %c32], %31 {strides = array<i32>} : memref<256x36xf32, #tpu.memory_space<vmem>>, vector<256x4xf32>,
    %c0_46 = arith.constant 0 : index
    %c0_47 = arith.constant 0 : index
    %33 = vector.load %arg12[%c0_46, %c0_47] : memref<256x36xf32, #tpu.memory_space<vmem>>, vector<256x36xf32>
    %c0_48 = arith.constant 0 : index
    %c0_49 = arith.constant 0 : index
    %34 = vector.load %arg3[%c0_48, %c0_49] : memref<36x8xf32, #tpu.memory_space<vmem>>, vector<36x8xf32>
    %cst_50 = arith.constant dense<0.000000e+00> : vector<256x8xf32>
    %35 = tpu.matmul %33, %34, %cst_50 {dimension_numbers = #tpu.dot_dimension_numbers<[1], [0], [0], [1], [0, 0, 1, 1], [], []>} : vector<256x36xf32>, vector<36x8xf32>, vector<256x8xf32> -> vector<256x8xf32>
    %c0_51 = arith.constant 0 : index
    %c0_52 = arith.constant 0 : index
    %36 = vector.load %arg5[%c0_51, %c0_52] : memref<256x8xf32, #tpu.memory_space<vmem>>, vector<256x8xf32>
    %37 = vector.broadcast %0 : f32 to vector<256x8xf32>
    %38 = arith.mulf %37, %36 : vector<256x8xf32>
    %39 = arith.addf %35, %38 : vector<256x8xf32>
    %c0_53 = arith.constant 0 : index
    %c0_54 = arith.constant 0 : index
    %40 = vector.load %arg4[%c0_53, %c0_54] : memref<1x8xf32, #tpu.memory_space<vmem>>, vector<1x8xf32>
    %41 = vector.broadcast %40 : vector<1x8xf32> to vector<256x8xf32>
    %42 = arith.addf %39, %41 : vector<256x8xf32>
    %cst_55 = arith.constant 0.000000e+00 : f32
    %43 = vector.broadcast %cst_55 : f32 to vector<18x18x8xf32>
    %c0_56 = arith.constant 0 : index
    %c0_57 = arith.constant 0 : index
    %c0_58 = arith.constant 0 : index
    %44 = vector.load %arg11[%c0_56, %c0_57, %c0_58] : memref<18x18x8xf32, #tpu.memory_space<vmem>>, vector<18x18x8xf32>
    tpu.vector_store %arg11[%c0_56, %c0_57, %c0_58], %43 {strides = array<i32>} : memref<18x18x8xf32, #tpu.memory_space<vmem>>, vector<18x18x8xf32>,
    %45 = vector.shape_cast %42 : vector<256x8xf32> to vector<16x16x8xf32>
    %c1_59 = arith.constant 1 : index
    %c1_60 = arith.constant 1 : index
    %c0_61 = arith.constant 0 : index
    %46 = vector.load %arg11[%c1_59, %c1_60, %c0_61] : memref<18x18x8xf32, #tpu.memory_space<vmem>>, vector<16x16x8xf32>
    tpu.vector_store %arg11[%c1_59, %c1_60, %c0_61], %45 {strides = array<i32>} : memref<18x18x8xf32, #tpu.memory_space<vmem>>, vector<16x16x8xf32>,
    %c0_62 = arith.constant 0 : index
    %c0_63 = arith.constant 0 : index
    %c0_64 = arith.constant 0 : index
    %47 = vector.load %arg11[%c0_62, %c0_63, %c0_64] : memref<18x18x8xf32, #tpu.memory_space<vmem>>, vector<16x16x8xf32>
    %48 = vector.shape_cast %47 : vector<16x16x8xf32> to vector<256x8xf32>
    %c0_65 = arith.constant 0 : index
    %c0_66 = arith.constant 0 : index
    %49 = vector.load %arg13[%c0_65, %c0_66] : memref<256x72xf32, #tpu.memory_space<vmem>>, vector<256x8xf32>
    tpu.vector_store %arg13[%c0_65, %c0_66], %48 {strides = array<i32>} : memref<256x72xf32, #tpu.memory_space<vmem>>, vector<256x8xf32>,
    %c0_67 = arith.constant 0 : index
    %c1_68 = arith.constant 1 : index
    %c0_69 = arith.constant 0 : index
    %50 = vector.load %arg11[%c0_67, %c1_68, %c0_69] : memref<18x18x8xf32, #tpu.memory_space<vmem>>, vector<16x16x8xf32>
    %51 = vector.shape_cast %50 : vector<16x16x8xf32> to vector<256x8xf32>
    %c0_70 = arith.constant 0 : index
    %c8_71 = arith.constant 8 : index
    %52 = vector.load %arg13[%c0_70, %c8_71] : memref<256x72xf32, #tpu.memory_space<vmem>>, vector<256x8xf32>
    tpu.vector_store %arg13[%c0_70, %c8_71], %51 {strides = array<i32>} : memref<256x72xf32, #tpu.memory_space<vmem>>, vector<256x8xf32>,
    %c0_72 = arith.constant 0 : index
    %c2_73 = arith.constant 2 : index
    %c0_74 = arith.constant 0 : index
    %53 = vector.load %arg11[%c0_72, %c2_73, %c0_74] : memref<18x18x8xf32, #tpu.memory_space<vmem>>, vector<16x16x8xf32>
    %54 = vector.shape_cast %53 : vector<16x16x8xf32> to vector<256x8xf32>
    %c0_75 = arith.constant 0 : index
    %c16_76 = arith.constant 16 : index
    %55 = vector.load %arg13[%c0_75, %c16_76] : memref<256x72xf32, #tpu.memory_space<vmem>>, vector<256x8xf32>
    tpu.vector_store %arg13[%c0_75, %c16_76], %54 {strides = array<i32>} : memref<256x72xf32, #tpu.memory_space<vmem>>, vector<256x8xf32>,
    %c1_77 = arith.constant 1 : index
    %c0_78 = arith.constant 0 : index
    %c0_79 = arith.constant 0 : index
    %56 = vector.load %arg11[%c1_77, %c0_78, %c0_79] : memref<18x18x8xf32, #tpu.memory_space<vmem>>, vector<16x16x8xf32>
    %57 = vector.shape_cast %56 : vector<16x16x8xf32> to vector<256x8xf32>
    %c0_80 = arith.constant 0 : index
    %c24_81 = arith.constant 24 : index
    %58 = vector.load %arg13[%c0_80, %c24_81] : memref<256x72xf32, #tpu.memory_space<vmem>>, vector<256x8xf32>
    tpu.vector_store %arg13[%c0_80, %c24_81], %57 {strides = array<i32>} : memref<256x72xf32, #tpu.memory_space<vmem>>, vector<256x8xf32>,
    %c1_82 = arith.constant 1 : index
    %c1_83 = arith.constant 1 : index
    %c0_84 = arith.constant 0 : index
    %59 = vector.load %arg11[%c1_82, %c1_83, %c0_84] : memref<18x18x8xf32, #tpu.memory_space<vmem>>, vector<16x16x8xf32>
    %60 = vector.shape_cast %59 : vector<16x16x8xf32> to vector<256x8xf32>
    %c0_85 = arith.constant 0 : index
    %c32_86 = arith.constant 32 : index
    %61 = vector.load %arg13[%c0_85, %c32_86] : memref<256x72xf32, #tpu.memory_space<vmem>>, vector<256x8xf32>
    tpu.vector_store %arg13[%c0_85, %c32_86], %60 {strides = array<i32>} : memref<256x72xf32, #tpu.memory_space<vmem>>, vector<256x8xf32>,
    %c1_87 = arith.constant 1 : index
    %c2_88 = arith.constant 2 : index
    %c0_89 = arith.constant 0 : index
    %62 = vector.load %arg11[%c1_87, %c2_88, %c0_89] : memref<18x18x8xf32, #tpu.memory_space<vmem>>, vector<16x16x8xf32>
    %63 = vector.shape_cast %62 : vector<16x16x8xf32> to vector<256x8xf32>
    %c0_90 = arith.constant 0 : index
    %c40 = arith.constant 40 : index
    %64 = vector.load %arg13[%c0_90, %c40] : memref<256x72xf32, #tpu.memory_space<vmem>>, vector<256x8xf32>
    tpu.vector_store %arg13[%c0_90, %c40], %63 {strides = array<i32>} : memref<256x72xf32, #tpu.memory_space<vmem>>, vector<256x8xf32>,
    %c2_91 = arith.constant 2 : index
    %c0_92 = arith.constant 0 : index
    %c0_93 = arith.constant 0 : index
    %65 = vector.load %arg11[%c2_91, %c0_92, %c0_93] : memref<18x18x8xf32, #tpu.memory_space<vmem>>, vector<16x16x8xf32>
    %66 = vector.shape_cast %65 : vector<16x16x8xf32> to vector<256x8xf32>
    %c0_94 = arith.constant 0 : index
    %c48 = arith.constant 48 : index
    %67 = vector.load %arg13[%c0_94, %c48] : memref<256x72xf32, #tpu.memory_space<vmem>>, vector<256x8xf32>
    tpu.vector_store %arg13[%c0_94, %c48], %66 {strides = array<i32>} : memref<256x72xf32, #tpu.memory_space<vmem>>, vector<256x8xf32>,
    %c2_95 = arith.constant 2 : index
    %c1_96 = arith.constant 1 : index
    %c0_97 = arith.constant 0 : index
    %68 = vector.load %arg11[%c2_95, %c1_96, %c0_97] : memref<18x18x8xf32, #tpu.memory_space<vmem>>, vector<16x16x8xf32>
    %69 = vector.shape_cast %68 : vector<16x16x8xf32> to vector<256x8xf32>
    %c0_98 = arith.constant 0 : index
    %c56 = arith.constant 56 : index
    %70 = vector.load %arg13[%c0_98, %c56] : memref<256x72xf32, #tpu.memory_space<vmem>>, vector<256x8xf32>
    tpu.vector_store %arg13[%c0_98, %c56], %69 {strides = array<i32>} : memref<256x72xf32, #tpu.memory_space<vmem>>, vector<256x8xf32>,
    %c2_99 = arith.constant 2 : index
    %c2_100 = arith.constant 2 : index
    %c0_101 = arith.constant 0 : index
    %71 = vector.load %arg11[%c2_99, %c2_100, %c0_101] : memref<18x18x8xf32, #tpu.memory_space<vmem>>, vector<16x16x8xf32>
    %72 = vector.shape_cast %71 : vector<16x16x8xf32> to vector<256x8xf32>
    %c0_102 = arith.constant 0 : index
    %c64 = arith.constant 64 : index
    %73 = vector.load %arg13[%c0_102, %c64] : memref<256x72xf32, #tpu.memory_space<vmem>>, vector<256x8xf32>
    tpu.vector_store %arg13[%c0_102, %c64], %72 {strides = array<i32>} : memref<256x72xf32, #tpu.memory_space<vmem>>, vector<256x8xf32>,
    %c0_103 = arith.constant 0 : index
    %c0_104 = arith.constant 0 : index
    %74 = vector.load %arg6[%c0_103, %c0_104] : memref<4x72xf32, #tpu.memory_space<vmem>>, vector<4x72xf32>
    %c0_105 = arith.constant 0 : index
    %c0_106 = arith.constant 0 : index
    %75 = vector.load %arg13[%c0_105, %c0_106] : memref<256x72xf32, #tpu.memory_space<vmem>>, vector<256x72xf32>
    %cst_107 = arith.constant dense<0.000000e+00> : vector<4x256xf32>
    %76 = tpu.matmul %74, %75, %cst_107 {dimension_numbers = #tpu.dot_dimension_numbers<[1], [1], [0], [0], [0, 0, 1, 0], [], []>} : vector<4x72xf32>, vector<256x72xf32>, vector<4x256xf32> -> vector<4x256xf32>
    %c0_108 = arith.constant 0 : index
    %c0_109 = arith.constant 0 : index
    %77 = vector.load %arg8[%c0_108, %c0_109] : memref<4x256xf32, #tpu.memory_space<vmem>>, vector<4x256xf32>
    %78 = vector.broadcast %0 : f32 to vector<4x256xf32>
    %79 = arith.mulf %78, %77 : vector<4x256xf32>
    %80 = arith.addf %76, %79 : vector<4x256xf32>
    %c0_110 = arith.constant 0 : index
    %c0_111 = arith.constant 0 : index
    %81 = vector.load %arg7[%c0_110, %c0_111] : memref<4x1xf32, #tpu.memory_space<vmem>>, vector<4x1xf32>
    %82 = vector.broadcast %81 : vector<4x1xf32> to vector<4x256xf32>
    %83 = arith.addf %80, %82 : vector<4x256xf32>
    %c0_112 = arith.constant 0 : index
    %c0_113 = arith.constant 0 : index
    %c0_114 = arith.constant 0 : index
    %84 = vector.load %arg9[%c0_112, %c0_113, %c0_114] : memref<1x4x256xf32, #tpu.memory_space<vmem>>, vector<1x4x256xf32>
    %85 = vector.shape_cast %84 : vector<1x4x256xf32> to vector<4x256xf32>
    %86 = vector.shape_cast %83 : vector<4x256xf32> to vector<1x4x256xf32>
    tpu.vector_store %arg9[%c0_112, %c0_113, %c0_114], %86 {strides = array<i32>} : memref<1x4x256xf32, #tpu.memory_space<vmem>>, vector<1x4x256xf32>,
    return
  }
  func.func @transform_0(%arg0: i32) -> (i32, i32) {
    %c0_i32 = arith.constant 0 : i32
    %c0_i32_0 = arith.constant 0 : i32
    %c0_i32_1 = arith.constant 0 : i32
    return %c0_i32, %c0_i32_0 : i32, i32
  }
  func.func @transform_1(%arg0: i32) -> (i32, i32, i32, i32) {
    %c0_i32 = arith.constant 0 : i32
    %c0_i32_0 = arith.constant 0 : i32
    %c0_i32_1 = arith.constant 0 : i32
    %c0_i32_2 = arith.constant 0 : i32
    return %arg0, %c0_i32, %c0_i32_0, %c0_i32_1 : i32, i32, i32, i32
  }
  func.func @transform_2(%arg0: i32) -> (i32, i32) {
    %c0_i32 = arith.constant 0 : i32
    %c0_i32_0 = arith.constant 0 : i32
    %c0_i32_1 = arith.constant 0 : i32
    return %c0_i32, %c0_i32_0 : i32, i32
  }
  func.func @transform_3(%arg0: i32) -> (i32, i32) {
    %c0_i32 = arith.constant 0 : i32
    %c0_i32_0 = arith.constant 0 : i32
    %c0_i32_1 = arith.constant 0 : i32
    return %c0_i32, %c0_i32_0 : i32, i32
  }
  func.func @transform_4(%arg0: i32) -> (i32, i32) {
    %c0_i32 = arith.constant 0 : i32
    %c0_i32_0 = arith.constant 0 : i32
    %c0_i32_1 = arith.constant 0 : i32
    return %c0_i32, %c0_i32_0 : i32, i32
  }
  func.func @transform_5(%arg0: i32) -> (i32, i32) {
    %c0_i32 = arith.constant 0 : i32
    %c0_i32_0 = arith.constant 0 : i32
    %c0_i32_1 = arith.constant 0 : i32
    return %c0_i32, %c0_i32_0 : i32, i32
  }
  func.func @transform_6(%arg0: i32) -> (i32, i32) {
    %c0_i32 = arith.constant 0 : i32
    %c0_i32_0 = arith.constant 0 : i32
    %c0_i32_1 = arith.constant 0 : i32
    return %c0_i32, %c0_i32_0 : i32, i32
  }
  func.func @transform_7(%arg0: i32) -> (i32, i32) {
    %c0_i32 = arith.constant 0 : i32
    %c0_i32_0 = arith.constant 0 : i32
    %c0_i32_1 = arith.constant 0 : i32
    return %c0_i32, %c0_i32_0 : i32, i32
  }
  func.func @transform_8(%arg0: i32) -> (i32, i32, i32) {
    %c0_i32 = arith.constant 0 : i32
    %c0_i32_0 = arith.constant 0 : i32
    %c0_i32_1 = arith.constant 0 : i32
    return %arg0, %c0_i32, %c0_i32_0 : i32, i32, i32
  }
}

</mosaic_0001>

<bundles_post_ra>
// kernel: conv_ode_func_forward.1
= control target key start
LH: loop header
LB: loop body
LE: loop exit
PB: predicated region body
PF: predicated region fallthrough
CT: control target
= control target key end

     0   :  { %s4839_s29 = smov 0   ;;  %s7206_s0 = inlined_call_operand.<no memory space> [shape: f32[1,1], index: 0, kind: input, shape index: {}]   ;;  %s7207_s1 = inlined_call_operand.vmem [shape: f32[2,16,16,4], index: 1, kind: input, shape index: {}]   ;;  %s7208_s2 = inlined_call_operand.vmem [shape: f32[36,8], index: 2, kind: input, shape index: {}]   ;;  %s7209_s3 = inlined_call_operand.vmem [shape: f32[1,8], index: 3, kind: input, shape index: {}]   ;;  %s7210_s4 = inlined_call_operand.vmem [shape: f32[256,8], index: 4, kind: input, shape index: {}]   ;;  %s7211_s5 = inlined_call_operand.vmem [shape: f32[4,72], index: 5, kind: input, shape index: {}]   ;;  %s7212_s6 = inlined_call_operand.vmem [shape: f32[4,1], index: 6, kind: input, shape index: {}]   ;;  %s7213_s7 = inlined_call_operand.vmem [shape: f32[4,256], index: 7, kind: input, shape index: {}]   ;;  %s7214_s8 = inlined_call_operand.vmem [shape: f32[2,4,256], index: 8, kind: output, shape index: {}]  }
   0x1   :  { %13 = sst [smem:[#allocation6]] %s7206_s0 }
   0x2 LB: > { %s4480_s30 = sadd.s32 4294967295, %s4775_s29   ;;  %p4484_p0 = scmp.ge.s32.totalorder %s4775_s29, 1  ;;  %s4775_s29 = sphi %s4839_s29, %s19_s29  }
   0x3   : > { %p263_p1 = scmp.lt.s32.totalorder %s4775_s29, 3 }
   0x5   : > { %p264_p2 = pnand %p4484_p0, %p263_p1 }
   0x7   : > { %267 = sbr.rel (%p264_p2) target bundleno = 1695 (0x69f), region = 52 }
   0xe   : > { %vm308_vm0 = vcmask 31744   ;;  %p4849_p3 = scmp.lt.s32.totalorder %s4480_s30, 1  ;;  %vm311_vm1 = vcmask 25600   ;;  %v7215_v0 = vmov 0.0   ;;  %s4778_s13 = smov 4   ;;  %vm653_vm2 = vcmask 64544  }
   0xf   : > { %309 = vst.msk [vmem:[#allocation2] sm:$0xff] %vm308_vm0, %v7215_v0  ;;  %310 = vst.msk [vmem:[#allocation2 + $0x8] sm:$0xff] %vm308_vm0, %v7215_v0  ;;  %s4779_s14 = smov 8   ;;  %s4780_s15 = smov 12   ;;  %vm846_vm3 = vcmask 97344   ;;  %vm1039_vm4 = vcmask 130144  }
  0x10   : > { %313 = vst.msk [vmem:[#allocation2 + $0x18] sm:$0xff] %vm308_vm0, %v7215_v0  ;;  %314 = vst.msk [vmem:[#allocation2 + $0x20] sm:$0xff] %vm308_vm0, %v7215_v0  ;;  %s7329_s30 = smov (!%p4849_p3, %s4480_s30), 1  ;;  %s4781_s16 = smov 16   ;;  %vm1232_vm5 = vcmask 162944   ;;  %vm2237_vm6 = vcmask 1043456  }
  0x11   : > { %316 = vst.msk [vmem:[#allocation2 + $0x30] sm:$0xff] %vm308_vm0, %v7215_v0  ;;  %317 = vst.msk [vmem:[#allocation2 + $0x38] sm:$0xff] %vm308_vm0, %v7215_v0  ;;  %s4558_s9 = sshll.u32 %s7329_s30, 8  ;;  %s4782_s17 = smov 20   ;;  %vm1425_vm7 = vcmask 195744   ;;  %vm1619_vm8 = vcmask 228544  }
  0x12   : > { %319 = vst.msk [vmem:[#allocation2 + $0x48] sm:$0xff] %vm308_vm0, %v7215_v0  ;;  %320 = vst.msk [vmem:[#allocation2 + $0x50] sm:$0xff] %vm308_vm0, %v7215_v0  ;;  %s4971_s12 = scalar_lea.vmem %s7207_s1, %s4558_s9  ;;  %s4783_s18 = smov 24   ;;  %vm1812_vm9 = vcmask 261344   ;;  %vm2005_vm10 = vcmask 294144   ;;  %vm2140_vm11 = vcmask 293888  }
  0x13   : > { %322 = vst.msk [vmem:[#allocation2 + $0x60] sm:$0xff] %vm308_vm0, %v7215_v0  ;;  %323 = vst.msk [vmem:[#allocation2 + $0x68] sm:$0xff] %vm308_vm0, %v7215_v0  ;;  %v364_v1 = vld [vmem:[%s4971_s12] sm:$0xff]  ;;  %v365_v2 = vld [vmem:[%s4971_s12 + $0x8] sm:$0xff]  ;;  %s4784_s27 = smov 28   ;;  %s4785_s9 = smov 32  }
  0x14   : > { %325 = vst.msk [vmem:[#allocation2 + $0x78] sm:$0xff] %vm308_vm0, %v7215_v0  ;;  %326 = vst.msk [vmem:[#allocation2 + $0x80] sm:$0xff] %vm308_vm0, %v7215_v0  ;;  %v366_v3 = vld [vmem:[%s4971_s12 + $0x10] sm:$0xff]  ;;  %v367_v4 = vld [vmem:[%s4971_s12 + $0x18] sm:$0xff]  ;;  %vm2505_vm12 = vcmask 64512   ;;  %vm2508_vm13 = vcmask 58368  }
  0x15   : > { %328 = vst.msk [vmem:[#allocation2 + $0x90] sm:$0xff] %vm308_vm0, %v7215_v0  ;;  %329 = vst.msk [vmem:[#allocation2 + $0x98] sm:$0xff] %vm308_vm0, %v7215_v0  ;;  %v368_v5 = vld [vmem:[%s4971_s12 + $0x20] sm:$0xff]  ;;  %v369_v6 = vld [vmem:[%s4971_s12 + $0x28] sm:$0xff]  ;;  %s307_s10 = sld [smem:[#allocation6]]  ;;  %vm2818_vm14 = vcmask 130112  }
  0x16   : > { %331 = vst.msk [vmem:[#allocation2 + $0xa8] sm:$0xff] %vm308_vm0, %v7215_v0  ;;  %332 = vst.msk [vmem:[#allocation2 + $0xb0] sm:$0xff] %vm308_vm0, %v7215_v0  ;;  %v493_v7 = vld [vmem:[#allocation2 + $0x1] sm:$0xff]  ;;  %v370_v9 = vld [vmem:[%s4971_s12 + $0x30] sm:$0xff]  ;;  %vm3011_vm15 = vcmask 195712   ;;  %s4788_s25 = smov 56  }
  0x17   : > { %334 = vst.msk [vmem:[#allocation2 + $0xc0] sm:$0xff] %vm308_vm0, %v7215_v0  ;;  %335 = vst.msk [vmem:[#allocation2 + $0xc8] sm:$0xff] %vm308_vm0, %v7215_v0  ;;  %557 = vrot.lane.b32.xlu0 %v493_v7, %s4778_s13  ;;  %v371_v10 = vld [vmem:[%s4971_s12 + $0x38] sm:$0xff]  ;;  %v372_v11 = vld [vmem:[%s4971_s12 + $0x40] sm:$0xff]  ;;  %s4789_s26 = smov 64   ;;  %s4559_s20 = sshll.u32 %s7329_s30, 3 }
  0x18   : > { %337 = vst.msk [vmem:[#allocation2 + $0xd8] sm:$0xff] %vm308_vm0, %v7215_v0  ;;  %338 = vst.msk [vmem:[#allocation2 + $0xe0] sm:$0xff] %vm308_vm0, %v7215_v0  ;;  %v373_v12 = vld [vmem:[%s4971_s12 + $0x48] sm:$0xff]  ;;  %v374_v13 = vld [vmem:[%s4971_s12 + $0x50] sm:$0xff]  ;;  %s306_s23 = scalar_lea.vmem %s7214_s8, %s4559_s20 }
  0x19   : > { %340 = vst.msk [vmem:[#allocation2 + $0xf0] sm:$0xff] %vm308_vm0, %v7215_v0  ;;  %341 = vst.msk [vmem:[#allocation2 + $0xf8] sm:$0xff] %vm308_vm0, %v7215_v0  ;;  %v375_v14 = vld [vmem:[%s4971_s12 + $0x58] sm:$0xff]  ;;  %v376_v15 = vld [vmem:[%s4971_s12 + $0x60] sm:$0xff] }
  0x1a   : > { %343 = vst.msk [vmem:[#allocation2 + $0x108] sm:$0xff] %vm308_vm0, %v7215_v0  ;;  %344 = vst.msk [vmem:[#allocation2 + $0x110] sm:$0xff] %vm308_vm0, %v7215_v0  ;;  %v377_v16 = vld [vmem:[%s4971_s12 + $0x68] sm:$0xff]  ;;  %v378_v17 = vld [vmem:[%s4971_s12 + $0x70] sm:$0xff] }
  0x1b   : > { %346 = vst.msk [vmem:[#allocation2 + $0x120] sm:$0xff] %vm308_vm0, %v7215_v0  ;;  %347 = vst.msk [vmem:[#allocation2 + $0x128] sm:$0xff] %vm308_vm0, %v7215_v0  ;;  %v379_v18 = vld [vmem:[%s4971_s12 + $0x78] sm:$0xff]  ;;  %v380_v19 = vld [vmem:[%s4971_s12 + $0x80] sm:$0xff] }
  0x1c   : > { %349 = vst.msk [vmem:[#allocation2 + $0x138] sm:$0xff] %vm308_vm0, %v7215_v0  ;;  %350 = vst.msk [vmem:[#allocation2 + $0x140] sm:$0xff] %vm308_vm0, %v7215_v0  ;;  %v381_v20 = vld [vmem:[%s4971_s12 + $0x88] sm:$0xff]  ;;  %v382_v21 = vld [vmem:[%s4971_s12 + $0x90] sm:$0xff] }
  0x1d   : > { %352 = vst.msk [vmem:[#allocation2 + $0x150] sm:$0xff] %vm308_vm0, %v7215_v0  ;;  %353 = vst.msk [vmem:[#allocation2 + $0x158] sm:$0xff] %vm308_vm0, %v7215_v0  ;;  %v383_v22 = vld [vmem:[%s4971_s12 + $0x98] sm:$0xff]  ;;  %v384_v23 = vld [vmem:[%s4971_s12 + $0xa0] sm:$0xff] }
  0x1e   : > { %355 = vst.msk [vmem:[#allocation2 + $0x168] sm:$0xff] %vm308_vm0, %v7215_v0  ;;  %356 = vst.msk [vmem:[#allocation2 + $0x170] sm:$0xff] %vm308_vm0, %v7215_v0  ;;  %v385_v24 = vld [vmem:[%s4971_s12 + $0xa8] sm:$0xff]  ;;  %v386_v28 = vld [vmem:[%s4971_s12 + $0xb0] sm:$0xff] }
  0x1f   : > { %358 = vst.msk [vmem:[#allocation2 + $0x180] sm:$0xff] %vm308_vm0, %v7215_v0  ;;  %359 = vst.msk [vmem:[#allocation2 + $0x188] sm:$0xff] %vm308_vm0, %v7215_v0  ;;  %v387_v29 = vld [vmem:[%s4971_s12 + $0xb8] sm:$0xff]  ;;  %v388_v33 = vld [vmem:[%s4971_s12 + $0xc0] sm:$0xff] }
  0x20   : > { %361 = vst.msk [vmem:[#allocation2 + $0x198] sm:$0xff] %vm308_vm0, %v7215_v0  ;;  %362 = vst.msk [vmem:[#allocation2 + $0x1a0] sm:$0xff] %vm308_vm0, %v7215_v0  ;;  %v389_v34 = vld [vmem:[%s4971_s12 + $0xc8] sm:$0xff]  ;;  %v390_v35 = vld [vmem:[%s4971_s12 + $0xd0] sm:$0xff] }
  0x21   : > { %312 = vst.msk [vmem:[#allocation2 + $0x10] sm:$0x3] %vm311_vm1, %v7215_v0  ;;  %315 = vst.msk [vmem:[#allocation2 + $0x28] sm:$0x3] %vm311_vm1, %v7215_v0  ;;  %v391_v36 = vld [vmem:[%s4971_s12 + $0xd8] sm:$0xff]  ;;  %v392_v37 = vld [vmem:[%s4971_s12 + $0xe0] sm:$0xff] }
  0x22   : > { %318 = vst.msk [vmem:[#allocation2 + $0x40] sm:$0x3] %vm311_vm1, %v7215_v0  ;;  %321 = vst.msk [vmem:[#allocation2 + $0x58] sm:$0x3] %vm311_vm1, %v7215_v0  ;;  %v393_v38 = vld [vmem:[%s4971_s12 + $0xe8] sm:$0xff]  ;;  %v429_v45 = vld [vmem:[#allocation2] sm:$0xff] }
  0x23   : > { %324 = vst.msk [vmem:[#allocation2 + $0x70] sm:$0x3] %vm311_vm1, %v7215_v0  ;;  %327 = vst.msk [vmem:[#allocation2 + $0x88] sm:$0x3] %vm311_vm1, %v7215_v0  ;;  %v430_v48 = vld [vmem:[#allocation2 + $0x8] sm:$0xff] }
  0x24   : > { %330 = vst.msk [vmem:[#allocation2 + $0xa0] sm:$0x3] %vm311_vm1, %v7215_v0  ;;  %333 = vst.msk [vmem:[#allocation2 + $0xb8] sm:$0x3] %vm311_vm1, %v7215_v0 }
  0x25   : > { %336 = vst.msk [vmem:[#allocation2 + $0xd0] sm:$0x3] %vm311_vm1, %v7215_v0  ;;  %339 = vst.msk [vmem:[#allocation2 + $0xe8] sm:$0x3] %vm311_vm1, %v7215_v0 }
  0x26   : > { %342 = vst.msk [vmem:[#allocation2 + $0x100] sm:$0x3] %vm311_vm1, %v7215_v0  ;;  %345 = vst.msk [vmem:[#allocation2 + $0x118] sm:$0x3] %vm311_vm1, %v7215_v0 }
  0x27   : > { %348 = vst.msk [vmem:[#allocation2 + $0x130] sm:$0x3] %vm311_vm1, %v7215_v0  ;;  %351 = vst.msk [vmem:[#allocation2 + $0x148] sm:$0x3] %vm311_vm1, %v7215_v0 }
  0x28   : > { %354 = vst.msk [vmem:[#allocation2 + $0x160] sm:$0x3] %vm311_vm1, %v7215_v0  ;;  %357 = vst.msk [vmem:[#allocation2 + $0x178] sm:$0x3] %vm311_vm1, %v7215_v0  ;;  %v494_v8 = vld [vmem:[#allocation2 + $0x9] sm:$0xff] }
  0x29   : > { %360 = vst.msk [vmem:[#allocation2 + $0x190] sm:$0x3] %vm311_vm1, %v7215_v0  ;;  %363 = vst.msk [vmem:[#allocation2 + $0x1a8] sm:$0x3] %vm311_vm1, %v7215_v0  ;;  %559 = vrot.lane.b32.xlu0 %v494_v8, %s4778_s13  ;;  %vm3397_vm1 = vcmask 326912  }
  0x2a   : > { %397 = vst.msk [vmem:[#allocation2 + $0x19] sm:$0xff] %vm308_vm0, %v364_v1  ;;  %398 = vst.msk [vmem:[#allocation2 + $0x21] sm:$0xff] %vm308_vm0, %v365_v2 }
  0x2b   : > { %399 = vst.msk [vmem:[#allocation2 + $0x31] sm:$0xff] %vm308_vm0, %v366_v3  ;;  %400 = vst.msk [vmem:[#allocation2 + $0x39] sm:$0xff] %vm308_vm0, %v367_v4 }
  0x2c   : > { %401 = vst.msk [vmem:[#allocation2 + $0x49] sm:$0xff] %vm308_vm0, %v368_v5  ;;  %402 = vst.msk [vmem:[#allocation2 + $0x51] sm:$0xff] %vm308_vm0, %v369_v6 }
  0x2d   : > { %403 = vst.msk [vmem:[#allocation2 + $0x61] sm:$0xff] %vm308_vm0, %v370_v9  ;;  %404 = vst.msk [vmem:[#allocation2 + $0x69] sm:$0xff] %vm308_vm0, %v371_v10 }
  0x2e   : > { %405 = vst.msk [vmem:[#allocation2 + $0x79] sm:$0xff] %vm308_vm0, %v372_v11  ;;  %406 = vst.msk [vmem:[#allocation2 + $0x81] sm:$0xff] %vm308_vm0, %v373_v12 }
  0x2f   : > { %407 = vst.msk [vmem:[#allocation2 + $0x91] sm:$0xff] %vm308_vm0, %v374_v13  ;;  %408 = vst.msk [vmem:[#allocation2 + $0x99] sm:$0xff] %vm308_vm0, %v375_v14 }
  0x30   : > { %409 = vst.msk [vmem:[#allocation2 + $0xa9] sm:$0xff] %vm308_vm0, %v376_v15  ;;  %410 = vst.msk [vmem:[#allocation2 + $0xb1] sm:$0xff] %vm308_vm0, %v377_v16 }
  0x31   : > { %411 = vst.msk [vmem:[#allocation2 + $0xc1] sm:$0xff] %vm308_vm0, %v378_v17  ;;  %412 = vst.msk [vmem:[#allocation2 + $0xc9] sm:$0xff] %vm308_vm0, %v379_v18  ;;  %v5016_v25 = vld [vmem:[#allocation2 + $0x19] sm:$0xff]  ;;  %v5025_v27 = vld [vmem:[#allocation2 + $0x21] sm:$0xff] }
  0x32   : > { %413 = vst.msk [vmem:[#allocation2 + $0xd9] sm:$0xff] %vm308_vm0, %v380_v19  ;;  %414 = vst.msk [vmem:[#allocation2 + $0xe1] sm:$0xff] %vm308_vm0, %v381_v20  ;;  %v5018_v26 = vld [vmem:[#allocation2 + $0x31] sm:$0xff]  ;;  %561 = vrot.lane.b32.xlu1 %v5016_v25, %s4778_s13  ;;  %v5037_v31 = vld [vmem:[#allocation2 + $0x39] sm:$0xff] }
  0x33   : > { %415 = vst.msk [vmem:[#allocation2 + $0xf1] sm:$0xff] %vm308_vm0, %v382_v21  ;;  %416 = vst.msk [vmem:[#allocation2 + $0xf9] sm:$0xff] %vm308_vm0, %v383_v22  ;;  %565 = vrot.lane.b32.xlu0 %v5018_v26, %s4778_s13  ;;  %v5033_v30 = vld [vmem:[#allocation2 + $0x49] sm:$0xff]  ;;  %v5054_v39 = vld [vmem:[#allocation2 + $0x51] sm:$0xff] }
  0x34   : > { %417 = vst.msk [vmem:[#allocation2 + $0x109] sm:$0xff] %vm308_vm0, %v384_v23  ;;  %418 = vst.msk [vmem:[#allocation2 + $0x111] sm:$0xff] %vm308_vm0, %v385_v24  ;;  %v5041_v32 = vld [vmem:[#allocation2 + $0x61] sm:$0xff]  ;;  %v5065_v41 = vld [vmem:[#allocation2 + $0x69] sm:$0xff] }
  0x35   : > { %419 = vst.msk [vmem:[#allocation2 + $0x121] sm:$0xff] %vm308_vm0, %v386_v28  ;;  %420 = vst.msk [vmem:[#allocation2 + $0x129] sm:$0xff] %vm308_vm0, %v387_v29  ;;  %v5061_v40 = vld [vmem:[#allocation2 + $0x79] sm:$0xff]  ;;  %v5073_v43 = vld [vmem:[#allocation2 + $0x81] sm:$0xff] }
  0x36   : > { %563 = vrot.lane.b32.xlu1 %v5025_v27, %s4778_s13  ;;  %421 = vst.msk [vmem:[#allocation2 + $0x139] sm:$0xff] %vm308_vm0, %v388_v33  ;;  %422 = vst.msk [vmem:[#allocation2 + $0x141] sm:$0xff] %vm308_vm0, %v389_v34  ;;  %v5069_v42 = vld [vmem:[#allocation2 + $0x91] sm:$0xff]  ;;  %v5081_v46 = vld [vmem:[#allocation2 + $0x99] sm:$0xff] }
  0x37   : > { %569 = vrot.lane.b32.xlu0 %v5033_v30, %s4778_s13  ;;  %423 = vst.msk [vmem:[#allocation2 + $0x151] sm:$0xff] %vm308_vm0, %v390_v35  ;;  %424 = vst.msk [vmem:[#allocation2 + $0x159] sm:$0xff] %vm308_vm0, %v391_v36  ;;  %v5077_v44 = vld [vmem:[#allocation2 + $0xa9] sm:$0xff]  ;;  %v5084_v47 = vld [vmem:[#allocation2 + $0x18] sm:$0xff] }
  0x38   : > { %425 = vst.msk [vmem:[#allocation2 + $0x169] sm:$0xff] %vm308_vm0, %v392_v37  ;;  %426 = vst.msk [vmem:[#allocation2 + $0x171] sm:$0xff] %vm308_vm0, %v393_v38  ;;  %v5091_v49 = vld [vmem:[#allocation2 + $0x20] sm:$0xff]  ;;  %v5093_v50 = vld [vmem:[#allocation2 + $0x30] sm:$0xff] }
  0x39   : > { %461 = vst.msk [vmem:[#allocation4] sm:$0xff] %vm308_vm0, %v429_v45  ;;  %463 = vst.msk [vmem:[#allocation4 + $0x10] sm:$0xff] %vm308_vm0, %v5084_v47  ;;  %v5095_v51 = vld [vmem:[#allocation2 + $0xc1] sm:$0xff]  ;;  %v5101_v52 = vld [vmem:[#allocation2 + $0x38] sm:$0xff] }
  0x3a   : > { %567 = vrot.lane.b32.xlu1 %v5037_v31, %s4778_s13  ;;  %462 = vst.msk [vmem:[#allocation4 + $0x8] sm:$0xff] %vm308_vm0, %v430_v48  ;;  %464 = vst.msk [vmem:[#allocation4 + $0x18] sm:$0xff] %vm308_vm0, %v5091_v49  ;;  %v5105_v53 = vld [vmem:[#allocation2 + $0xb1] sm:$0xff]  ;;  %v5109_v54 = vld [vmem:[#allocation2 + $0x48] sm:$0xff] }
  0x3b   : > { %573 = vrot.lane.b32.xlu0 %v5041_v32, %s4778_s13  ;;  %465 = vst.msk [vmem:[#allocation4 + $0x20] sm:$0xff] %vm308_vm0, %v5093_v50  ;;  %466 = vst.msk [vmem:[#allocation4 + $0x28] sm:$0xff] %vm308_vm0, %v5101_v52  ;;  %v5111_v55 = vld [vmem:[#allocation2 + $0x50] sm:$0xff]  ;;  %v5113_v56 = vld [vmem:[#allocation2 + $0xd9] sm:$0xff] }
  0x3c   : > { %467 = vst.msk [vmem:[#allocation4 + $0x30] sm:$0xff] %vm308_vm0, %v5109_v54  ;;  %468 = vst.msk [vmem:[#allocation4 + $0x38] sm:$0xff] %vm308_vm0, %v5111_v55  ;;  %v5119_v57 = vld [vmem:[#allocation2 + $0x60] sm:$0xff]  ;;  %v5121_v58 = vld [vmem:[#allocation2 + $0x68] sm:$0xff] }
  0x3d   : > { %v5123_v59 = vld [vmem:[#allocation2 + $0x78] sm:$0xff]  ;;  %469 = vst.msk [vmem:[#allocation4 + $0x40] sm:$0xff] %vm308_vm0, %v5119_v57  ;;  %470 = vst.msk [vmem:[#allocation4 + $0x48] sm:$0xff] %vm308_vm0, %v5121_v58  ;;  %v5133_v60 = vld [vmem:[#allocation2 + $0x80] sm:$0xff] }
  0x3e   : > { %571 = vrot.lane.b32.xlu1 %v5054_v39, %s4778_s13  ;;  %471 = vst.msk [vmem:[#allocation4 + $0x50] sm:$0xff] %vm308_vm0, %v5123_v59  ;;  %v5135_v61 = vld [vmem:[#allocation2 + $0x90] sm:$0xff]  ;;  %v5137_v62 = vld [vmem:[#allocation2 + $0x98] sm:$0xff]  ;;  %472 = vst.msk [vmem:[#allocation4 + $0x58] sm:$0xff] %vm308_vm0, %v5133_v60 }
  0x3f   : > { %577 = vrot.lane.b32.xlu0 %v5061_v40, %s4778_s13  ;;  %v5139_v63 = vld [vmem:[#allocation2 + $0xc9] sm:$0xff]  ;;  %473 = vst.msk [vmem:[#allocation4 + $0x60] sm:$0xff] %vm308_vm0, %v5135_v61  ;;  %474 = vst.msk [vmem:[#allocation4 + $0x68] sm:$0xff] %vm308_vm0, %v5137_v62  ;;  %v5151_v3 = vld [vmem:[#allocation2 + $0xc0] sm:$0xff] }
  0x40   : > { %v5147_v1 = vld [vmem:[#allocation2 + $0xa8] sm:$0xff]  ;;  %v5149_v2 = vld [vmem:[#allocation2 + $0xb0] sm:$0xff]  ;;  %477 = vst.msk [vmem:[#allocation4 + $0x80] sm:$0xff] %vm308_vm0, %v5151_v3  ;;  %v5163_v5 = vld [vmem:[#allocation2 + $0xd8] sm:$0xff] }
  0x41   : > { %475 = vst.msk [vmem:[#allocation4 + $0x70] sm:$0xff] %vm308_vm0, %v5147_v1  ;;  %476 = vst.msk [vmem:[#allocation4 + $0x78] sm:$0xff] %vm308_vm0, %v5149_v2  ;;  %v5161_v4 = vld [vmem:[#allocation2 + $0xc8] sm:$0xff]  ;;  %v5165_v6 = vld [vmem:[#allocation2 + $0xe0] sm:$0xff] }
  0x42   : > { %575 = vrot.lane.b32.xlu1 %v5065_v41, %s4778_s13  ;;  %478 = vst.msk [vmem:[#allocation4 + $0x88] sm:$0xff] %vm308_vm0, %v5161_v4  ;;  %479 = vst.msk [vmem:[#allocation4 + $0x90] sm:$0xff] %vm308_vm0, %v5163_v5  ;;  %v5173_v7 = vld [vmem:[#allocation2 + $0xf0] sm:$0xff]  ;;  %v5175_v8 = vld [vmem:[#allocation2 + $0xf8] sm:$0xff] }
  0x43   : > { %581 = vrot.lane.b32.xlu0 %v5069_v42, %s4778_s13  ;;  %480 = vst.msk [vmem:[#allocation4 + $0x98] sm:$0xff] %vm308_vm0, %v5165_v6  ;;  %v5177_v9 = vld [vmem:[#allocation2 + $0x108] sm:$0xff]  ;;  %481 = vst.msk [vmem:[#allocation4 + $0xa0] sm:$0xff] %vm308_vm0, %v5173_v7  ;;  %v5187_v10 = vld [vmem:[#allocation2 + $0x110] sm:$0xff] }
  0x44   : > { %482 = vst.msk [vmem:[#allocation4 + $0xa8] sm:$0xff] %vm308_vm0, %v5175_v8  ;;  %483 = vst.msk [vmem:[#allocation4 + $0xb0] sm:$0xff] %vm308_vm0, %v5177_v9  ;;  %v5189_v11 = vld [vmem:[#allocation2 + $0xf1] sm:$0xff]  ;;  %v5193_v12 = vld [vmem:[#allocation2 + $0x120] sm:$0xff] }
  0x45   : > { %484 = vst.msk [vmem:[#allocation4 + $0xb8] sm:$0xff] %vm308_vm0, %v5187_v10  ;;  %485 = vst.msk [vmem:[#allocation4 + $0xc0] sm:$0xff] %vm308_vm0, %v5193_v12  ;;  %v5199_v13 = vld [vmem:[#allocation2 + $0x128] sm:$0xff]  ;;  %v5209_v16 = vld [vmem:[#allocation2 + $0x138] sm:$0xff] }
  0x46   : > { %579 = vrot.lane.b32.xlu1 %v5073_v43, %s4778_s13  ;;  %v5201_v14 = vld [vmem:[#allocation2 + $0xe1] sm:$0xff]  ;;  %486 = vst.msk [vmem:[#allocation4 + $0xc8] sm:$0xff] %vm308_vm0, %v5199_v13  ;;  %v5207_v15 = vld [vmem:[#allocation2 + $0x109] sm:$0xff]  ;;  %487 = vst.msk [vmem:[#allocation4 + $0xd0] sm:$0xff] %vm308_vm0, %v5209_v16 }
  0x47   : > { %585 = vrot.lane.b32.xlu0 %v5077_v44, %s4778_s13  ;;  %v5215_v17 = vld [vmem:[#allocation2 + $0x140] sm:$0xff]  ;;  %v5225_v20 = vld [vmem:[#allocation2 + $0x150] sm:$0xff]  ;;  %v5231_v21 = vld [vmem:[#allocation2 + $0x158] sm:$0xff] }
  0x48   : > { %v5217_v18 = vld [vmem:[#allocation2 + $0xf9] sm:$0xff]  ;;  %488 = vst.msk [vmem:[#allocation4 + $0xd8] sm:$0xff] %vm308_vm0, %v5215_v17  ;;  %v5223_v19 = vld [vmem:[#allocation2 + $0x121] sm:$0xff]  ;;  %489 = vst.msk [vmem:[#allocation4 + $0xe0] sm:$0xff] %vm308_vm0, %v5225_v20 }
  0x49   : > { %v5233_v22 = vld [vmem:[#allocation2 + $0x111] sm:$0xff]  ;;  %490 = vst.msk [vmem:[#allocation4 + $0xe8] sm:$0xff] %vm308_vm0, %v5231_v21  ;;  %v5239_v23 = vld [vmem:[#allocation2 + $0x139] sm:$0xff]  ;;  %v5241_v24 = vld [vmem:[#allocation2 + $0x168] sm:$0xff] }
  0x4a   : > { %583 = vrot.lane.b32.xlu1 %v5081_v46, %s4778_s13  ;;  %491 = vst.msk [vmem:[#allocation4 + $0xf0] sm:$0xff] %vm308_vm0, %v5241_v24  ;;  %v5247_v28 = vld [vmem:[#allocation2 + $0x170] sm:$0xff]  ;;  %v5259_v34 = vld [vmem:[#allocation2 + $0x141] sm:$0xff]  ;;  %v395_v37 = vld [vmem:[%s4971_s12 + $0xf8] sm:$0xff] }
  0x4b   : > { %589 = vrot.lane.b32.xlu0 %v5095_v51, %s4778_s13  ;;  %v5249_v29 = vld [vmem:[#allocation2 + $0x129] sm:$0xff]  ;;  %492 = vst.msk [vmem:[#allocation4 + $0xf8] sm:$0xff] %vm308_vm0, %v5247_v28  ;;  %v5255_v33 = vld [vmem:[#allocation2 + $0x151] sm:$0xff]  ;;  %7255 = vst [vmem:[#allocation7_spill] sm:$0xff] %v5259_v34 }
  0x4c   : > { %v394_v35 = vld [vmem:[%s4971_s12 + $0xf0] sm:$0xff]  ;;  %428 = vst.msk [vmem:[#allocation2 + $0x189] sm:$0xff] %vm308_vm0, %v395_v37  ;;  %v5271_v38 = vld [vmem:[#allocation2 + $0x159] sm:$0xff]  ;;  %v686_v45 = vld [vmem:[#allocation2 + $0x2] sm:$0xff] }
  0x4d   : > { %427 = vst.msk [vmem:[#allocation2 + $0x181] sm:$0xff] %vm308_vm0, %v394_v35  ;;  %v5265_v36 = vld [vmem:[#allocation2 + $0x169] sm:$0xff]  ;;  %7257 = vst [vmem:[#allocation9_spill] sm:$0xff] %v5271_v38  ;;  %v5277_v48 = vld [vmem:[#allocation2 + $0x171] sm:$0xff]  ;;  %vm3204_vm0 = vcmask 261312  }
  0x4e   : > { %587 = vrot.lane.b32.xlu1 %v5105_v53, %s4778_s13  ;;  %7256 = vst [vmem:[#allocation8_spill] sm:$0xff] %v5265_v36  ;;  %7258 = vst [vmem:[#allocation10_spill] sm:$0xff] %v5277_v48  ;;  %v5280_v35 = vld [vmem:[#allocation2 + $0x1a] sm:$0xff]  ;;  %v687_v37 = vld [vmem:[#allocation2 + $0xa] sm:$0xff] }
  0x4f   : > { %593 = vrot.lane.b32.xlu0 %v5113_v56, %s4778_s13  ;;  %7259 = vst [vmem:[#allocation11_spill] sm:$0xff] %v5280_v35  ;;  %v5286_v0 = vld [vmem:[#allocation2 + $0x32] sm:$0xff] }
  0x50   : > { %7260 = vst [vmem:[#allocation12_spill] sm:$0xff] %v5286_v0 }
  0x52   : > { %591 = vrot.lane.b32.xlu1 %v5139_v63, %s4778_s13 }
  0x53   : > { %597 = vrot.lane.b32.xlu0 %v5189_v11, %s4778_s13 }
  0x56   : > { %595 = vrot.lane.b32.xlu1 %v5201_v14, %s4778_s13 }
  0x57   : > { %601 = vrot.lane.b32.xlu0 %v5207_v15, %s4778_s13 }
  0x5a   : > { %599 = vrot.lane.b32.xlu1 %v5217_v18, %s4778_s13 }
  0x5b   : > { %605 = vrot.lane.b32.xlu0 %v5223_v19, %s4778_s13 }
  0x5e   : > { %603 = vrot.lane.b32.xlu1 %v5233_v22, %s4778_s13 }
  0x5f   : > { %609 = vrot.lane.b32.xlu0 %v5239_v23, %s4778_s13 }
  0x62   : > { %607 = vrot.lane.b32.xlu1 %v5249_v29, %s4778_s13 }
  0x63   : > { %613 = vrot.lane.b32.xlu0 %v5255_v33, %s4778_s13 }
  0x66   : > { %611 = vrot.lane.b32.xlu1 %v5259_v34, %s4778_s13 }
  0x67   : > { %617 = vrot.lane.b32.xlu0 %v5265_v36, %s4778_s13  ;;  %v5289_v36 = vld [vmem:[#allocation2 + $0x22] sm:$0xff] }
  0x68   : > { %7261 = vst [vmem:[#allocation13_spill] sm:$0xff] %v5289_v36 }
  0x6a   : > { %615 = vrot.lane.b32.xlu1 %v5271_v38, %s4778_s13  ;;  %v5293_v38 = vld [vmem:[#allocation2 + $0x4a] sm:$0xff] }
  0x6b   : > { %750 = vrot.lane.b32.xlu0 %v686_v45, %s4779_s14  ;;  %7262 = vst [vmem:[#allocation14_spill] sm:$0xff] %v5293_v38  ;;  %v5297_v45 = vld [vmem:[#allocation2 + $0x3a] sm:$0xff] }
  0x6c   : > { %7263 = vst [vmem:[#allocation15_spill] sm:$0xff] %v5297_v45 }
  0x6e   : > { %619 = vrot.lane.b32.xlu1 %v5277_v48, %s4778_s13  ;;  %v5387_v48 = vld [vmem:[#allocation2 + $0x142] sm:$0xff] }
  0x6f   : > { %754 = vrot.lane.b32.xlu0 %v5280_v35, %s4779_s14  ;;  %v5301_v35 = vld [vmem:[#allocation2 + $0x62] sm:$0xff]  ;;  %7284 = vst [vmem:[#allocation36_spill] sm:$0xff] %v5387_v48 }
  0x70   : > { %7264 = vst [vmem:[#allocation16_spill] sm:$0xff] %v5301_v35 }
  0x72   : > { %752 = vrot.lane.b32.xlu1 %v687_v37, %s4779_s14  ;;  %v5305_v37 = vld [vmem:[#allocation2 + $0x52] sm:$0xff] }
  0x73   : > { %758 = vrot.lane.b32.xlu0 %v5286_v0, %s4779_s14  ;;  %7265 = vst [vmem:[#allocation17_spill] sm:$0xff] %v5305_v37  ;;  %v5309_v0 = vld [vmem:[#allocation2 + $0x7a] sm:$0xff] }
  0x74   : > { %7266 = vst [vmem:[#allocation18_spill] sm:$0xff] %v5309_v0 }
  0x76   : > { %756 = vrot.lane.b32.xlu1 %v5289_v36, %s4779_s14  ;;  %v5313_v36 = vld [vmem:[#allocation2 + $0x6a] sm:$0xff] }
  0x77   : > { %762 = vrot.lane.b32.xlu0 %v5293_v38, %s4779_s14  ;;  %7267 = vst [vmem:[#allocation19_spill] sm:$0xff] %v5313_v36  ;;  %v5317_v38 = vld [vmem:[#allocation2 + $0x92] sm:$0xff] }
  0x78   : > { %7268 = vst [vmem:[#allocation20_spill] sm:$0xff] %v5317_v38 }
  0x7a   : > { %760 = vrot.lane.b32.xlu1 %v5297_v45, %s4779_s14  ;;  %v5321_v45 = vld [vmem:[#allocation2 + $0x82] sm:$0xff] }
  0x7b   : > { %766 = vrot.lane.b32.xlu0 %v5301_v35, %s4779_s14  ;;  %7269 = vst [vmem:[#allocation21_spill] sm:$0xff] %v5321_v45  ;;  %v5325_v35 = vld [vmem:[#allocation2 + $0xaa] sm:$0xff] }
  0x7c   : > { %7270 = vst [vmem:[#allocation22_spill] sm:$0xff] %v5325_v35 }
  0x7e   : > { %764 = vrot.lane.b32.xlu1 %v5305_v37, %s4779_s14  ;;  %v5329_v37 = vld [vmem:[#allocation2 + $0x9a] sm:$0xff] }
  0x7f   : > { %770 = vrot.lane.b32.xlu0 %v5309_v0, %s4779_s14  ;;  %7271 = vst [vmem:[#allocation23_spill] sm:$0xff] %v5329_v37  ;;  %v5333_v0 = vld [vmem:[#allocation2 + $0xc2] sm:$0xff] }
  0x80   : > { %7272 = vst [vmem:[#allocation24_spill] sm:$0xff] %v5333_v0 }
  0x82   : > { %768 = vrot.lane.b32.xlu1 %v5313_v36, %s4779_s14  ;;  %v5337_v36 = vld [vmem:[#allocation2 + $0xb2] sm:$0xff] }
  0x83   : > { %774 = vrot.lane.b32.xlu0 %v5317_v38, %s4779_s14  ;;  %7273 = vst [vmem:[#allocation25_spill] sm:$0xff] %v5337_v36  ;;  %v5341_v38 = vld [vmem:[#allocation2 + $0xda] sm:$0xff] }
  0x84   : > { %7274 = vst [vmem:[#allocation26_spill] sm:$0xff] %v5341_v38 }
  0x86   : > { %772 = vrot.lane.b32.xlu1 %v5321_v45, %s4779_s14  ;;  %v5345_v45 = vld [vmem:[#allocation2 + $0xca] sm:$0xff] }
  0x87   : > { %778 = vrot.lane.b32.xlu0 %v5325_v35, %s4779_s14  ;;  %7275 = vst [vmem:[#allocation27_spill] sm:$0xff] %v5345_v45  ;;  %v5349_v35 = vld [vmem:[#allocation2 + $0xf2] sm:$0xff] }
  0x88   : > { %7276 = vst [vmem:[#allocation28_spill] sm:$0xff] %v5349_v35 }
  0x8a   : > { %776 = vrot.lane.b32.xlu1 %v5329_v37, %s4779_s14  ;;  %v5353_v37 = vld [vmem:[#allocation2 + $0xe2] sm:$0xff] }
  0x8b   : > { %782 = vrot.lane.b32.xlu0 %v5333_v0, %s4779_s14  ;;  %7277 = vst [vmem:[#allocation29_spill] sm:$0xff] %v5353_v37  ;;  %v5357_v0 = vld [vmem:[#allocation2 + $0x10a] sm:$0xff] }
  0x8c   : > { %7278 = vst [vmem:[#allocation30_spill] sm:$0xff] %v5357_v0 }
  0x8e   : > { %780 = vrot.lane.b32.xlu1 %v5337_v36, %s4779_s14  ;;  %v5361_v36 = vld [vmem:[#allocation2 + $0xfa] sm:$0xff] }
  0x8f   : > { %786 = vrot.lane.b32.xlu0 %v5341_v38, %s4779_s14  ;;  %7279 = vst [vmem:[#allocation31_spill] sm:$0xff] %v5361_v36  ;;  %v5365_v38 = vld [vmem:[#allocation2 + $0x122] sm:$0xff] }
  0x90   : > { %7280 = vst [vmem:[#allocation32_spill] sm:$0xff] %v5365_v38 }
  0x92   : > { %784 = vrot.lane.b32.xlu1 %v5345_v45, %s4779_s14  ;;  %v5369_v45 = vld [vmem:[#allocation2 + $0x112] sm:$0xff] }
  0x93   : > { %790 = vrot.lane.b32.xlu0 %v5349_v35, %s4779_s14  ;;  %7281 = vst [vmem:[#allocation33_spill] sm:$0xff] %v5369_v45  ;;  %v5373_v35 = vld [vmem:[#allocation2 + $0x13a] sm:$0xff] }
  0x94   : > { %7282 = vst [vmem:[#allocation34_spill] sm:$0xff] %v5373_v35 }
  0x96   : > { %788 = vrot.lane.b32.xlu1 %v5353_v37, %s4779_s14  ;;  %v558_v37 = vpop.permute.xlu0 %557 }
  0x97   : > { %794 = vrot.lane.b32.xlu0 %v5357_v0, %s4779_s14  ;;  %654 = vst.msk [vmem:[#allocation4] sm:$0xff] %vm653_vm2, %v558_v37  ;;  %v5378_v0 = vld [vmem:[#allocation2 + $0x12a] sm:$0xff] }
  0x98   : > { %7283 = vst [vmem:[#allocation35_spill] sm:$0xff] %v5378_v0  ;;  %v5392_v37 = vld [vmem:[#allocation2 + $0x16a] sm:$0xff] }
  0x9a   : > { %792 = vrot.lane.b32.xlu1 %v5361_v36, %s4779_s14  ;;  %v5382_v36 = vld [vmem:[#allocation2 + $0x152] sm:$0xff] }
  0x9b   : > { %798 = vrot.lane.b32.xlu0 %v5365_v38, %s4779_s14  ;;  %v560_v38 = vpop.permute.xlu0 %559 }
  0x9c   : > { %655 = vst.msk [vmem:[#allocation4 + $0x8] sm:$0xff] %vm653_vm2, %v560_v38  ;;  %v5405_v38 = vld [vmem:[#allocation2 + $0x172] sm:$0xff] }
  0x9e   : > { %796 = vrot.lane.b32.xlu1 %v5369_v45, %s4779_s14 }
  0x9f   : > { %802 = vrot.lane.b32.xlu0 %v5373_v35, %s4779_s14 }
  0xa2   : > { %800 = vrot.lane.b32.xlu1 %v5378_v0, %s4779_s14  ;;  %v5397_v0 = vld [vmem:[#allocation2 + $0x15a] sm:$0xff] }
  0xa3   : > { %806 = vrot.lane.b32.xlu0 %v5382_v36, %s4779_s14 }
  0xa4   : > { %v562_v34 = vpop.permute.xlu1 %561 }
  0xa5   : > { %656 = vst.msk [vmem:[#allocation4 + $0x10] sm:$0xff] %vm653_vm2, %v562_v34  ;;  %v566_v35 = vpop.permute.xlu0 %565 }
  0xa6   : > { %804 = vrot.lane.b32.xlu1 %v5387_v48, %s4779_s14  ;;  %658 = vst.msk [vmem:[#allocation4 + $0x20] sm:$0xff] %vm653_vm2, %v566_v35 }
  0xa7   : > { %810 = vrot.lane.b32.xlu0 %v5392_v37, %s4779_s14 }
  0xa8   : > { %v564_v45 = vpop.permute.xlu1 %563 }
  0xa9   : > { %657 = vst.msk [vmem:[#allocation4 + $0x18] sm:$0xff] %vm653_vm2, %v564_v45  ;;  %v570_v34 = vpop.permute.xlu0 %569 }
  0xaa   : > { %808 = vrot.lane.b32.xlu1 %v5397_v0, %s4779_s14  ;;  %660 = vst.msk [vmem:[#allocation4 + $0x30] sm:$0xff] %vm653_vm2, %v570_v34 }
  0xab   : > { %943 = vrot.lane.b32.xlu0 %v5084_v47, %s4780_s15 }
  0xac   : > { %v568_v48 = vpop.permute.xlu1 %567 }
  0xad   : > { %659 = vst.msk [vmem:[#allocation4 + $0x28] sm:$0xff] %vm653_vm2, %v568_v48  ;;  %v574_v35 = vpop.permute.xlu0 %573 }
  0xae   : > { %812 = vrot.lane.b32.xlu1 %v5405_v38, %s4779_s14  ;;  %662 = vst.msk [vmem:[#allocation4 + $0x40] sm:$0xff] %vm653_vm2, %v574_v35 }
  0xaf   : > { %947 = vrot.lane.b32.xlu0 %v5093_v50, %s4780_s15 }
  0xb0   : > { %v572_v45 = vpop.permute.xlu1 %571 }
  0xb1   : > { %661 = vst.msk [vmem:[#allocation4 + $0x38] sm:$0xff] %vm653_vm2, %v572_v45  ;;  %v578_v34 = vpop.permute.xlu0 %577 }
  0xb2   : > { %945 = vrot.lane.b32.xlu1 %v5091_v49, %s4780_s15  ;;  %664 = vst.msk [vmem:[#allocation4 + $0x50] sm:$0xff] %vm653_vm2, %v578_v34 }
  0xb3   : > { %951 = vrot.lane.b32.xlu0 %v5109_v54, %s4780_s15 }
  0xb4   : > { %v576_v47 = vpop.permute.xlu1 %575 }
  0xb5   : > { %663 = vst.msk [vmem:[#allocation4 + $0x48] sm:$0xff] %vm653_vm2, %v576_v47  ;;  %v582_v48 = vpop.permute.xlu0 %581 }
  0xb6   : > { %949 = vrot.lane.b32.xlu1 %v5101_v52, %s4780_s15  ;;  %666 = vst.msk [vmem:[#allocation4 + $0x60] sm:$0xff] %vm653_vm2, %v582_v48 }
  0xb7   : > { %955 = vrot.lane.b32.xlu0 %v5119_v57, %s4780_s15 }
  0xb8   : > { %v580_v35 = vpop.permute.xlu1 %579 }
  0xb9   : > { %665 = vst.msk [vmem:[#allocation4 + $0x58] sm:$0xff] %vm653_vm2, %v580_v35  ;;  %v586_v49 = vpop.permute.xlu0 %585 }
  0xba   : > { %953 = vrot.lane.b32.xlu1 %v5111_v55, %s4780_s15  ;;  %668 = vst.msk [vmem:[#allocation4 + $0x70] sm:$0xff] %vm653_vm2, %v586_v49 }
  0xbb   : > { %959 = vrot.lane.b32.xlu0 %v5123_v59, %s4780_s15 }
  0xbc   : > { %v584_v45 = vpop.permute.xlu1 %583 }
  0xbd   : > { %667 = vst.msk [vmem:[#allocation4 + $0x68] sm:$0xff] %vm653_vm2, %v584_v45  ;;  %v590_v34 = vpop.permute.xlu0 %589 }
  0xbe   : > { %957 = vrot.lane.b32.xlu1 %v5121_v58, %s4780_s15  ;;  %670 = vst.msk [vmem:[#allocation4 + $0x80] sm:$0xff] %vm653_vm2, %v590_v34 }
  0xbf   : > { %963 = vrot.lane.b32.xlu0 %v5135_v61, %s4780_s15 }
  0xc0   : > { %v588_v47 = vpop.permute.xlu1 %587 }
  0xc1   : > { %669 = vst.msk [vmem:[#allocation4 + $0x78] sm:$0xff] %vm653_vm2, %v588_v47  ;;  %v594_v48 = vpop.permute.xlu0 %593 }
  0xc2   : > { %961 = vrot.lane.b32.xlu1 %v5133_v60, %s4780_s15  ;;  %672 = vst.msk [vmem:[#allocation4 + $0x90] sm:$0xff] %vm653_vm2, %v594_v48 }
  0xc3   : > { %967 = vrot.lane.b32.xlu0 %v5147_v1, %s4780_s15 }
  0xc4   : > { %v592_v35 = vpop.permute.xlu1 %591 }
  0xc5   : > { %671 = vst.msk [vmem:[#allocation4 + $0x88] sm:$0xff] %vm653_vm2, %v592_v35  ;;  %v598_v49 = vpop.permute.xlu0 %597 }
  0xc6   : > { %965 = vrot.lane.b32.xlu1 %v5137_v62, %s4780_s15  ;;  %674 = vst.msk [vmem:[#allocation4 + $0xa0] sm:$0xff] %vm653_vm2, %v598_v49 }
  0xc7   : > { %971 = vrot.lane.b32.xlu0 %v5151_v3, %s4780_s15 }
  0xc8   : > { %v596_v45 = vpop.permute.xlu1 %595 }
  0xc9   : > { %673 = vst.msk [vmem:[#allocation4 + $0x98] sm:$0xff] %vm653_vm2, %v596_v45  ;;  %v602_v34 = vpop.permute.xlu0 %601 }
  0xca   : > { %969 = vrot.lane.b32.xlu1 %v5149_v2, %s4780_s15  ;;  %676 = vst.msk [vmem:[#allocation4 + $0xb0] sm:$0xff] %vm653_vm2, %v602_v34 }
  0xcb   : > { %975 = vrot.lane.b32.xlu0 %v5163_v5, %s4780_s15 }
  0xcc   : > { %v600_v47 = vpop.permute.xlu1 %599 }
  0xcd   : > { %675 = vst.msk [vmem:[#allocation4 + $0xa8] sm:$0xff] %vm653_vm2, %v600_v47  ;;  %v606_v48 = vpop.permute.xlu0 %605 }
  0xce   : > { %973 = vrot.lane.b32.xlu1 %v5161_v4, %s4780_s15  ;;  %678 = vst.msk [vmem:[#allocation4 + $0xc0] sm:$0xff] %vm653_vm2, %v606_v48 }
  0xcf   : > { %979 = vrot.lane.b32.xlu0 %v5173_v7, %s4780_s15 }
  0xd0   : > { %v604_v35 = vpop.permute.xlu1 %603 }
  0xd1   : > { %677 = vst.msk [vmem:[#allocation4 + $0xb8] sm:$0xff] %vm653_vm2, %v604_v35  ;;  %v610_v49 = vpop.permute.xlu0 %609 }
  0xd2   : > { %977 = vrot.lane.b32.xlu1 %v5165_v6, %s4780_s15  ;;  %680 = vst.msk [vmem:[#allocation4 + $0xd0] sm:$0xff] %vm653_vm2, %v610_v49  ;;  %v7286_v49 = vld [vmem:[#allocation8_spill] sm:$0xff] }
  0xd3   : > { %983 = vrot.lane.b32.xlu0 %v5177_v9, %s4780_s15 }
  0xd4   : > { %v608_v5 = vpop.permute.xlu1 %607 }
  0xd5   : > { %679 = vst.msk [vmem:[#allocation4 + $0xc8] sm:$0xff] %vm653_vm2, %v608_v5  ;;  %v614_v4 = vpop.permute.xlu0 %613  ;;  %v7287_v5 = vld [vmem:[#allocation9_spill] sm:$0xff] }
  0xd6   : > { %981 = vrot.lane.b32.xlu1 %v5175_v8, %s4780_s15  ;;  %682 = vst.msk [vmem:[#allocation4 + $0xe0] sm:$0xff] %vm653_vm2, %v614_v4 }
  0xd7   : > { %987 = vrot.lane.b32.xlu0 %v5193_v12, %s4780_s15 }
  0xd8   : > { %v612_v7 = vpop.permute.xlu1 %611 }
  0xd9   : > { %681 = vst.msk [vmem:[#allocation4 + $0xd8] sm:$0xff] %vm653_vm2, %v612_v7  ;;  %v618_v6 = vpop.permute.xlu0 %617  ;;  %v7288_v7 = vld [vmem:[#allocation10_spill] sm:$0xff] }
  0xda   : > { %985 = vrot.lane.b32.xlu1 %v5187_v10, %s4780_s15  ;;  %684 = vst.msk [vmem:[#allocation4 + $0xf0] sm:$0xff] %vm653_vm2, %v618_v6 }
  0xdb   : > { %991 = vrot.lane.b32.xlu0 %v5209_v16, %s4780_s15 }
  0xdc   : > { %v616_v9 = vpop.permute.xlu1 %615 }
  0xdd   : > { %683 = vst.msk [vmem:[#allocation4 + $0xe8] sm:$0xff] %vm653_vm2, %v616_v9  ;;  %v751_v8 = vpop.permute.xlu0 %750  ;;  %v1103_v9 = vld [vmem:[#allocation2 + $0x189] sm:$0xff] }
  0xde   : > { %989 = vrot.lane.b32.xlu1 %v5199_v13, %s4780_s15  ;;  %847 = vst.msk [vmem:[#allocation4] sm:$0xff] %vm846_vm3, %v751_v8  ;;  %v909_v13 = vld [vmem:[#allocation2 + $0x180] sm:$0xff] }
  0xdf   : > { %995 = vrot.lane.b32.xlu0 %v5225_v20, %s4780_s15 }
  0xe0   : > { %v620_v12 = vpop.permute.xlu1 %619 }
  0xe1   : > { %685 = vst.msk [vmem:[#allocation4 + $0xf8] sm:$0xff] %vm653_vm2, %v620_v12  ;;  %v755_v10 = vpop.permute.xlu0 %754  ;;  %v7289_v12 = vld [vmem:[#allocation11_spill] sm:$0xff]  ;;  %vm3590_vm2 = vcmask 392512  }
  0xe2   : > { %993 = vrot.lane.b32.xlu1 %v5215_v17, %s4780_s15  ;;  %849 = vst.msk [vmem:[#allocation4 + $0x10] sm:$0xff] %vm846_vm3, %v755_v10 }
  0xe3   : > { %999 = vrot.lane.b32.xlu0 %v5241_v24, %s4780_s15  ;;  %v910_v24 = vld [vmem:[#allocation2 + $0x188] sm:$0xff] }
  0xe4   : > { %v753_v16 = vpop.permute.xlu1 %752 }
  0xe5   : > { %848 = vst.msk [vmem:[#allocation4 + $0x8] sm:$0xff] %vm846_vm3, %v753_v16  ;;  %v759_v45 = vpop.permute.xlu0 %758 }
  0xe6   : > { %997 = vrot.lane.b32.xlu1 %v5231_v21, %s4780_s15  ;;  %851 = vst.msk [vmem:[#allocation4 + $0x20] sm:$0xff] %vm846_vm3, %v759_v45  ;;  %v7291_v45 = vld [vmem:[#allocation13_spill] sm:$0xff] }
  0xe7   : > { %1003 = vrot.lane.b32.xlu0 %v909_v13, %s4780_s15  ;;  %v7290_v13 = vld [vmem:[#allocation12_spill] sm:$0xff] }
  0xe8   : > { %v757_v20 = vpop.permute.xlu1 %756 }
  0xe9   : > { %850 = vst.msk [vmem:[#allocation4 + $0x18] sm:$0xff] %vm846_vm3, %v757_v20  ;;  %v763_v17 = vpop.permute.xlu0 %762 }
  0xea   : > { %1001 = vrot.lane.b32.xlu1 %v5247_v28, %s4780_s15  ;;  %853 = vst.msk [vmem:[#allocation4 + $0x30] sm:$0xff] %vm846_vm3, %v763_v17 }
  0xeb   : > { %1136 = vrot.lane.b32.xlu0 %v5016_v25, %s4781_s16 }
  0xec   : > { %v761_v34 = vpop.permute.xlu1 %760 }
  0xed   : > { %852 = vst.msk [vmem:[#allocation4 + $0x28] sm:$0xff] %vm846_vm3, %v761_v34  ;;  %v767_v21 = vpop.permute.xlu0 %766  ;;  %v7293_v34 = vld [vmem:[#allocation15_spill] sm:$0xff] }
  0xee   : > { %1005 = vrot.lane.b32.xlu1 %v910_v24, %s4780_s15  ;;  %855 = vst.msk [vmem:[#allocation4 + $0x40] sm:$0xff] %vm846_vm3, %v767_v21  ;;  %v7292_v24 = vld [vmem:[#allocation14_spill] sm:$0xff] }
  0xef   : > { %1140 = vrot.lane.b32.xlu0 %v5018_v26, %s4781_s16 }
  0xf0   : > { %v765_v47 = vpop.permute.xlu1 %764 }
  0xf1   : > { %854 = vst.msk [vmem:[#allocation4 + $0x38] sm:$0xff] %vm846_vm3, %v765_v47  ;;  %v771_v28 = vpop.permute.xlu0 %770 }
  0xf2   : > { %1138 = vrot.lane.b32.xlu1 %v5025_v27, %s4781_s16  ;;  %857 = vst.msk [vmem:[#allocation4 + $0x50] sm:$0xff] %vm846_vm3, %v771_v28  ;;  %v7294_v28 = vld [vmem:[#allocation16_spill] sm:$0xff] }
  0xf3   : > { %1144 = vrot.lane.b32.xlu0 %v5033_v30, %s4781_s16 }
  0xf4   : > { %v769_v25 = vpop.permute.xlu1 %768 }
  0xf5   : > { %856 = vst.msk [vmem:[#allocation4 + $0x48] sm:$0xff] %vm846_vm3, %v769_v25  ;;  %v775_v48 = vpop.permute.xlu0 %774  ;;  %v7295_v25 = vld [vmem:[#allocation17_spill] sm:$0xff] }
  0xf6   : > { %1142 = vrot.lane.b32.xlu1 %v5037_v31, %s4781_s16  ;;  %859 = vst.msk [vmem:[#allocation4 + $0x60] sm:$0xff] %vm846_vm3, %v775_v48 }
  0xf7   : > { %1148 = vrot.lane.b32.xlu0 %v5041_v32, %s4781_s16 }
  0xf8   : > { %v773_v26 = vpop.permute.xlu1 %772 }
  0xf9   : > { %858 = vst.msk [vmem:[#allocation4 + $0x58] sm:$0xff] %vm846_vm3, %v773_v26  ;;  %v779_v27 = vpop.permute.xlu0 %778 }
  0xfa   : > { %1146 = vrot.lane.b32.xlu1 %v5054_v39, %s4781_s16  ;;  %861 = vst.msk [vmem:[#allocation4 + $0x70] sm:$0xff] %vm846_vm3, %v779_v27  ;;  %v7296_v27 = vld [vmem:[#allocation18_spill] sm:$0xff] }
  0xfb   : > { %1152 = vrot.lane.b32.xlu0 %v5061_v40, %s4781_s16 }
  0xfc   : > { %v777_v30 = vpop.permute.xlu1 %776 }
  0xfd   : > { %860 = vst.msk [vmem:[#allocation4 + $0x68] sm:$0xff] %vm846_vm3, %v777_v30  ;;  %v783_v31 = vpop.permute.xlu0 %782  ;;  %v7297_v30 = vld [vmem:[#allocation19_spill] sm:$0xff] }
  0xfe   : > { %1150 = vrot.lane.b32.xlu1 %v5065_v41, %s4781_s16  ;;  %863 = vst.msk [vmem:[#allocation4 + $0x80] sm:$0xff] %vm846_vm3, %v783_v31 }
  0xff   : > { %1156 = vrot.lane.b32.xlu0 %v5069_v42, %s4781_s16 }
 0x100   : > { %v781_v32 = vpop.permute.xlu1 %780 }
 0x101   : > { %862 = vst.msk [vmem:[#allocation4 + $0x78] sm:$0xff] %vm846_vm3, %v781_v32  ;;  %v787_v39 = vpop.permute.xlu0 %786 }
 0x102   : > { %1154 = vrot.lane.b32.xlu1 %v5073_v43, %s4781_s16  ;;  %865 = vst.msk [vmem:[#allocation4 + $0x90] sm:$0xff] %vm846_vm3, %v787_v39  ;;  %v7298_v39 = vld [vmem:[#allocation20_spill] sm:$0xff] }
 0x103   : > { %1160 = vrot.lane.b32.xlu0 %v5077_v44, %s4781_s16 }
 0x104   : > { %v785_v40 = vpop.permute.xlu1 %784 }
 0x105   : > { %864 = vst.msk [vmem:[#allocation4 + $0x88] sm:$0xff] %vm846_vm3, %v785_v40  ;;  %v791_v41 = vpop.permute.xlu0 %790  ;;  %v7299_v40 = vld [vmem:[#allocation21_spill] sm:$0xff] }
 0x106   : > { %1158 = vrot.lane.b32.xlu1 %v5081_v46, %s4781_s16  ;;  %867 = vst.msk [vmem:[#allocation4 + $0xa0] sm:$0xff] %vm846_vm3, %v791_v41 }
 0x107   : > { %1164 = vrot.lane.b32.xlu0 %v5095_v51, %s4781_s16 }
 0x108   : > { %v789_v42 = vpop.permute.xlu1 %788 }
 0x109   : > { %866 = vst.msk [vmem:[#allocation4 + $0x98] sm:$0xff] %vm846_vm3, %v789_v42  ;;  %v795_v43 = vpop.permute.xlu0 %794 }
 0x10a   : > { %1162 = vrot.lane.b32.xlu1 %v5105_v53, %s4781_s16  ;;  %869 = vst.msk [vmem:[#allocation4 + $0xb0] sm:$0xff] %vm846_vm3, %v795_v43  ;;  %v7300_v43 = vld [vmem:[#allocation22_spill] sm:$0xff] }
 0x10b   : > { %1168 = vrot.lane.b32.xlu0 %v5113_v56, %s4781_s16 }
 0x10c   : > { %v793_v44 = vpop.permute.xlu1 %792 }
 0x10d   : > { %868 = vst.msk [vmem:[#allocation4 + $0xa8] sm:$0xff] %vm846_vm3, %v793_v44  ;;  %v799_v46 = vpop.permute.xlu0 %798  ;;  %v7301_v44 = vld [vmem:[#allocation23_spill] sm:$0xff] }
 0x10e   : > { %1166 = vrot.lane.b32.xlu1 %v5139_v63, %s4781_s16  ;;  %871 = vst.msk [vmem:[#allocation4 + $0xc0] sm:$0xff] %vm846_vm3, %v799_v46 }
 0x10f   : > { %1172 = vrot.lane.b32.xlu0 %v5189_v11, %s4781_s16 }
 0x110   : > { %v797_v51 = vpop.permute.xlu1 %796 }
 0x111   : > { %870 = vst.msk [vmem:[#allocation4 + $0xb8] sm:$0xff] %vm846_vm3, %v797_v51  ;;  %v803_v53 = vpop.permute.xlu0 %802 }
 0x112   : > { %1170 = vrot.lane.b32.xlu1 %v5201_v14, %s4781_s16  ;;  %873 = vst.msk [vmem:[#allocation4 + $0xd0] sm:$0xff] %vm846_vm3, %v803_v53  ;;  %v7302_v53 = vld [vmem:[#allocation24_spill] sm:$0xff] }
 0x113   : > { %1176 = vrot.lane.b32.xlu0 %v5207_v15, %s4781_s16 }
 0x114   : > { %v801_v56 = vpop.permute.xlu1 %800 }
 0x115   : > { %872 = vst.msk [vmem:[#allocation4 + $0xc8] sm:$0xff] %vm846_vm3, %v801_v56  ;;  %v807_v63 = vpop.permute.xlu0 %806  ;;  %v7303_v56 = vld [vmem:[#allocation25_spill] sm:$0xff] }
 0x116   : > { %1174 = vrot.lane.b32.xlu1 %v5217_v18, %s4781_s16  ;;  %875 = vst.msk [vmem:[#allocation4 + $0xe0] sm:$0xff] %vm846_vm3, %v807_v63 }
 0x117   : > { %1180 = vrot.lane.b32.xlu0 %v5223_v19, %s4781_s16 }
 0x118   : > { %v805_v11 = vpop.permute.xlu1 %804 }
 0x119   : > { %874 = vst.msk [vmem:[#allocation4 + $0xd8] sm:$0xff] %vm846_vm3, %v805_v11  ;;  %v811_v14 = vpop.permute.xlu0 %810 }
 0x11a   : > { %1178 = vrot.lane.b32.xlu1 %v5233_v22, %s4781_s16  ;;  %877 = vst.msk [vmem:[#allocation4 + $0xf0] sm:$0xff] %vm846_vm3, %v811_v14  ;;  %v7285_v22 = vld [vmem:[#allocation7_spill] sm:$0xff]  ;;  %v7304_v14 = vld [vmem:[#allocation26_spill] sm:$0xff] }
 0x11b   : > { %1184 = vrot.lane.b32.xlu0 %v5239_v23, %s4781_s16 }
 0x11c   : > { %v809_v15 = vpop.permute.xlu1 %808 }
 0x11d   : > { %876 = vst.msk [vmem:[#allocation4 + $0xe8] sm:$0xff] %vm846_vm3, %v809_v15  ;;  %v944_v18 = vpop.permute.xlu0 %943  ;;  %v7305_v15 = vld [vmem:[#allocation27_spill] sm:$0xff] }
 0x11e   : > { %1182 = vrot.lane.b32.xlu1 %v5249_v29, %s4781_s16  ;;  %1040 = vst.msk [vmem:[#allocation4] sm:$0xff] %vm1039_vm4, %v944_v18  ;;  %v1102_v29 = vld [vmem:[#allocation2 + $0x181] sm:$0xff] }
 0x11f   : > { %1188 = vrot.lane.b32.xlu0 %v5255_v33, %s4781_s16 }
 0x120   : > { %v813_v19 = vpop.permute.xlu1 %812 }
 0x121   : > { %878 = vst.msk [vmem:[#allocation4 + $0xf8] sm:$0xff] %vm846_vm3, %v813_v19  ;;  %v948_v35 = vpop.permute.xlu0 %947  ;;  %vm3784_vm3 = vcmask 458112  }
 0x122   : > { %1186 = vrot.lane.b32.xlu1 %v7285_v22, %s4781_s16  ;;  %1042 = vst.msk [vmem:[#allocation4 + $0x10] sm:$0xff] %vm1039_vm4, %v948_v35  ;;  %v7306_v22 = vld [vmem:[#allocation28_spill] sm:$0xff]  ;;  %v7307_v35 = vld [vmem:[#allocation29_spill] sm:$0xff] }
 0x123   : > { %1192 = vrot.lane.b32.xlu0 %v7286_v49, %s4781_s16 }
 0x124   : > { %v946_v23 = vpop.permute.xlu1 %945 }
 0x125   : > { %1041 = vst.msk [vmem:[#allocation4 + $0x8] sm:$0xff] %vm1039_vm4, %v946_v23  ;;  %v952_v4 = vpop.permute.xlu0 %951 }
 0x126   : > { %1190 = vrot.lane.b32.xlu1 %v7287_v5, %s4781_s16  ;;  %1044 = vst.msk [vmem:[#allocation4 + $0x20] sm:$0xff] %vm1039_vm4, %v952_v4  ;;  %v7309_v5 = vld [vmem:[#allocation31_spill] sm:$0xff] }
 0x127   : > { %1196 = vrot.lane.b32.xlu0 %v1102_v29, %s4781_s16  ;;  %v7308_v29 = vld [vmem:[#allocation30_spill] sm:$0xff] }
 0x128   : > { %v950_v33 = vpop.permute.xlu1 %949 }
 0x129   : > { %1043 = vst.msk [vmem:[#allocation4 + $0x18] sm:$0xff] %vm1039_vm4, %v950_v33  ;;  %v956_v6 = vpop.permute.xlu0 %955 }
 0x12a   : > { %1194 = vrot.lane.b32.xlu1 %v7288_v7, %s4781_s16  ;;  %1046 = vst.msk [vmem:[#allocation4 + $0x30] sm:$0xff] %vm1039_vm4, %v956_v6  ;;  %v7310_v7 = vld [vmem:[#allocation32_spill] sm:$0xff]  ;;  %v7311_v6 = vld [vmem:[#allocation33_spill] sm:$0xff] }
 0x12b   : > { %1329 = vrot.lane.b32.xlu0 %v7289_v12, %s4782_s17  ;;  %v7312_v12 = vld [vmem:[#allocation34_spill] sm:$0xff] }
 0x12c   : > { %v954_v8 = vpop.permute.xlu1 %953 }
 0x12d   : > { %1045 = vst.msk [vmem:[#allocation4 + $0x28] sm:$0xff] %vm1039_vm4, %v954_v8  ;;  %v960_v10 = vpop.permute.xlu0 %959 }
 0x12e   : > { %1198 = vrot.lane.b32.xlu1 %v1103_v9, %s4781_s16  ;;  %1048 = vst.msk [vmem:[#allocation4 + $0x40] sm:$0xff] %vm1039_vm4, %v960_v10  ;;  %v7313_v10 = vld [vmem:[#allocation35_spill] sm:$0xff] }
 0x12f   : > { %1333 = vrot.lane.b32.xlu0 %v7290_v13, %s4782_s17 }
 0x130   : > { %v958_v16 = vpop.permute.xlu1 %957 }
 0x131   : > { %1047 = vst.msk [vmem:[#allocation4 + $0x38] sm:$0xff] %vm1039_vm4, %v958_v16  ;;  %v964_v20 = vpop.permute.xlu0 %963 }
 0x132   : > { %1331 = vrot.lane.b32.xlu1 %v7291_v45, %s4782_s17  ;;  %1050 = vst.msk [vmem:[#allocation4 + $0x50] sm:$0xff] %vm1039_vm4, %v964_v20  ;;  %v7314_v45 = vld [vmem:[#allocation36_spill] sm:$0xff] }
 0x133   : > { %1337 = vrot.lane.b32.xlu0 %v7292_v24, %s4782_s17  ;;  %v5682_v24 = vld [vmem:[#allocation2 + $0x182] sm:$0xff] }
 0x134   : > { %v962_v17 = vpop.permute.xlu1 %961 }
 0x135   : > { %1049 = vst.msk [vmem:[#allocation4 + $0x48] sm:$0xff] %vm1039_vm4, %v962_v17  ;;  %v968_v21 = vpop.permute.xlu0 %967 }
 0x136   : > { %1335 = vrot.lane.b32.xlu1 %v7293_v34, %s4782_s17  ;;  %1052 = vst.msk [vmem:[#allocation4 + $0x60] sm:$0xff] %vm1039_vm4, %v968_v21  ;;  %v5693_v21 = vld [vmem:[#allocation2 + $0x18a] sm:$0xff] }
 0x137   : > { %1341 = vrot.lane.b32.xlu0 %v7294_v28, %s4782_s17 }
 0x138   : > { %v966_v47 = vpop.permute.xlu1 %965 }
 0x139   : > { %1051 = vst.msk [vmem:[#allocation4 + $0x58] sm:$0xff] %vm1039_vm4, %v966_v47  ;;  %v972_v48 = vpop.permute.xlu0 %971 }
 0x13a   : > { %1339 = vrot.lane.b32.xlu1 %v7295_v25, %s4782_s17  ;;  %1054 = vst.msk [vmem:[#allocation4 + $0x70] sm:$0xff] %vm1039_vm4, %v972_v48 }
 0x13b   : > { %1345 = vrot.lane.b32.xlu0 %v7296_v27, %s4782_s17  ;;  %v2073_v27 = vld [vmem:[%s7208_s2 + $0x18] sm:$0xff] }
 0x13c   : > { %v970_v26 = vpop.permute.xlu1 %969 }
 0x13d   : > { %1053 = vst.msk [vmem:[#allocation4 + $0x68] sm:$0xff] %vm1039_vm4, %v970_v26  ;;  %v976_v31 = vpop.permute.xlu0 %975 }
 0x13e   : > { %1343 = vrot.lane.b32.xlu1 %v7297_v30, %s4782_s17  ;;  %1056 = vst.msk [vmem:[#allocation4 + $0x80] sm:$0xff] %vm1039_vm4, %v976_v31 }
 0x13f   : > { %1349 = vrot.lane.b32.xlu0 %v7298_v39, %s4782_s17 }
 0x140   : > { %v974_v32 = vpop.permute.xlu1 %973 }
 0x141   : > { %1055 = vst.msk [vmem:[#allocation4 + $0x78] sm:$0xff] %vm1039_vm4, %v974_v32  ;;  %v980_v41 = vpop.permute.xlu0 %979  ;;  %v1652_v32 = vld [vmem:[#allocation2 + $0x31] sm:$0xff] }
 0x142   : > { %1347 = vrot.lane.b32.xlu1 %v7299_v40, %s4782_s17  ;;  %1058 = vst.msk [vmem:[#allocation4 + $0x90] sm:$0xff] %vm1039_vm4, %v980_v41  ;;  %v1846_v40 = vld [vmem:[#allocation2 + $0x3a] sm:$0xff]  ;;  %v1845_v41 = vld [vmem:[#allocation2 + $0x32] sm:$0xff] }
 0x143   : > { %1353 = vrot.lane.b32.xlu0 %v7300_v43, %s4782_s17  ;;  %v1655_v43 = vld [vmem:[#allocation2 + $0x51] sm:$0xff] }
 0x144   : > { %v978_v42 = vpop.permute.xlu1 %977 }
 0x145   : > { %1057 = vst.msk [vmem:[#allocation4 + $0x88] sm:$0xff] %vm1039_vm4, %v978_v42  ;;  %v984_v46 = vpop.permute.xlu0 %983 }
 0x146   : > { %1351 = vrot.lane.b32.xlu1 %v7301_v44, %s4782_s17  ;;  %1060 = vst.msk [vmem:[#allocation4 + $0xa0] sm:$0xff] %vm1039_vm4, %v984_v46  ;;  %v1654_v46 = vld [vmem:[#allocation2 + $0x49] sm:$0xff] }
 0x147   : > { %1357 = vrot.lane.b32.xlu0 %v7302_v53, %s4782_s17  ;;  %v1848_v53 = vld [vmem:[#allocation2 + $0x52] sm:$0xff] }
 0x148   : > { %v982_v51 = vpop.permute.xlu1 %981 }
 0x149   : > { %1059 = vst.msk [vmem:[#allocation4 + $0x98] sm:$0xff] %vm1039_vm4, %v982_v51  ;;  %v988_v63 = vpop.permute.xlu0 %987 }
 0x14a   : > { %1355 = vrot.lane.b32.xlu1 %v7303_v56, %s4782_s17  ;;  %1062 = vst.msk [vmem:[#allocation4 + $0xb0] sm:$0xff] %vm1039_vm4, %v988_v63  ;;  %v1847_v63 = vld [vmem:[#allocation2 + $0x4a] sm:$0xff] }
 0x14b   : > { %1361 = vrot.lane.b32.xlu0 %v7304_v14, %s4782_s17  ;;  %v1657_v14 = vld [vmem:[#allocation2 + $0x69] sm:$0xff] }
 0x14c   : > { %v986_v11 = vpop.permute.xlu1 %985 }
 0x14d   : > { %1061 = vst.msk [vmem:[#allocation4 + $0xa8] sm:$0xff] %vm1039_vm4, %v986_v11  ;;  %v992_v18 = vpop.permute.xlu0 %991 }
 0x14e   : > { %1359 = vrot.lane.b32.xlu1 %v7305_v15, %s4782_s17  ;;  %1064 = vst.msk [vmem:[#allocation4 + $0xc0] sm:$0xff] %vm1039_vm4, %v992_v18  ;;  %v1656_v18 = vld [vmem:[#allocation2 + $0x61] sm:$0xff] }
 0x14f   : > { %1365 = vrot.lane.b32.xlu0 %v7306_v22, %s4782_s17  ;;  %v1850_v22 = vld [vmem:[#allocation2 + $0x6a] sm:$0xff] }
 0x150   : > { %v990_v19 = vpop.permute.xlu1 %989 }
 0x151   : > { %1063 = vst.msk [vmem:[#allocation4 + $0xb8] sm:$0xff] %vm1039_vm4, %v990_v19  ;;  %v996_v23 = vpop.permute.xlu0 %995 }
 0x152   : > { %1363 = vrot.lane.b32.xlu1 %v7307_v35, %s4782_s17  ;;  %1066 = vst.msk [vmem:[#allocation4 + $0xd0] sm:$0xff] %vm1039_vm4, %v996_v23  ;;  %v1849_v23 = vld [vmem:[#allocation2 + $0x62] sm:$0xff] }
 0x153   : > { %1369 = vrot.lane.b32.xlu0 %v7308_v29, %s4782_s17  ;;  %v1659_v29 = vld [vmem:[#allocation2 + $0x81] sm:$0xff] }
 0x154   : > { %v994_v49 = vpop.permute.xlu1 %993 }
 0x155   : > { %1065 = vst.msk [vmem:[#allocation4 + $0xc8] sm:$0xff] %vm1039_vm4, %v994_v49  ;;  %v1000_v4 = vpop.permute.xlu0 %999 }
 0x156   : > { %1367 = vrot.lane.b32.xlu1 %v7309_v5, %s4782_s17  ;;  %1068 = vst.msk [vmem:[#allocation4 + $0xe0] sm:$0xff] %vm1039_vm4, %v1000_v4  ;;  %v1658_v4 = vld [vmem:[#allocation2 + $0x79] sm:$0xff] }
 0x157   : > { %1373 = vrot.lane.b32.xlu0 %v7310_v7, %s4782_s17  ;;  %v1852_v7 = vld [vmem:[#allocation2 + $0x82] sm:$0xff] }
 0x158   : > { %v998_v33 = vpop.permute.xlu1 %997 }
 0x159   : > { %1067 = vst.msk [vmem:[#allocation4 + $0xd8] sm:$0xff] %vm1039_vm4, %v998_v33  ;;  %v1004_v9 = vpop.permute.xlu0 %1003 }
 0x15a   : > { %1371 = vrot.lane.b32.xlu1 %v7311_v6, %s4782_s17  ;;  %1070 = vst.msk [vmem:[#allocation4 + $0xf0] sm:$0xff] %vm1039_vm4, %v1004_v9  ;;  %v1851_v9 = vld [vmem:[#allocation2 + $0x7a] sm:$0xff] }
 0x15b   : > { %1377 = vrot.lane.b32.xlu0 %v7312_v12, %s4782_s17  ;;  %v1661_v12 = vld [vmem:[#allocation2 + $0x99] sm:$0xff] }
 0x15c   : > { %v1002_v8 = vpop.permute.xlu1 %1001 }
 0x15d   : > { %1069 = vst.msk [vmem:[#allocation4 + $0xe8] sm:$0xff] %vm1039_vm4, %v1002_v8  ;;  %v1137_v16 = vpop.permute.xlu0 %1136 }
 0x15e   : > { %1375 = vrot.lane.b32.xlu1 %v7313_v10, %s4782_s17  ;;  %1233 = vst.msk [vmem:[#allocation4] sm:$0xff] %vm1232_vm5, %v1137_v16  ;;  %v1660_v16 = vld [vmem:[#allocation2 + $0x91] sm:$0xff] }
 0x15f   : > { %1381 = vrot.lane.b32.xlu0 %v5382_v36, %s4782_s17 }
 0x160   : > { %v1006_v13 = vpop.permute.xlu1 %1005 }
 0x161   : > { %1071 = vst.msk [vmem:[#allocation4 + $0xf8] sm:$0xff] %vm1039_vm4, %v1006_v13  ;;  %v1141_v20 = vpop.permute.xlu0 %1140  ;;  %vm3977_vm4 = vcmask 523712  }
 0x162   : > { %1379 = vrot.lane.b32.xlu1 %v7314_v45, %s4782_s17  ;;  %1235 = vst.msk [vmem:[#allocation4 + $0x10] sm:$0xff] %vm1232_vm5, %v1141_v20  ;;  %v1854_v45 = vld [vmem:[#allocation2 + $0x9a] sm:$0xff] }
 0x163   : > { %1385 = vrot.lane.b32.xlu0 %v5392_v37, %s4782_s17 }
 0x164   : > { %v1139_v17 = vpop.permute.xlu1 %1138 }
 0x165   : > { %1234 = vst.msk [vmem:[#allocation4 + $0x8] sm:$0xff] %vm1232_vm5, %v1139_v17  ;;  %v1145_v36 = vpop.permute.xlu0 %1144  ;;  %v1853_v17 = vld [vmem:[#allocation2 + $0x92] sm:$0xff] }
 0x166   : > { %1383 = vrot.lane.b32.xlu1 %v5397_v0, %s4782_s17  ;;  %1237 = vst.msk [vmem:[#allocation4 + $0x20] sm:$0xff] %vm1232_vm5, %v1145_v36 }
 0x167   : > { %1389 = vrot.lane.b32.xlu0 %v5682_v24, %s4782_s17 }
 0x168   : > { %v1143_v34 = vpop.permute.xlu1 %1142 }
 0x169   : > { %1236 = vst.msk [vmem:[#allocation4 + $0x18] sm:$0xff] %vm1232_vm5, %v1143_v34  ;;  %v1149_v37 = vpop.permute.xlu0 %1148  ;;  %v1663_v34 = vld [vmem:[#allocation2 + $0xb1] sm:$0xff] }
 0x16a   : > { %1387 = vrot.lane.b32.xlu1 %v5405_v38, %s4782_s17  ;;  %1239 = vst.msk [vmem:[#allocation4 + $0x30] sm:$0xff] %vm1232_vm5, %v1149_v37 }
 0x16b   : > { %1523 = vrot.lane.b32.xlu0 %v5093_v50, %s4783_s18 }
 0x16c   : > { %v1147_v47 = vpop.permute.xlu1 %1146 }
 0x16d   : > { %1238 = vst.msk [vmem:[#allocation4 + $0x28] sm:$0xff] %vm1232_vm5, %v1147_v47  ;;  %v1153_v0 = vpop.permute.xlu0 %1152  ;;  %v1662_v47 = vld [vmem:[#allocation2 + $0xa9] sm:$0xff] }
 0x16e   : > { %1391 = vrot.lane.b32.xlu1 %v5693_v21, %s4782_s17  ;;  %1241 = vst.msk [vmem:[#allocation4 + $0x40] sm:$0xff] %vm1232_vm5, %v1153_v0 }
 0x16f   : > { %1527 = vrot.lane.b32.xlu0 %v5109_v54, %s4783_s18 }
 0x170   : > { %v1151_v28 = vpop.permute.xlu1 %1150 }
 0x171   : > { %1240 = vst.msk [vmem:[#allocation4 + $0x38] sm:$0xff] %vm1232_vm5, %v1151_v28  ;;  %v1157_v38 = vpop.permute.xlu0 %1156  ;;  %v1856_v28 = vld [vmem:[#allocation2 + $0xb2] sm:$0xff] }
 0x172   : > { %1525 = vrot.lane.b32.xlu1 %v5101_v52, %s4783_s18  ;;  %1243 = vst.msk [vmem:[#allocation4 + $0x50] sm:$0xff] %vm1232_vm5, %v1157_v38 }
 0x173   : > { %1531 = vrot.lane.b32.xlu0 %v5119_v57, %s4783_s18 }
 0x174   : > { %v1155_v50 = vpop.permute.xlu1 %1154 }
 0x175   : > { %1242 = vst.msk [vmem:[#allocation4 + $0x48] sm:$0xff] %vm1232_vm5, %v1155_v50  ;;  %v1161_v25 = vpop.permute.xlu0 %1160  ;;  %v1855_v50 = vld [vmem:[#allocation2 + $0xaa] sm:$0xff] }
 0x176   : > { %1529 = vrot.lane.b32.xlu1 %v5111_v55, %s4783_s18  ;;  %1245 = vst.msk [vmem:[#allocation4 + $0x60] sm:$0xff] %vm1232_vm5, %v1161_v25 }
 0x177   : > { %1535 = vrot.lane.b32.xlu0 %v5123_v59, %s4783_s18  ;;  %v2070_v59 = vld [vmem:[%s7208_s2] sm:$0xff] }
 0x178   : > { %v1159_v54 = vpop.permute.xlu1 %1158 }
 0x179   : > { %1244 = vst.msk [vmem:[#allocation4 + $0x58] sm:$0xff] %vm1232_vm5, %v1159_v54  ;;  %v1165_v52 = vpop.permute.xlu0 %1164  ;;  %v1664_v54 = vld [vmem:[#allocation2 + $0xc1] sm:$0xff] }
 0x17a   : > { %1533 = vrot.lane.b32.xlu1 %v5121_v58, %s4783_s18  ;;  %1247 = vst.msk [vmem:[#allocation4 + $0x70] sm:$0xff] %vm1232_vm5, %v1165_v52  ;;  %v2071_v58 = vld [vmem:[%s7208_s2 + $0x8] sm:$0xff] }
 0x17b   : > { %1539 = vrot.lane.b32.xlu0 %v5135_v61, %s4783_s18  ;;  %v4689_v48 = vpack.c.bf16 %v2071_v58, %v2070_v59  ;;  %v2072_v61 = vld [vmem:[%s7208_s2 + $0x10] sm:$0xff]  ;;  %v1857_v59 = vld [vmem:[#allocation2 + $0xc2] sm:$0xff] }
 0x17c   : > { %v1163_v57 = vpop.permute.xlu1 %1162  ;;  %v4693_v30 = vpack.c.bf16 %v2073_v27, %v2072_v61  ;;  %v1858_v27 = vld [vmem:[#allocation2 + $0xca] sm:$0xff] }
 0x17d   : > { %1246 = vst.msk [vmem:[#allocation4 + $0x68] sm:$0xff] %vm1232_vm5, %v1163_v57  ;;  %v1169_v55 = vpop.permute.xlu0 %1168  ;;  %4690 = vmatprep.subr.bf16.mxu0 %v4689_v48  ;;  %v1472_v57 = vld [vmem:[#allocation2 + $0xc8] sm:$0xff] }
 0x17e   : > { %1537 = vrot.lane.b32.xlu1 %v5133_v60, %s4783_s18  ;;  %1249 = vst.msk [vmem:[#allocation4 + $0x80] sm:$0xff] %vm1232_vm5, %v1169_v55  ;;  %4692 = vmatpush3.bf16.msra.mxu0 %v4689_v48  ;;  %v1665_v48 = vld [vmem:[#allocation2 + $0xc9] sm:$0xff] }
 0x17f   : > { %1543 = vrot.lane.b32.xlu0 %v5147_v1, %s4783_s18  ;;  %4694 = vmatprep.subr.bf16.mxu0 %v4693_v30 }
 0x180   : > { %v1167_v26 = vpop.permute.xlu1 %1166 }
 0x181   : > { %1248 = vst.msk [vmem:[#allocation4 + $0x78] sm:$0xff] %vm1232_vm5, %v1167_v26  ;;  %v1173_v60 = vpop.permute.xlu0 %1172 }
 0x182   : > { %1541 = vrot.lane.b32.xlu1 %v5137_v62, %s4783_s18  ;;  %1251 = vst.msk [vmem:[#allocation4 + $0x90] sm:$0xff] %vm1232_vm5, %v1173_v60  ;;  %v1653_v62 = vld [vmem:[#allocation2 + $0x39] sm:$0xff]  ;;  %4696 = vmatpush3.bf16.msra.mxu0 %v4693_v30 }
 0x183   : > { %1547 = vrot.lane.b32.xlu0 %v5151_v3, %s4783_s18  ;;  %v2074_v3 = vld [vmem:[%s7208_s2 + $0x20] sm:$0xf]  ;;  %v1473_v60 = vld [vmem:[#allocation2 + $0xd8] sm:$0xff] }
 0x184   : > { %v1171_v1 = vpop.permute.xlu1 %1170  ;;  %4639 = vmatprep.subr.msk.mxu0 %vm2237_vm6, %v2074_v3 }
 0x185   : > { %1250 = vst.msk [vmem:[#allocation4 + $0x88] sm:$0xff] %vm1232_vm5, %v1171_v1  ;;  %v1177_v31 = vpop.permute.xlu0 %1176  ;;  %v1666_v1 = vld [vmem:[#allocation2 + $0xd9] sm:$0xff] }
 0x186   : > { %1545 = vrot.lane.b32.xlu1 %v5149_v2, %s4783_s18  ;;  %1253 = vst.msk [vmem:[#allocation4 + $0xa0] sm:$0xff] %vm1232_vm5, %v1177_v31  ;;  %4640 = vmatpush3.msk.msra.mxu0 %vm2237_vm6, %v2074_v3  ;;  %v1474_v31 = vld [vmem:[#allocation2 + $0xe0] sm:$0xff]  ;;  %vm4241_vm6 = vcmask 588800  }
 0x187   : > { %1718 = vrot.lane.b32.xlu0 %v1653_v62, %s4784_s27 }
 0x188   : > { %v1175_v39 = vpop.permute.xlu1 %1174 }
 0x189   : > { %1252 = vst.msk [vmem:[#allocation4 + $0x98] sm:$0xff] %vm1232_vm5, %v1175_v39  ;;  %v1181_v2 = vpop.permute.xlu0 %1180  ;;  %v1859_v39 = vld [vmem:[#allocation2 + $0xda] sm:$0xff] }
 0x18a   : > { %1716 = vrot.lane.b32.xlu1 %v1652_v32, %s4784_s27  ;;  %1255 = vst.msk [vmem:[#allocation4 + $0xb0] sm:$0xff] %vm1232_vm5, %v1181_v2 }
 0x18b   : > { %1911 = vrot.lane.b32.xlu0 %v1846_v40, %s4785_s9  ;;  %v1667_v40 = vld [vmem:[#allocation2 + $0xe1] sm:$0xff] }
 0x18c   : > { %v1179_v42 = vpop.permute.xlu1 %1178 }
 0x18d   : > { %1254 = vst.msk [vmem:[#allocation4 + $0xa8] sm:$0xff] %vm1232_vm5, %v1179_v42  ;;  %v1185_v44 = vpop.permute.xlu0 %1184 }
 0x18e   : > { %1909 = vrot.lane.b32.xlu1 %v1845_v41, %s4785_s9  ;;  %1257 = vst.msk [vmem:[#allocation4 + $0xc0] sm:$0xff] %vm1232_vm5, %v1185_v44  ;;  %v1475_v41 = vld [vmem:[#allocation2 + $0xf0] sm:$0xff] }
 0x18f   : > { %1722 = vrot.lane.b32.xlu0 %v1655_v43, %s4784_s27  ;;  %v1860_v43 = vld [vmem:[#allocation2 + $0xe2] sm:$0xff] }
 0x190   : > { %v1183_v51 = vpop.permute.xlu1 %1182 }
 0x191   : > { %1256 = vst.msk [vmem:[#allocation4 + $0xb8] sm:$0xff] %vm1232_vm5, %v1183_v51  ;;  %v1189_v56 = vpop.permute.xlu0 %1188 }
 0x192   : > { %1720 = vrot.lane.b32.xlu1 %v1654_v46, %s4784_s27  ;;  %1259 = vst.msk [vmem:[#allocation4 + $0xd0] sm:$0xff] %vm1232_vm5, %v1189_v56  ;;  %v1668_v46 = vld [vmem:[#allocation2 + $0xf1] sm:$0xff] }
 0x193   : > { %1915 = vrot.lane.b32.xlu0 %v1848_v53, %s4785_s9  ;;  %v1476_v53 = vld [vmem:[#allocation2 + $0xf8] sm:$0xff] }
 0x194   : > { %v1187_v11 = vpop.permute.xlu1 %1186 }
 0x195   : > { %1258 = vst.msk [vmem:[#allocation4 + $0xc8] sm:$0xff] %vm1232_vm5, %v1187_v11  ;;  %v1193_v15 = vpop.permute.xlu0 %1192 }
 0x196   : > { %1913 = vrot.lane.b32.xlu1 %v1847_v63, %s4785_s9  ;;  %1261 = vst.msk [vmem:[#allocation4 + $0xe0] sm:$0xff] %vm1232_vm5, %v1193_v15  ;;  %v1861_v63 = vld [vmem:[#allocation2 + $0xf2] sm:$0xff] }
 0x197   : > { %1726 = vrot.lane.b32.xlu0 %v1657_v14, %s4784_s27  ;;  %v1669_v14 = vld [vmem:[#allocation2 + $0xf9] sm:$0xff] }
 0x198   : > { %v1191_v19 = vpop.permute.xlu1 %1190 }
 0x199   : > { %1260 = vst.msk [vmem:[#allocation4 + $0xd8] sm:$0xff] %vm1232_vm5, %v1191_v19  ;;  %v1197_v35 = vpop.permute.xlu0 %1196 }
 0x19a   : > { %1724 = vrot.lane.b32.xlu1 %v1656_v18, %s4784_s27  ;;  %1263 = vst.msk [vmem:[#allocation4 + $0xf0] sm:$0xff] %vm1232_vm5, %v1197_v35  ;;  %v1477_v18 = vld [vmem:[#allocation2 + $0x108] sm:$0xff] }
 0x19b   : > { %1919 = vrot.lane.b32.xlu0 %v1850_v22, %s4785_s9  ;;  %v1862_v22 = vld [vmem:[#allocation2 + $0xfa] sm:$0xff] }
 0x19c   : > { %v1195_v49 = vpop.permute.xlu1 %1194 }
 0x19d   : > { %1262 = vst.msk [vmem:[#allocation4 + $0xe8] sm:$0xff] %vm1232_vm5, %v1195_v49  ;;  %v1330_v5 = vpop.permute.xlu0 %1329 }
 0x19e   : > { %1917 = vrot.lane.b32.xlu1 %v1849_v23, %s4785_s9  ;;  %1426 = vst.msk [vmem:[#allocation4] sm:$0xff] %vm1425_vm7, %v1330_v5  ;;  %v1670_v23 = vld [vmem:[#allocation2 + $0x109] sm:$0xff] }
 0x19f   : > { %1730 = vrot.lane.b32.xlu0 %v1659_v29, %s4784_s27  ;;  %v1478_v29 = vld [vmem:[#allocation2 + $0x110] sm:$0xff] }
 0x1a0   : > { %v1199_v33 = vpop.permute.xlu1 %1198 }
 0x1a1   : > { %1264 = vst.msk [vmem:[#allocation4 + $0xf8] sm:$0xff] %vm1232_vm5, %v1199_v33  ;;  %v1334_v6 = vpop.permute.xlu0 %1333  ;;  %vm4170_vm5 = vcmask 589312  }
 0x1a2   : > { %1728 = vrot.lane.b32.xlu1 %v1658_v4, %s4784_s27  ;;  %1428 = vst.msk [vmem:[#allocation4 + $0x10] sm:$0xff] %vm1425_vm7, %v1334_v6  ;;  %v1863_v4 = vld [vmem:[#allocation2 + $0x10a] sm:$0xff] }
 0x1a3   : > { %1923 = vrot.lane.b32.xlu0 %v1852_v7, %s4785_s9  ;;  %v1671_v7 = vld [vmem:[#allocation2 + $0x111] sm:$0xff] }
 0x1a4   : > { %v1332_v8 = vpop.permute.xlu1 %1331 }
 0x1a5   : > { %1427 = vst.msk [vmem:[#allocation4 + $0x8] sm:$0xff] %vm1425_vm7, %v1332_v8  ;;  %v1338_v10 = vpop.permute.xlu0 %1337 }
 0x1a6   : > { %1921 = vrot.lane.b32.xlu1 %v1851_v9, %s4785_s9  ;;  %1430 = vst.msk [vmem:[#allocation4 + $0x20] sm:$0xff] %vm1425_vm7, %v1338_v10  ;;  %v1479_v9 = vld [vmem:[#allocation2 + $0x120] sm:$0xff] }
 0x1a7   : > { %1734 = vrot.lane.b32.xlu0 %v1661_v12, %s4784_s27  ;;  %v1864_v12 = vld [vmem:[#allocation2 + $0x112] sm:$0xff] }
 0x1a8   : > { %v1336_v13 = vpop.permute.xlu1 %1335 }
 0x1a9   : > { %1429 = vst.msk [vmem:[#allocation4 + $0x18] sm:$0xff] %vm1425_vm7, %v1336_v13  ;;  %v1342_v20 = vpop.permute.xlu0 %1341 }
 0x1aa   : > { %1732 = vrot.lane.b32.xlu1 %v1660_v16, %s4784_s27  ;;  %1432 = vst.msk [vmem:[#allocation4 + $0x30] sm:$0xff] %vm1425_vm7, %v1342_v20  ;;  %v1672_v16 = vld [vmem:[#allocation2 + $0x121] sm:$0xff] }
 0x1ab   : > { %1927 = vrot.lane.b32.xlu0 %v1854_v45, %s4785_s9  ;;  %v1480_v45 = vld [vmem:[#allocation2 + $0x128] sm:$0xff] }
 0x1ac   : > { %v1340_v36 = vpop.permute.xlu1 %1339 }
 0x1ad   : > { %1431 = vst.msk [vmem:[#allocation4 + $0x28] sm:$0xff] %vm1425_vm7, %v1340_v36  ;;  %v1346_v37 = vpop.permute.xlu0 %1345 }
 0x1ae   : > { %1925 = vrot.lane.b32.xlu1 %v1853_v17, %s4785_s9  ;;  %1434 = vst.msk [vmem:[#allocation4 + $0x40] sm:$0xff] %vm1425_vm7, %v1346_v37  ;;  %v1865_v17 = vld [vmem:[#allocation2 + $0x122] sm:$0xff] }
 0x1af   : > { %1738 = vrot.lane.b32.xlu0 %v1663_v34, %s4784_s27  ;;  %v1673_v34 = vld [vmem:[#allocation2 + $0x129] sm:$0xff] }
 0x1b0   : > { %v1344_v0 = vpop.permute.xlu1 %1343 }
 0x1b1   : > { %1433 = vst.msk [vmem:[#allocation4 + $0x38] sm:$0xff] %vm1425_vm7, %v1344_v0  ;;  %v1350_v38 = vpop.permute.xlu0 %1349 }
 0x1b2   : > { %1736 = vrot.lane.b32.xlu1 %v1662_v47, %s4784_s27  ;;  %1436 = vst.msk [vmem:[#allocation4 + $0x50] sm:$0xff] %vm1425_vm7, %v1350_v38  ;;  %v1481_v47 = vld [vmem:[#allocation2 + $0x138] sm:$0xff] }
 0x1b3   : > { %1931 = vrot.lane.b32.xlu0 %v1856_v28, %s4785_s9  ;;  %v1866_v28 = vld [vmem:[#allocation2 + $0x12a] sm:$0xff] }
 0x1b4   : > { %v1348_v25 = vpop.permute.xlu1 %1347 }
 0x1b5   : > { %1435 = vst.msk [vmem:[#allocation4 + $0x48] sm:$0xff] %vm1425_vm7, %v1348_v25  ;;  %v1354_v52 = vpop.permute.xlu0 %1353 }
 0x1b6   : > { %1929 = vrot.lane.b32.xlu1 %v1855_v50, %s4785_s9  ;;  %1438 = vst.msk [vmem:[#allocation4 + $0x60] sm:$0xff] %vm1425_vm7, %v1354_v52  ;;  %v1674_v50 = vld [vmem:[#allocation2 + $0x139] sm:$0xff] }
 0x1b7   : > { %1740 = vrot.lane.b32.xlu0 %v1664_v54, %s4784_s27  ;;  %v1482_v54 = vld [vmem:[#allocation2 + $0x140] sm:$0xff] }
 0x1b8   : > { %v1352_v55 = vpop.permute.xlu1 %1351 }
 0x1b9   : > { %1437 = vst.msk [vmem:[#allocation4 + $0x58] sm:$0xff] %vm1425_vm7, %v1352_v55  ;;  %v1358_v58 = vpop.permute.xlu0 %1357 }
 0x1ba   : > { %1549 = vrot.lane.b32.xlu1 %v1472_v57, %s4783_s18  ;;  %1440 = vst.msk [vmem:[#allocation4 + $0x70] sm:$0xff] %vm1425_vm7, %v1358_v58  ;;  %v1867_v57 = vld [vmem:[#allocation2 + $0x13a] sm:$0xff] }
 0x1bb   : > { %1933 = vrot.lane.b32.xlu0 %v1857_v59, %s4785_s9  ;;  %v1675_v59 = vld [vmem:[#allocation2 + $0x141] sm:$0xff] }
 0x1bc   : > { %v1356_v26 = vpop.permute.xlu1 %1355 }
 0x1bd   : > { %1439 = vst.msk [vmem:[#allocation4 + $0x68] sm:$0xff] %vm1425_vm7, %v1356_v26  ;;  %v1362_v61 = vpop.permute.xlu0 %1361 }
 0x1be   : > { %1742 = vrot.lane.b32.xlu1 %v1665_v48, %s4784_s27  ;;  %1442 = vst.msk [vmem:[#allocation4 + $0x80] sm:$0xff] %vm1425_vm7, %v1362_v61  ;;  %v1483_v48 = vld [vmem:[#allocation2 + $0x150] sm:$0xff] }
 0x1bf   : > { %1551 = vrot.lane.b32.xlu0 %v1473_v60, %s4783_s18  ;;  %v1868_v60 = vld [vmem:[#allocation2 + $0x142] sm:$0xff] }
 0x1c0   : > { %v1360_v30 = vpop.permute.xlu1 %1359 }
 0x1c1   : > { %1441 = vst.msk [vmem:[#allocation4 + $0x78] sm:$0xff] %vm1425_vm7, %v1360_v30  ;;  %v1366_v62 = vpop.permute.xlu0 %1365 }
 0x1c2   : > { %1935 = vrot.lane.b32.xlu1 %v1858_v27, %s4785_s9  ;;  %1444 = vst.msk [vmem:[#allocation4 + $0x90] sm:$0xff] %vm1425_vm7, %v1366_v62  ;;  %v1676_v27 = vld [vmem:[#allocation2 + $0x151] sm:$0xff] }
 0x1c3   : > { %1744 = vrot.lane.b32.xlu0 %v1666_v1, %s4784_s27  ;;  %v1484_v1 = vld [vmem:[#allocation2 + $0x158] sm:$0xff] }
 0x1c4   : > { %v1364_v32 = vpop.permute.xlu1 %1363 }
 0x1c5   : > { %1443 = vst.msk [vmem:[#allocation4 + $0x88] sm:$0xff] %vm1425_vm7, %v1364_v32  ;;  %v1370_v3 = vpop.permute.xlu0 %1369 }
 0x1c6   : > { %1553 = vrot.lane.b32.xlu1 %v1474_v31, %s4783_s18  ;;  %1446 = vst.msk [vmem:[#allocation4 + $0xa0] sm:$0xff] %vm1425_vm7, %v1370_v3  ;;  %v1869_v31 = vld [vmem:[#allocation2 + $0x152] sm:$0xff] }
 0x1c7   : > { %1937 = vrot.lane.b32.xlu0 %v1859_v39, %s4785_s9  ;;  %v1677_v39 = vld [vmem:[#allocation2 + $0x159] sm:$0xff] }
 0x1c8   : > { %v1368_v2 = vpop.permute.xlu1 %1367 }
 0x1c9   : > { %1445 = vst.msk [vmem:[#allocation4 + $0x98] sm:$0xff] %vm1425_vm7, %v1368_v2  ;;  %v1374_v42 = vpop.permute.xlu0 %1373 }
 0x1ca   : > { %1746 = vrot.lane.b32.xlu1 %v1667_v40, %s4784_s27  ;;  %1448 = vst.msk [vmem:[#allocation4 + $0xb0] sm:$0xff] %vm1425_vm7, %v1374_v42  ;;  %v1485_v40 = vld [vmem:[#allocation2 + $0x168] sm:$0xff] }
 0x1cb   : > { %1555 = vrot.lane.b32.xlu0 %v1475_v41, %s4783_s18  ;;  %v1870_v41 = vld [vmem:[#allocation2 + $0x15a] sm:$0xff] }
 0x1cc   : > { %v1372_v44 = vpop.permute.xlu1 %1371 }
 0x1cd   : > { %1447 = vst.msk [vmem:[#allocation4 + $0xa8] sm:$0xff] %vm1425_vm7, %v1372_v44  ;;  %v1378_v51 = vpop.permute.xlu0 %1377 }
 0x1ce   : > { %1939 = vrot.lane.b32.xlu1 %v1860_v43, %s4785_s9  ;;  %1450 = vst.msk [vmem:[#allocation4 + $0xc0] sm:$0xff] %vm1425_vm7, %v1378_v51 }
 0x1cf   : > { %1748 = vrot.lane.b32.xlu0 %v1668_v46, %s4784_s27  ;;  %v1678_v46 = vld [vmem:[#allocation2 + $0x169] sm:$0xff] }
 0x1d0   : > { %v1376_v56 = vpop.permute.xlu1 %1375 }
 0x1d1   : > { %1449 = vst.msk [vmem:[#allocation4 + $0xb8] sm:$0xff] %vm1425_vm7, %v1376_v56  ;;  %v1382_v11 = vpop.permute.xlu0 %1381 }
 0x1d2   : > { %1557 = vrot.lane.b32.xlu1 %v1476_v53, %s4783_s18  ;;  %1452 = vst.msk [vmem:[#allocation4 + $0xd0] sm:$0xff] %vm1425_vm7, %v1382_v11  ;;  %v1486_v53 = vld [vmem:[#allocation2 + $0x170] sm:$0xff] }
 0x1d3   : > { %1941 = vrot.lane.b32.xlu0 %v1861_v63, %s4785_s9  ;;  %v1871_v63 = vld [vmem:[#allocation2 + $0x16a] sm:$0xff] }
 0x1d4   : > { %v1380_v15 = vpop.permute.xlu1 %1379 }
 0x1d5   : > { %1451 = vst.msk [vmem:[#allocation4 + $0xc8] sm:$0xff] %vm1425_vm7, %v1380_v15  ;;  %v1386_v19 = vpop.permute.xlu0 %1385 }
 0x1d6   : > { %1750 = vrot.lane.b32.xlu1 %v1669_v14, %s4784_s27  ;;  %1454 = vst.msk [vmem:[#allocation4 + $0xe0] sm:$0xff] %vm1425_vm7, %v1386_v19  ;;  %v1679_v14 = vld [vmem:[#allocation2 + $0x171] sm:$0xff] }
 0x1d7   : > { %1559 = vrot.lane.b32.xlu0 %v1477_v18, %s4783_s18 }
 0x1d8   : > { %v1384_v35 = vpop.permute.xlu1 %1383 }
 0x1d9   : > { %1453 = vst.msk [vmem:[#allocation4 + $0xd8] sm:$0xff] %vm1425_vm7, %v1384_v35  ;;  %v1390_v49 = vpop.permute.xlu0 %1389 }
 0x1da   : > { %1943 = vrot.lane.b32.xlu1 %v1862_v22, %s4785_s9  ;;  %1456 = vst.msk [vmem:[#allocation4 + $0xf0] sm:$0xff] %vm1425_vm7, %v1390_v49  ;;  %v1487_v22 = vld [vmem:[#allocation2 + $0x180] sm:$0xff] }
 0x1db   : > { %1752 = vrot.lane.b32.xlu0 %v1670_v23, %s4784_s27  ;;  %v1872_v23 = vld [vmem:[#allocation2 + $0x172] sm:$0xff] }
 0x1dc   : > { %v1388_v5 = vpop.permute.xlu1 %1387 }
 0x1dd   : > { %1455 = vst.msk [vmem:[#allocation4 + $0xe8] sm:$0xff] %vm1425_vm7, %v1388_v5  ;;  %v1524_v33 = vpop.permute.xlu0 %1523 }
 0x1de   : > { %1561 = vrot.lane.b32.xlu1 %v1478_v29, %s4783_s18  ;;  %1620 = vst.msk [vmem:[#allocation4] sm:$0xff] %vm1619_vm8, %v1524_v33  ;;  %v1680_v29 = vld [vmem:[#allocation2 + $0x181] sm:$0xff] }
 0x1df   : > { %1945 = vrot.lane.b32.xlu0 %v1863_v4, %s4785_s9  ;;  %v1488_v4 = vld [vmem:[#allocation2 + $0x188] sm:$0xff] }
 0x1e0   : > { %v1392_v6 = vpop.permute.xlu1 %1391 }
 0x1e1   : > { %1457 = vst.msk [vmem:[#allocation4 + $0xf8] sm:$0xff] %vm1425_vm7, %v1392_v6  ;;  %v1528_v8 = vpop.permute.xlu0 %1527  ;;  %vm6884_vm7 = vmpackc.low %vm4241_vm6, %vm4241_vm6 }
 0x1e2   : > { %1754 = vrot.lane.b32.xlu1 %v1671_v7, %s4784_s27  ;;  %1622 = vst.msk [vmem:[#allocation4 + $0x10] sm:$0xff] %vm1619_vm8, %v1528_v8  ;;  %v1681_v8 = vld [vmem:[#allocation2 + $0x189] sm:$0xff] }
 0x1e3   : > { %1563 = vrot.lane.b32.xlu0 %v1479_v9, %s4783_s18 }
 0x1e4   : > { %v1526_v10 = vpop.permute.xlu1 %1525 }
 0x1e5   : > { %1621 = vst.msk [vmem:[#allocation4 + $0x8] sm:$0xff] %vm1619_vm8, %v1526_v10  ;;  %v1532_v13 = vpop.permute.xlu0 %1531  ;;  %v1489_v10 = vld [vmem:[#allocation2 + $0x198] sm:$0xff] }
 0x1e6   : > { %1947 = vrot.lane.b32.xlu1 %v1864_v12, %s4785_s9  ;;  %1624 = vst.msk [vmem:[#allocation4 + $0x20] sm:$0xff] %vm1619_vm8, %v1532_v13 }
 0x1e7   : > { %1756 = vrot.lane.b32.xlu0 %v1672_v16, %s4784_s27 }
 0x1e8   : > { %v1530_v20 = vpop.permute.xlu1 %1529 }
 0x1e9   : > { %1623 = vst.msk [vmem:[#allocation4 + $0x18] sm:$0xff] %vm1619_vm8, %v1530_v20  ;;  %v1536_v36 = vpop.permute.xlu0 %1535 }
 0x1ea   : > { %1565 = vrot.lane.b32.xlu1 %v1480_v45, %s4783_s18  ;;  %1626 = vst.msk [vmem:[#allocation4 + $0x30] sm:$0xff] %vm1619_vm8, %v1536_v36 }
 0x1eb   : > { %1949 = vrot.lane.b32.xlu0 %v1865_v17, %s4785_s9  ;;  %v1490_v17 = vld [vmem:[#allocation2 + $0x1a0] sm:$0xff] }
 0x1ec   : > { %v1534_v37 = vpop.permute.xlu1 %1533 }
 0x1ed   : > { %1625 = vst.msk [vmem:[#allocation4 + $0x28] sm:$0xff] %vm1619_vm8, %v1534_v37  ;;  %v1540_v0 = vpop.permute.xlu0 %1539 }
 0x1ee   : > { %1758 = vrot.lane.b32.xlu1 %v1673_v34, %s4784_s27  ;;  %1628 = vst.msk [vmem:[#allocation4 + $0x40] sm:$0xff] %vm1619_vm8, %v1540_v0 }
 0x1ef   : > { %1567 = vrot.lane.b32.xlu0 %v1481_v47, %s4783_s18 }
 0x1f0   : > { %v1538_v38 = vpop.permute.xlu1 %1537 }
 0x1f1   : > { %1627 = vst.msk [vmem:[#allocation4 + $0x38] sm:$0xff] %vm1619_vm8, %v1538_v38  ;;  %v1544_v25 = vpop.permute.xlu0 %1543 }
 0x1f2   : > { %1951 = vrot.lane.b32.xlu1 %v1866_v28, %s4785_s9  ;;  %1630 = vst.msk [vmem:[#allocation4 + $0x50] sm:$0xff] %vm1619_vm8, %v1544_v25 }
 0x1f3   : > { %1760 = vrot.lane.b32.xlu0 %v1674_v50, %s4784_s27 }
 0x1f4   : > { %v1542_v52 = vpop.permute.xlu1 %1541 }
 0x1f5   : > { %1629 = vst.msk [vmem:[#allocation4 + $0x48] sm:$0xff] %vm1619_vm8, %v1542_v52  ;;  %v1548_v55 = vpop.permute.xlu0 %1547 }
 0x1f6   : > { %1569 = vrot.lane.b32.xlu1 %v1482_v54, %s4783_s18  ;;  %1632 = vst.msk [vmem:[#allocation4 + $0x60] sm:$0xff] %vm1619_vm8, %v1548_v55 }
 0x1f7   : > { %1953 = vrot.lane.b32.xlu0 %v1867_v57, %s4785_s9 }
 0x1f8   : > { %v1546_v58 = vpop.permute.xlu1 %1545 }
 0x1f9   : > { %1631 = vst.msk [vmem:[#allocation4 + $0x58] sm:$0xff] %vm1619_vm8, %v1546_v58  ;;  %v1719_v26 = vpop.permute.xlu0 %1718 }
 0x1fa   : > { %1762 = vrot.lane.b32.xlu1 %v1675_v59, %s4784_s27  ;;  %1814 = vst.msk [vmem:[#allocation4 + $0x8] sm:$0xff] %vm1812_vm9, %v1719_v26 }
 0x1fb   : > { %1571 = vrot.lane.b32.xlu0 %v1483_v48, %s4783_s18 }
 0x1fc   : > { %v1717_v61 = vpop.permute.xlu1 %1716 }
 0x1fd   : > { %1813 = vst.msk [vmem:[#allocation4] sm:$0xff] %vm1812_vm9, %v1717_v61  ;;  %v1912_v30 = vpop.permute.xlu0 %1911 }
 0x1fe   : > { %1955 = vrot.lane.b32.xlu1 %v1868_v60, %s4785_s9  ;;  %2007 = vst.msk [vmem:[#allocation4 + $0x8] sm:$0xff] %vm2005_vm10, %v1912_v30 }
 0x1ff   : > { %1764 = vrot.lane.b32.xlu0 %v1676_v27, %s4784_s27 }
 0x200   : > { %v1910_v62 = vpop.permute.xlu1 %1909 }
 0x201   : > { %2006 = vst.msk [vmem:[#allocation4] sm:$0xff] %vm2005_vm10, %v1910_v62  ;;  %v1723_v32 = vpop.permute.xlu0 %1722 }
 0x202   : > { %1573 = vrot.lane.b32.xlu1 %v1484_v1, %s4783_s18  ;;  %1816 = vst.msk [vmem:[#allocation4 + $0x18] sm:$0xff] %vm1812_vm9, %v1723_v32 }
 0x203   : > { %1957 = vrot.lane.b32.xlu0 %v1869_v31, %s4785_s9 }
 0x204   : > { %v1721_v3 = vpop.permute.xlu1 %1720 }
 0x205   : > { %1815 = vst.msk [vmem:[#allocation4 + $0x10] sm:$0xff] %vm1812_vm9, %v1721_v3  ;;  %v1916_v2 = vpop.permute.xlu0 %1915  ;;  %v2039_v42 = vld [vmem:[#allocation4 + $0x8] sm:$0xff] }
 0x206   : > { %1766 = vrot.lane.b32.xlu1 %v1677_v39, %s4784_s27  ;;  %2009 = vst.msk [vmem:[#allocation4 + $0x18] sm:$0xff] %vm2005_vm10, %v1916_v2 }
 0x207   : > { %1575 = vrot.lane.b32.xlu0 %v1485_v40, %s4783_s18 }
 0x208   : > { %v1914_v43 = vpop.permute.xlu1 %1913  ;;  %v2038_v44 = vld [vmem:[#allocation4] sm:$0xff] }
 0x209   : > { %2008 = vst.msk [vmem:[#allocation4 + $0x10] sm:$0xff] %vm2005_vm10, %v1914_v43  ;;  %4641 = vmatprep.mubr.msk.f32.mxu0 %vm2140_vm11, %v2038_v44  ;;  %v1727_v51 = vpop.permute.xlu0 %1726 }
 0x20a   : > { %1959 = vrot.lane.b32.xlu1 %v1870_v41, %s4785_s9  ;;  %4642 = vmatmul.mubr.msk.f32.vlgmr.msra.gmra.mrb[0].mxu0 %vm2140_vm11, %v2039_v42  ;;  %1818 = vst.msk [vmem:[#allocation4 + $0x28] sm:$0xff] %vm1812_vm9, %v1727_v51 }
 0x20b   : > { %1768 = vrot.lane.b32.xlu0 %v1678_v46, %s4784_s27 }
 0x20c   : > { %v1725_v56 = vpop.permute.xlu1 %1724 }
 0x20d   : > { %1817 = vst.msk [vmem:[#allocation4 + $0x20] sm:$0xff] %vm1812_vm9, %v1725_v56  ;;  %v1920_v11 = vpop.permute.xlu0 %1919  ;;  %v2041_v15 = vld [vmem:[#allocation4 + $0x18] sm:$0xff] }
 0x20e   : > { %1577 = vrot.lane.b32.xlu1 %v1486_v53, %s4783_s18  ;;  %2011 = vst.msk [vmem:[#allocation4 + $0x28] sm:$0xff] %vm2005_vm10, %v1920_v11 }
 0x20f   : > { %1961 = vrot.lane.b32.xlu0 %v1871_v63, %s4785_s9 }
 0x210   : > { %v1918_v18 = vpop.permute.xlu1 %1917  ;;  %v2040_v19 = vld [vmem:[#allocation4 + $0x10] sm:$0xff] }
 0x211   : > { %2010 = vst.msk [vmem:[#allocation4 + $0x20] sm:$0xff] %vm2005_vm10, %v1918_v18  ;;  %4644 = vmatprep.mubr.msk.f32.mxu0 %vm2140_vm11, %v2040_v19  ;;  %v1731_v35 = vpop.permute.xlu0 %1730  ;;  %v1683_v18 = vld [vmem:[#allocation2 + $0x1a1] sm:$0xff] }
 0x212   : > { %1770 = vrot.lane.b32.xlu1 %v1679_v14, %s4784_s27  ;;  %4645 = vmatmul.mubr.msk.f32.gmra.mrb[2].mxu0 %vm2140_vm11, %v2041_v15  ;;  %1820 = vst.msk [vmem:[#allocation4 + $0x38] sm:$0xff] %vm1812_vm9, %v1731_v35  ;;  %v1682_v15 = vld [vmem:[#allocation2 + $0x199] sm:$0xff]  ;;  %v7315_v35 = vmov 0.0  }
 0x213   : > { %1579 = vrot.lane.b32.xlu0 %v1487_v22, %s4783_s18  ;;  %2511 = vst.msk [vmem:[#allocation3 + $0x20] sm:$0xff] %vm2505_vm12, %v7315_v35  ;;  %2506 = vst.msk [vmem:[#allocation3] sm:$0xff] %vm2505_vm12, %v7315_v35 }
 0x214   : > { %v1729_v49 = vpop.permute.xlu1 %1728  ;;  %2512 = vst.msk [vmem:[#allocation3 + $0x28] sm:$0x3] %vm2508_vm13, %v7315_v35  ;;  %2509 = vst.msk [vmem:[#allocation3 + $0x10] sm:$0x3] %vm2508_vm13, %v7315_v35 }
 0x215   : > { %1819 = vst.msk [vmem:[#allocation4 + $0x30] sm:$0xff] %vm1812_vm9, %v1729_v49  ;;  %v1924_v5 = vpop.permute.xlu0 %1923  ;;  %v2043_v33 = vld [vmem:[#allocation4 + $0x28] sm:$0xff]  ;;  %v1875_v49 = vld [vmem:[#allocation2 + $0x19a] sm:$0xff] }
 0x216   : > { %1963 = vrot.lane.b32.xlu1 %v1872_v23, %s4785_s9  ;;  %2013 = vst.msk [vmem:[#allocation4 + $0x38] sm:$0xff] %vm2005_vm10, %v1924_v5 }
 0x217   : > { %1772 = vrot.lane.b32.xlu0 %v1680_v29, %s4784_s27  ;;  %2507 = vst.msk [vmem:[#allocation3 + $0x8] sm:$0xff] %vm2505_vm12, %v7315_v35  ;;  %2510 = vst.msk [vmem:[#allocation3 + $0x18] sm:$0xff] %vm2505_vm12, %v7315_v35  ;;  %v1876_v29 = vld [vmem:[#allocation2 + $0x1a2] sm:$0xff] }
 0x218   : > { %v1922_v7 = vpop.permute.xlu1 %1921  ;;  %v2042_v6 = vld [vmem:[#allocation4 + $0x20] sm:$0xff]  ;;  %2513 = vst.msk [vmem:[#allocation3 + $0x30] sm:$0xff] %vm2505_vm12, %v7315_v35  ;;  %2514 = vst.msk [vmem:[#allocation3 + $0x38] sm:$0xff] %vm2505_vm12, %v7315_v35 }
 0x219   : > { %2012 = vst.msk [vmem:[#allocation4 + $0x30] sm:$0xff] %vm2005_vm10, %v1922_v7  ;;  %4647 = vmatprep.mubr.msk.f32.mxu0 %vm2140_vm11, %v2042_v6  ;;  %v1735_v9 = vpop.permute.xlu0 %1734 }
 0x21a   : > { %1581 = vrot.lane.b32.xlu1 %v1488_v4, %s4783_s18  ;;  %4648 = vmatmul.mubr.msk.f32.gmra.mrb[4].mxu0 %vm2140_vm11, %v2043_v33  ;;  %1822 = vst.msk [vmem:[#allocation4 + $0x48] sm:$0xff] %vm1812_vm9, %v1735_v9 }
 0x21b   : > { %1965 = vrot.lane.b32.xlu0 %v5682_v24, %s4785_s9  ;;  %2515 = vst.msk [vmem:[#allocation3 + $0x40] sm:$0x3] %vm2508_vm13, %v7315_v35  ;;  %2518 = vst.msk [vmem:[#allocation3 + $0x58] sm:$0x3] %vm2508_vm13, %v7315_v35 }
 0x21c   : > { %v1733_v12 = vpop.permute.xlu1 %1732  ;;  %2516 = vst.msk [vmem:[#allocation3 + $0x48] sm:$0xff] %vm2505_vm12, %v7315_v35  ;;  %2517 = vst.msk [vmem:[#allocation3 + $0x50] sm:$0xff] %vm2505_vm12, %v7315_v35 }
 0x21d   : > { %1821 = vst.msk [vmem:[#allocation4 + $0x40] sm:$0xff] %vm1812_vm9, %v1733_v12  ;;  %v1928_v16 = vpop.permute.xlu0 %1927  ;;  %v2045_v13 = vld [vmem:[#allocation4 + $0x38] sm:$0xff] }
 0x21e   : > { %1774 = vrot.lane.b32.xlu1 %v1681_v8, %s4784_s27  ;;  %2015 = vst.msk [vmem:[#allocation4 + $0x48] sm:$0xff] %vm2005_vm10, %v1928_v16  ;;  %v2658_v7 = vld [vmem:[#allocation3 + $0x1] sm:$0xff]  ;;  %v2659_v6 = vld [vmem:[#allocation3 + $0x9] sm:$0xff] }
 0x21f   : > { %1583 = vrot.lane.b32.xlu0 %v1489_v10, %s4783_s18  ;;  %2519 = vst.msk [vmem:[#allocation3 + $0x60] sm:$0xff] %vm2505_vm12, %v7315_v35  ;;  %2520 = vst.msk [vmem:[#allocation3 + $0x68] sm:$0xff] %vm2505_vm12, %v7315_v35 }
 0x220   : > { %v1926_v45 = vpop.permute.xlu1 %1925  ;;  %v2044_v20 = vld [vmem:[#allocation4 + $0x30] sm:$0xff]  ;;  %2521 = vst.msk [vmem:[#allocation3 + $0x70] sm:$0x3] %vm2508_vm13, %v7315_v35  ;;  %2524 = vst.msk [vmem:[#allocation3 + $0x88] sm:$0x3] %vm2508_vm13, %v7315_v35 }
 0x221   : > { %2014 = vst.msk [vmem:[#allocation4 + $0x40] sm:$0xff] %vm2005_vm10, %v1926_v45  ;;  %4650 = vmatprep.mubr.msk.f32.mxu0 %vm2140_vm11, %v2044_v20  ;;  %v1739_v24 = vpop.permute.xlu0 %1738 }
 0x222   : > { %1967 = vrot.lane.b32.xlu1 %v5693_v21, %s4785_s9  ;;  %4651 = vmatmul.mubr.msk.f32.gmra.mrb[6].mxu0 %vm2140_vm11, %v2045_v13  ;;  %1824 = vst.msk [vmem:[#allocation4 + $0x58] sm:$0xff] %vm1812_vm9, %v1739_v24 }
 0x223   : > { %2522 = vst.msk [vmem:[#allocation3 + $0x78] sm:$0xff] %vm2505_vm12, %v7315_v35  ;;  %2523 = vst.msk [vmem:[#allocation3 + $0x80] sm:$0xff] %vm2505_vm12, %v7315_v35  ;;  %1776 = vrot.lane.b32.xlu0 %v1682_v15, %s4784_s27 }
 0x224   : > { %v1737_v36 = vpop.permute.xlu1 %1736  ;;  %2525 = vst.msk [vmem:[#allocation3 + $0x90] sm:$0xff] %vm2505_vm12, %v7315_v35  ;;  %2526 = vst.msk [vmem:[#allocation3 + $0x98] sm:$0xff] %vm2505_vm12, %v7315_v35 }
 0x225   : > { %1823 = vst.msk [vmem:[#allocation4 + $0x50] sm:$0xff] %vm1812_vm9, %v1737_v36  ;;  %v1932_v34 = vpop.permute.xlu0 %1931  ;;  %v2047_v37 = vld [vmem:[#allocation4 + $0x48] sm:$0xff] }
 0x226   : > { %1585 = vrot.lane.b32.xlu1 %v1490_v17, %s4783_s18  ;;  %2017 = vst.msk [vmem:[#allocation4 + $0x58] sm:$0xff] %vm2005_vm10, %v1932_v34 }
 0x227   : > { %2527 = vst.msk [vmem:[#allocation3 + $0xa0] sm:$0x3] %vm2508_vm13, %v7315_v35  ;;  %2530 = vst.msk [vmem:[#allocation3 + $0xb8] sm:$0x3] %vm2508_vm13, %v7315_v35  ;;  %1969 = vrot.lane.b32.xlu0 %v1875_v49, %s4785_s9 }
 0x228   : > { %v1930_v47 = vpop.permute.xlu1 %1929  ;;  %v2046_v0 = vld [vmem:[#allocation4 + $0x40] sm:$0xff]  ;;  %2528 = vst.msk [vmem:[#allocation3 + $0xa8] sm:$0xff] %vm2505_vm12, %v7315_v35  ;;  %2529 = vst.msk [vmem:[#allocation3 + $0xb0] sm:$0xff] %vm2505_vm12, %v7315_v35 }
 0x229   : > { %2016 = vst.msk [vmem:[#allocation4 + $0x50] sm:$0xff] %vm2005_vm10, %v1930_v47  ;;  %4653 = vmatprep.mubr.msk.f32.mxu0 %vm2140_vm11, %v2046_v0  ;;  %v1741_v21 = vpop.permute.xlu0 %1740 }
 0x22a   : > { %4654 = vmatmul.mubr.msk.f32.gmra.mrb[8].mxu0 %vm2140_vm11, %v2047_v37  ;;  %1825 = vst.msk [vmem:[#allocation4 + $0x60] sm:$0xff] %vm1812_vm9, %v1741_v21  ;;  %1778 = vrot.lane.b32.xlu1 %v1683_v18, %s4784_s27 }
 0x22b   : > { %2531 = vst.msk [vmem:[#allocation3 + $0xc0] sm:$0xff] %vm2505_vm12, %v7315_v35  ;;  %2532 = vst.msk [vmem:[#allocation3 + $0xc8] sm:$0xff] %vm2505_vm12, %v7315_v35  ;;  %2722 = vrot.lane.b32.xlu0 %v2658_v7, %s4779_s14 }
 0x22c   : > { %v1550_v28 = vpop.permute.xlu1 %1549  ;;  %2533 = vst.msk [vmem:[#allocation3 + $0xd0] sm:$0x3] %vm2508_vm13, %v7315_v35  ;;  %2536 = vst.msk [vmem:[#allocation3 + $0xe8] sm:$0x3] %vm2508_vm13, %v7315_v35 }
 0x22d   : > { %1633 = vst.msk [vmem:[#allocation4 + $0x68] sm:$0xff] %vm1619_vm8, %v1550_v28  ;;  %v1934_v38 = vpop.permute.xlu0 %1933  ;;  %v2049_v50 = vld [vmem:[#allocation4 + $0x58] sm:$0xff] }
 0x22e   : > { %2018 = vst.msk [vmem:[#allocation4 + $0x60] sm:$0xff] %vm2005_vm10, %v1934_v38  ;;  %1971 = vrot.lane.b32.xlu1 %v1876_v29, %s4785_s9 }
 0x22f   : > { %2534 = vst.msk [vmem:[#allocation3 + $0xd8] sm:$0xff] %vm2505_vm12, %v7315_v35  ;;  %2535 = vst.msk [vmem:[#allocation3 + $0xe0] sm:$0xff] %vm2505_vm12, %v7315_v35 }
 0x230   : > { %v1743_v25 = vpop.permute.xlu1 %1742  ;;  %v2048_v54 = vld [vmem:[#allocation4 + $0x50] sm:$0xff]  ;;  %2537 = vst.msk [vmem:[#allocation3 + $0xf0] sm:$0xff] %vm2505_vm12, %v7315_v35  ;;  %2538 = vst.msk [vmem:[#allocation3 + $0xf8] sm:$0xff] %vm2505_vm12, %v7315_v35 }
 0x231   : > { %1826 = vst.msk [vmem:[#allocation4 + $0x68] sm:$0xff] %vm1812_vm9, %v1743_v25  ;;  %4656 = vmatprep.mubr.msk.f32.mxu0 %vm2140_vm11, %v2048_v54  ;;  %v1552_v52 = vpop.permute.xlu0 %1551 }
 0x232   : > { %4657 = vmatmul.mubr.msk.f32.gmra.mrb[10].mxu0 %vm2140_vm11, %v2049_v50  ;;  %1634 = vst.msk [vmem:[#allocation4 + $0x70] sm:$0xff] %vm1619_vm8, %v1552_v52  ;;  %2724 = vrot.lane.b32.xlu1 %v2659_v6, %s4779_s14  ;;  %v2079_v6 = vld [vmem:[%s7210_s4 + $0x20] sm:$0xff] }
 0x233   : > { %2539 = vst.msk [vmem:[#allocation3 + $0x100] sm:$0x3] %vm2508_vm13, %v7315_v35  ;;  %2542 = vst.msk [vmem:[#allocation3 + $0x118] sm:$0x3] %vm2508_vm13, %v7315_v35 }
 0x234   : > { %v1936_v57 = vpop.permute.xlu1 %1935  ;;  %2540 = vst.msk [vmem:[#allocation3 + $0x108] sm:$0xff] %vm2505_vm12, %v7315_v35  ;;  %2541 = vst.msk [vmem:[#allocation3 + $0x110] sm:$0xff] %vm2505_vm12, %v7315_v35 }
 0x235   : > { %2019 = vst.msk [vmem:[#allocation4 + $0x68] sm:$0xff] %vm2005_vm10, %v1936_v57  ;;  %v1745_v55 = vpop.permute.xlu0 %1744  ;;  %v2050_v59 = vld [vmem:[#allocation4 + $0x60] sm:$0xff] }
 0x236   : > { %1827 = vst.msk [vmem:[#allocation4 + $0x70] sm:$0xff] %vm1812_vm9, %v1745_v55  ;;  %4659 = vmatprep.mubr.msk.f32.mxu0 %vm2140_vm11, %v2050_v59 }
 0x237   : > { %2543 = vst.msk [vmem:[#allocation3 + $0x120] sm:$0xff] %vm2505_vm12, %v7315_v35  ;;  %2544 = vst.msk [vmem:[#allocation3 + $0x128] sm:$0xff] %vm2505_vm12, %v7315_v35 }
 0x238   : > { %v1554_v58 = vpop.permute.xlu1 %1553  ;;  %2545 = vst.msk [vmem:[#allocation3 + $0x130] sm:$0x3] %vm2508_vm13, %v7315_v35  ;;  %2548 = vst.msk [vmem:[#allocation3 + $0x148] sm:$0x3] %vm2508_vm13, %v7315_v35 }
 0x239   : > { %1635 = vst.msk [vmem:[#allocation4 + $0x78] sm:$0xff] %vm1619_vm8, %v1554_v58  ;;  %v1938_v48 = vpop.permute.xlu0 %1937 }
 0x23a   : > { %2020 = vst.msk [vmem:[#allocation4 + $0x70] sm:$0xff] %vm2005_vm10, %v1938_v48 }
 0x23b   : > { %2546 = vst.msk [vmem:[#allocation3 + $0x138] sm:$0xff] %vm2505_vm12, %v7315_v35  ;;  %2547 = vst.msk [vmem:[#allocation3 + $0x140] sm:$0xff] %vm2505_vm12, %v7315_v35 }
 0x23c   : > { %v1747_v26 = vpop.permute.xlu1 %1746  ;;  %v2051_v60 = vld [vmem:[#allocation4 + $0x68] sm:$0xff]  ;;  %2549 = vst.msk [vmem:[#allocation3 + $0x150] sm:$0xff] %vm2505_vm12, %v7315_v35  ;;  %2550 = vst.msk [vmem:[#allocation3 + $0x158] sm:$0xff] %vm2505_vm12, %v7315_v35 }
 0x23d   : > { %1828 = vst.msk [vmem:[#allocation4 + $0x78] sm:$0xff] %vm1812_vm9, %v1747_v26  ;;  %4660 = vmatmul.mubr.msk.f32.gmra.mrb[12].mxu0 %vm2140_vm11, %v2051_v60  ;;  %v1556_v61 = vpop.permute.xlu0 %1555 }
 0x23e   : > { %1636 = vst.msk [vmem:[#allocation4 + $0x80] sm:$0xff] %vm1619_vm8, %v1556_v61 }
 0x23f   : > { %2551 = vst.msk [vmem:[#allocation3 + $0x160] sm:$0x3] %vm2508_vm13, %v7315_v35  ;;  %2554 = vst.msk [vmem:[#allocation3 + $0x178] sm:$0x3] %vm2508_vm13, %v7315_v35 }
 0x240   : > { %v1940_v27 = vpop.permute.xlu1 %1939  ;;  %2552 = vst.msk [vmem:[#allocation3 + $0x168] sm:$0xff] %vm2505_vm12, %v7315_v35  ;;  %2553 = vst.msk [vmem:[#allocation3 + $0x170] sm:$0xff] %vm2505_vm12, %v7315_v35 }
 0x241   : > { %2021 = vst.msk [vmem:[#allocation4 + $0x78] sm:$0xff] %vm2005_vm10, %v1940_v27  ;;  %v1749_v30 = vpop.permute.xlu0 %1748  ;;  %v2052_v1 = vld [vmem:[#allocation4 + $0x70] sm:$0xff] }
 0x242   : > { %1829 = vst.msk [vmem:[#allocation4 + $0x80] sm:$0xff] %vm1812_vm9, %v1749_v30  ;;  %4662 = vmatprep.mubr.msk.f32.mxu0 %vm2140_vm11, %v2052_v1 }
 0x243   : > { %2555 = vst.msk [vmem:[#allocation3 + $0x180] sm:$0xff] %vm2505_vm12, %v7315_v35  ;;  %2556 = vst.msk [vmem:[#allocation3 + $0x188] sm:$0xff] %vm2505_vm12, %v7315_v35 }
 0x244   : > { %v1558_v62 = vpop.permute.xlu1 %1557  ;;  %2557 = vst.msk [vmem:[#allocation3 + $0x190] sm:$0x3] %vm2508_vm13, %v7315_v35  ;;  %2560 = vst.msk [vmem:[#allocation3 + $0x1a8] sm:$0x3] %vm2508_vm13, %v7315_v35 }
 0x245   : > { %1637 = vst.msk [vmem:[#allocation4 + $0x88] sm:$0xff] %vm1619_vm8, %v1558_v62  ;;  %v1942_v31 = vpop.permute.xlu0 %1941 }
 0x246   : > { %2022 = vst.msk [vmem:[#allocation4 + $0x80] sm:$0xff] %vm2005_vm10, %v1942_v31 }
 0x247   : > { %2558 = vst.msk [vmem:[#allocation3 + $0x198] sm:$0xff] %vm2505_vm12, %v7315_v35  ;;  %2559 = vst.msk [vmem:[#allocation3 + $0x1a0] sm:$0xff] %vm2505_vm12, %v7315_v35 }
 0x248   : > { %v1751_v32 = vpop.permute.xlu1 %1750  ;;  %v2053_v39 = vld [vmem:[#allocation4 + $0x78] sm:$0xff] }
 0x249   : > { %1830 = vst.msk [vmem:[#allocation4 + $0x88] sm:$0xff] %vm1812_vm9, %v1751_v32  ;;  %4663 = vmatmul.mubr.msk.f32.gmra.mrb[14].mxu0 %vm2140_vm11, %v2053_v39  ;;  %v1560_v3 = vpop.permute.xlu0 %1559 }
 0x24a   : > { %1638 = vst.msk [vmem:[#allocation4 + $0x90] sm:$0xff] %vm1619_vm8, %v1560_v3  ;;  %v2076_v3 = vld [vmem:[%s7210_s4 + $0x8] sm:$0xff] }
 0x24c   : > { %v1944_v40 = vpop.permute.xlu1 %1943 }
 0x24d   : > { %2023 = vst.msk [vmem:[#allocation4 + $0x88] sm:$0xff] %vm2005_vm10, %v1944_v40  ;;  %v1753_v2 = vpop.permute.xlu0 %1752  ;;  %v2054_v41 = vld [vmem:[#allocation4 + $0x80] sm:$0xff]  ;;  %v6118_v40 = vstv %s307_s10 }
 0x24e   : > { %1831 = vst.msk [vmem:[#allocation4 + $0x90] sm:$0xff] %vm1812_vm9, %v1753_v2  ;;  %4665 = vmatprep.mubr.msk.f32.mxu0 %vm2140_vm11, %v2054_v41  ;;  %v2075_v2 = vld [vmem:[%s7210_s4] sm:$0xff]  ;;  %v2109_v41 = vmul.f32 %v6118_v40, %v2076_v3 }
 0x250   : > { %v1562_v42 = vpop.permute.xlu1 %1561 }
 0x251   : > { %1639 = vst.msk [vmem:[#allocation4 + $0x98] sm:$0xff] %vm1619_vm8, %v1562_v42  ;;  %v1946_v43 = vpop.permute.xlu0 %1945  ;;  %v2108_v42 = vmul.f32 %v6118_v40, %v2075_v2 }
 0x252   : > { %2024 = vst.msk [vmem:[#allocation4 + $0x90] sm:$0xff] %vm2005_vm10, %v1946_v43 }
 0x254   : > { %v1755_v44 = vpop.permute.xlu1 %1754  ;;  %v2055_v46 = vld [vmem:[#allocation4 + $0x88] sm:$0xff] }
 0x255   : > { %1832 = vst.msk [vmem:[#allocation4 + $0x98] sm:$0xff] %vm1812_vm9, %v1755_v44  ;;  %4666 = vmatmul.mubr.msk.f32.gmra.mrb[16].mxu0 %vm2140_vm11, %v2055_v46  ;;  %v1564_v51 = vpop.permute.xlu0 %1563  ;;  %v6130_v44 = vld [vmem:[%s7209_s3] ss:$0 sm:$0xff] }
 0x256   : > { %1640 = vst.msk [vmem:[#allocation4 + $0xa0] sm:$0xff] %vm1619_vm8, %v1564_v51 }
 0x258   : > { %v1948_v53 = vpop.permute.xlu1 %1947 }
 0x259   : > { %2025 = vst.msk [vmem:[#allocation4 + $0x98] sm:$0xff] %vm2005_vm10, %v1948_v53  ;;  %v1757_v56 = vpop.permute.xlu0 %1756  ;;  %v2056_v63 = vld [vmem:[#allocation4 + $0x90] sm:$0xff] }
 0x25a   : > { %1833 = vst.msk [vmem:[#allocation4 + $0xa0] sm:$0xff] %vm1812_vm9, %v1757_v56  ;;  %4668 = vmatprep.mubr.msk.f32.mxu0 %vm2140_vm11, %v2056_v63  ;;  %v2594_v53 = vld [vmem:[#allocation3] sm:$0xff]  ;;  %v2595_v56 = vld [vmem:[#allocation3 + $0x8] sm:$0xff] }
 0x25b   : > { %2626 = vst.msk [vmem:[#allocation5] sm:$0xff] %vm2505_vm12, %v2594_v53  ;;  %2627 = vst.msk [vmem:[#allocation5 + $0x8] sm:$0xff] %vm2505_vm12, %v2595_v56 }
 0x25c   : > { %v1566_v11 = vpop.permute.xlu1 %1565 }
 0x25d   : > { %1641 = vst.msk [vmem:[#allocation4 + $0xa8] sm:$0xff] %vm1619_vm8, %v1566_v11  ;;  %v1950_v14 = vpop.permute.xlu0 %1949  ;;  %v2078_v11 = vld [vmem:[%s7210_s4 + $0x18] sm:$0xff] }
 0x25e   : > { %2026 = vst.msk [vmem:[#allocation4 + $0xa0] sm:$0xff] %vm2005_vm10, %v1950_v14  ;;  %v2111_v35 = vmul.f32 %v6118_v40, %v2078_v11 }
 0x260   : > { %v1759_v19 = vpop.permute.xlu1 %1758  ;;  %v2057_v22 = vld [vmem:[#allocation4 + $0x98] sm:$0xff] }
 0x261   : > { %1834 = vst.msk [vmem:[#allocation4 + $0xa8] sm:$0xff] %vm1812_vm9, %v1759_v19  ;;  %4669 = vmatmul.mubr.msk.f32.gmra.mrb[18].mxu0 %vm2140_vm11, %v2057_v22  ;;  %v1568_v23 = vpop.permute.xlu0 %1567  ;;  %v2077_v19 = vld [vmem:[%s7210_s4 + $0x10] sm:$0xff] }
 0x262   : > { %1642 = vst.msk [vmem:[#allocation4 + $0xb0] sm:$0xff] %vm1619_vm8, %v1568_v23  ;;  %v2110_v23 = vmul.f32 %v6118_v40, %v2077_v19 }
 0x264   : > { %v1952_v5 = vpop.permute.xlu1 %1951 }
 0x265   : > { %2027 = vst.msk [vmem:[#allocation4 + $0xa8] sm:$0xff] %vm2005_vm10, %v1952_v5  ;;  %v1761_v4 = vpop.permute.xlu0 %1760  ;;  %v2058_v33 = vld [vmem:[#allocation4 + $0xa0] sm:$0xff] }
 0x266   : > { %1835 = vst.msk [vmem:[#allocation4 + $0xb0] sm:$0xff] %vm1812_vm9, %v1761_v4  ;;  %4671 = vmatprep.mubr.msk.f32.mxu0 %vm2140_vm11, %v2058_v33  ;;  %v2080_v33 = vld [vmem:[%s7210_s4 + $0x28] sm:$0xff] }
 0x268   : > { %v1570_v9 = vpop.permute.xlu1 %1569 }
 0x269   : > { %1643 = vst.msk [vmem:[#allocation4 + $0xb8] sm:$0xff] %vm1619_vm8, %v1570_v9  ;;  %v1954_v8 = vpop.permute.xlu0 %1953 }
 0x26a   : > { %2028 = vst.msk [vmem:[#allocation4 + $0xb0] sm:$0xff] %vm2005_vm10, %v1954_v8 }
 0x26c   : > { %v1763_v12 = vpop.permute.xlu1 %1762  ;;  %v2059_v10 = vld [vmem:[#allocation4 + $0xa8] sm:$0xff] }
 0x26d   : > { %1836 = vst.msk [vmem:[#allocation4 + $0xb8] sm:$0xff] %vm1812_vm9, %v1763_v12  ;;  %4672 = vmatmul.mubr.msk.f32.gmra.mrb[20].mxu0 %vm2140_vm11, %v2059_v10  ;;  %v1572_v16 = vpop.permute.xlu0 %1571  ;;  %v2113_v10 = vmul.f32 %v6118_v40, %v2080_v33 }
 0x26e   : > { %1644 = vst.msk [vmem:[#allocation4 + $0xc0] sm:$0xff] %vm1619_vm8, %v1572_v16 }
 0x270   : > { %v1956_v13 = vpop.permute.xlu1 %1955 }
 0x271   : > { %2029 = vst.msk [vmem:[#allocation4 + $0xb8] sm:$0xff] %vm2005_vm10, %v1956_v13  ;;  %v1765_v45 = vpop.permute.xlu0 %1764  ;;  %v2060_v20 = vld [vmem:[#allocation4 + $0xb0] sm:$0xff] }
 0x272   : > { %1837 = vst.msk [vmem:[#allocation4 + $0xc0] sm:$0xff] %vm1812_vm9, %v1765_v45  ;;  %4674 = vmatprep.mubr.msk.f32.mxu0 %vm2140_vm11, %v2060_v20  ;;  %v2112_v45 = vmul.f32 %v6118_v40, %v2079_v6 }
 0x274   : > { %v1574_v24 = vpop.permute.xlu1 %1573 }
 0x275   : > { %1645 = vst.msk [vmem:[#allocation4 + $0xc8] sm:$0xff] %vm1619_vm8, %v1574_v24  ;;  %v1958_v17 = vpop.permute.xlu0 %1957 }
 0x276   : > { %2030 = vst.msk [vmem:[#allocation4 + $0xc0] sm:$0xff] %vm2005_vm10, %v1958_v17 }
 0x278   : > { %v1767_v36 = vpop.permute.xlu1 %1766  ;;  %v2061_v34 = vld [vmem:[#allocation4 + $0xb8] sm:$0xff] }
 0x279   : > { %1838 = vst.msk [vmem:[#allocation4 + $0xc8] sm:$0xff] %vm1812_vm9, %v1767_v36  ;;  %4675 = vmatmul.mubr.msk.f32.gmra.mrb[22].mxu0 %vm2140_vm11, %v2061_v34  ;;  %v1576_v37 = vpop.permute.xlu0 %1575  ;;  %v2082_v34 = vld [vmem:[%s7210_s4 + $0x38] sm:$0xff] }
 0x27a   : > { %1646 = vst.msk [vmem:[#allocation4 + $0xd0] sm:$0xff] %vm1619_vm8, %v1576_v37 }
 0x27c   : > { %v1960_v47 = vpop.permute.xlu1 %1959 }
 0x27d   : > { %2031 = vst.msk [vmem:[#allocation4 + $0xc8] sm:$0xff] %vm2005_vm10, %v1960_v47  ;;  %v1769_v0 = vpop.permute.xlu0 %1768  ;;  %v2062_v21 = vld [vmem:[#allocation4 + $0xc0] sm:$0xff]  ;;  %v2081_v47 = vld [vmem:[%s7210_s4 + $0x30] sm:$0xff] }
 0x27e   : > { %1839 = vst.msk [vmem:[#allocation4 + $0xd0] sm:$0xff] %vm1812_vm9, %v1769_v0  ;;  %4677 = vmatprep.mubr.msk.f32.mxu0 %vm2140_vm11, %v2062_v21 }
 0x280   : > { %v1578_v28 = vpop.permute.xlu1 %1577 }
 0x281   : > { %1647 = vst.msk [vmem:[#allocation4 + $0xd8] sm:$0xff] %vm1619_vm8, %v1578_v28  ;;  %v1962_v38 = vpop.permute.xlu0 %1961 }
 0x282   : > { %2032 = vst.msk [vmem:[#allocation4 + $0xd0] sm:$0xff] %vm2005_vm10, %v1962_v38  ;;  %v2115_v38 = vmul.f32 %v6118_v40, %v2082_v34 }
 0x284   : > { %v1771_v50 = vpop.permute.xlu1 %1770  ;;  %v2063_v25 = vld [vmem:[#allocation4 + $0xc8] sm:$0xff] }
 0x285   : > { %1840 = vst.msk [vmem:[#allocation4 + $0xd8] sm:$0xff] %vm1812_vm9, %v1771_v50  ;;  %4678 = vmatmul.mubr.msk.f32.gmra.mrb[24].mxu0 %vm2140_vm11, %v2063_v25  ;;  %v1580_v54 = vpop.permute.xlu0 %1579 }
 0x286   : > { %1648 = vst.msk [vmem:[#allocation4 + $0xe0] sm:$0xff] %vm1619_vm8, %v1580_v54  ;;  %v2114_v54 = vmul.f32 %v6118_v40, %v2081_v47 }
 0x288   : > { %v1964_v52 = vpop.permute.xlu1 %1963 }
 0x289   : > { %2033 = vst.msk [vmem:[#allocation4 + $0xd8] sm:$0xff] %vm2005_vm10, %v1964_v52  ;;  %v1773_v57 = vpop.permute.xlu0 %1772  ;;  %v2064_v55 = vld [vmem:[#allocation4 + $0xd0] sm:$0xff] }
 0x28a   : > { %1841 = vst.msk [vmem:[#allocation4 + $0xe0] sm:$0xff] %vm1812_vm9, %v1773_v57  ;;  %4680 = vmatprep.mubr.msk.f32.mxu0 %vm2140_vm11, %v2064_v55 }
 0x28c   : > { %v1582_v59 = vpop.permute.xlu1 %1581 }
 0x28d   : > { %1649 = vst.msk [vmem:[#allocation4 + $0xe8] sm:$0xff] %vm1619_vm8, %v1582_v59  ;;  %v1966_v58 = vpop.permute.xlu0 %1965 }
 0x28e   : > { %2034 = vst.msk [vmem:[#allocation4 + $0xe0] sm:$0xff] %vm2005_vm10, %v1966_v58  ;;  %v2084_v58 = vld [vmem:[%s7210_s4 + $0x48] sm:$0xff] }
 0x290   : > { %v1775_v48 = vpop.permute.xlu1 %1774  ;;  %v2065_v26 = vld [vmem:[#allocation4 + $0xd8] sm:$0xff] }
 0x291   : > { %1842 = vst.msk [vmem:[#allocation4 + $0xe8] sm:$0xff] %vm1812_vm9, %v1775_v48  ;;  %4681 = vmatmul.mubr.msk.f32.gmra.mrb[26].mxu0 %vm2140_vm11, %v2065_v26  ;;  %v1584_v30 = vpop.permute.xlu0 %1583  ;;  %v2083_v26 = vld [vmem:[%s7210_s4 + $0x40] sm:$0xff] }
 0x292   : > { %1650 = vst.msk [vmem:[#allocation4 + $0xf0] sm:$0xff] %vm1619_vm8, %v1584_v30  ;;  %v2117_v30 = vmul.f32 %v6118_v40, %v2084_v58 }
 0x294   : > { %v1968_v60 = vpop.permute.xlu1 %1967 }
 0x295   : > { %2035 = vst.msk [vmem:[#allocation4 + $0xe8] sm:$0xff] %vm2005_vm10, %v1968_v60  ;;  %v2066_v61 = vld [vmem:[#allocation4 + $0xe0] sm:$0xff]  ;;  %v1777_v62 = vpop.permute.xlu0 %1776 }
 0x296   : > { %4683 = vmatprep.mubr.msk.f32.mxu0 %vm2140_vm11, %v2066_v61  ;;  %1843 = vst.msk [vmem:[#allocation4 + $0xf0] sm:$0xff] %vm1812_vm9, %v1777_v62 }
 0x298   : > { %v1586_v1 = vpop.permute.xlu1 %1585 }
 0x299   : > { %1651 = vst.msk [vmem:[#allocation4 + $0xf8] sm:$0xff] %vm1619_vm8, %v1586_v1  ;;  %v1970_v32 = vpop.permute.xlu0 %1969 }
 0x29a   : > { %2036 = vst.msk [vmem:[#allocation4 + $0xf0] sm:$0xff] %vm2005_vm10, %v1970_v32 }
 0x29c   : > { %v2067_v27 = vld [vmem:[#allocation4 + $0xe8] sm:$0xff]  ;;  %v1779_v31 = vpop.permute.xlu1 %1778 }
 0x29d   : > { %4684 = vmatmul.mubr.msk.f32.gmra.mrb[28].mxu0 %vm2140_vm11, %v2067_v27  ;;  %1844 = vst.msk [vmem:[#allocation4 + $0xf8] sm:$0xff] %vm1812_vm9, %v1779_v31  ;;  %v2723_v14 = vpop.permute.xlu0 %2722  ;;  %v2116_v31 = vmul.f32 %v6118_v40, %v2083_v26 }
 0x29e   : > { %2819 = vst.msk [vmem:[#allocation5] sm:$0xff] %vm2818_vm14, %v2723_v14 }
 0x2a0   : > { %v1972_v39 = vpop.permute.xlu1 %1971 }
 0x2a1   : > { %2037 = vst.msk [vmem:[#allocation4 + $0xf8] sm:$0xff] %vm2005_vm10, %v1972_v39 }
 0x2a4   : > { %v2725_v15 = vpop.permute.xlu1 %2724 }
 0x2a5   : > { %2820 = vst.msk [vmem:[#allocation5 + $0x8] sm:$0xff] %vm2818_vm14, %v2725_v15 }
 0x2dd   : > { %v4643_v43 = vpop.f32.mrb[0].mxu0 }
 0x2de   : > { %v2313_v46 = vadd.f32 %v4643_v43, %v2109_v41  ;;  %v2307_v51 = vpop.f32.mrb[1].mxu0  ;;  %v2086_v41 = vld [vmem:[%s7210_s4 + $0x58] sm:$0xff]  ;;  %v2085_v43 = vld [vmem:[%s7210_s4 + $0x50] sm:$0xff] }
 0x2df   : > { %v2308_v63 = vadd.f32 %v2307_v51, %v2108_v42  ;;  %v2119_v56 = vmul.f32 %v6118_v40, %v2086_v41  ;;  %v2118_v14 = vmul.f32 %v6118_v40, %v2085_v43 }
 0x2e0   : > { %v2474_v18 = vadd.f32 %v6130_v44, %v2313_v46 }
 0x2e1   : > { %v2473_v22 = vadd.f32 %v6130_v44, %v2308_v63 }
 0x2e2   : > { %2563 = vst.msk [vmem:[#allocation3 + $0x21] sm:$0xff] %vm2505_vm12, %v2474_v18 }
 0x2e3   : > { %2562 = vst.msk [vmem:[#allocation3 + $0x19] sm:$0xff] %vm2505_vm12, %v2473_v22 }
 0x2e5   : > { %v4646_v49 = vpop.f32.mrb[2].mxu0 }
 0x2e6   : > { %v2323_v29 = vadd.f32 %v4646_v49, %v2111_v35  ;;  %v2317_v5 = vpop.f32.mrb[3].mxu0 }
 0x2e7   : > { %v2318_v4 = vadd.f32 %v2317_v5, %v2110_v23 }
 0x2e8   : > { %v2476_v7 = vadd.f32 %v6130_v44, %v2323_v29  ;;  %v2088_v29 = vld [vmem:[%s7210_s4 + $0x68] sm:$0xff] }
 0x2e9   : > { %v2475_v9 = vadd.f32 %v6130_v44, %v2318_v4  ;;  %v6156_v8 = vld [vmem:[#allocation3 + $0x21] sm:$0xff]  ;;  %v2121_v6 = vmul.f32 %v6118_v40, %v2088_v29 }
 0x2ea   : > { %2565 = vst.msk [vmem:[#allocation3 + $0x39] sm:$0xff] %vm2505_vm12, %v2476_v7  ;;  %2728 = vrot.lane.b32.xlu1 %v6156_v8, %s4779_s14  ;;  %v6161_v12 = vld [vmem:[#allocation3 + $0x19] sm:$0xff]  ;;  %v2087_v7 = vld [vmem:[%s7210_s4 + $0x60] sm:$0xff] }
 0x2eb   : > { %v6164_v16 = vld [vmem:[#allocation3 + $0x18] sm:$0xff]  ;;  %v6166_v13 = vld [vmem:[#allocation3 + $0x20] sm:$0xff]  ;;  %2564 = vst.msk [vmem:[#allocation3 + $0x31] sm:$0xff] %vm2505_vm12, %v2475_v9  ;;  %2726 = vrot.lane.b32.xlu0 %v6161_v12, %s4779_s14  ;;  %v2120_v9 = vmul.f32 %v6118_v40, %v2087_v7 }
 0x2ec   : > { %2628 = vst.msk [vmem:[#allocation5 + $0x10] sm:$0xff] %vm2505_vm12, %v6164_v16  ;;  %2629 = vst.msk [vmem:[#allocation5 + $0x18] sm:$0xff] %vm2505_vm12, %v6166_v13 }
 0x2ed   : > { %v4649_v20 = vpop.f32.mrb[4].mxu0 }
 0x2ee   : > { %v2333_v24 = vadd.f32 %v4649_v20, %v2113_v10  ;;  %v2327_v17 = vpop.f32.mrb[5].mxu0 }
 0x2ef   : > { %v2328_v36 = vadd.f32 %v2327_v17, %v2112_v45 }
 0x2f0   : > { %v2478_v37 = vadd.f32 %v6130_v44, %v2333_v24 }
 0x2f1   : > { %v2477_v0 = vadd.f32 %v6130_v44, %v2328_v36  ;;  %v6184_v21 = vld [vmem:[#allocation3 + $0x39] sm:$0xff] }
 0x2f2   : > { %2567 = vst.msk [vmem:[#allocation3 + $0x51] sm:$0xff] %vm2505_vm12, %v2478_v37  ;;  %2732 = vrot.lane.b32.xlu1 %v6184_v21, %s4779_s14  ;;  %v6189_v28 = vld [vmem:[#allocation3 + $0x31] sm:$0xff] }
 0x2f3   : > { %v6192_v50 = vld [vmem:[#allocation3 + $0x38] sm:$0xff]  ;;  %v6194_v25 = vld [vmem:[#allocation3 + $0x30] sm:$0xff]  ;;  %2566 = vst.msk [vmem:[#allocation3 + $0x49] sm:$0xff] %vm2505_vm12, %v2477_v0  ;;  %2730 = vrot.lane.b32.xlu0 %v6189_v28, %s4779_s14 }
 0x2f4   : > { %2631 = vst.msk [vmem:[#allocation5 + $0x28] sm:$0xff] %vm2505_vm12, %v6192_v50  ;;  %2630 = vst.msk [vmem:[#allocation5 + $0x20] sm:$0xff] %vm2505_vm12, %v6194_v25 }
 0x2f5   : > { %v4652_v52 = vpop.f32.mrb[6].mxu0 }
 0x2f6   : > { %v2343_v57 = vadd.f32 %v4652_v52, %v2115_v38  ;;  %v2337_v55 = vpop.f32.mrb[7].mxu0  ;;  %v2090_v38 = vld [vmem:[%s7210_s4 + $0x78] sm:$0xff] }
 0x2f7   : > { %v2338_v59 = vadd.f32 %v2337_v55, %v2114_v54  ;;  %v2089_v54 = vld [vmem:[%s7210_s4 + $0x70] sm:$0xff]  ;;  %v2123_v52 = vmul.f32 %v6118_v40, %v2090_v38 }
 0x2f8   : > { %v2480_v48 = vadd.f32 %v6130_v44, %v2343_v57  ;;  %v2122_v57 = vmul.f32 %v6118_v40, %v2089_v54 }
 0x2f9   : > { %v2479_v60 = vadd.f32 %v6130_v44, %v2338_v59  ;;  %v2665_v61 = vld [vmem:[#allocation3 + $0x51] sm:$0xff] }
 0x2fa   : > { %2569 = vst.msk [vmem:[#allocation3 + $0x69] sm:$0xff] %vm2505_vm12, %v2480_v48  ;;  %2736 = vrot.lane.b32.xlu1 %v2665_v61, %s4779_s14  ;;  %v2664_v27 = vld [vmem:[#allocation3 + $0x49] sm:$0xff] }
 0x2fb   : > { %v6215_v1 = vld [vmem:[#allocation3 + $0x50] sm:$0xff]  ;;  %v6217_v62 = vld [vmem:[#allocation3 + $0x48] sm:$0xff]  ;;  %2568 = vst.msk [vmem:[#allocation3 + $0x61] sm:$0xff] %vm2505_vm12, %v2479_v60  ;;  %2734 = vrot.lane.b32.xlu0 %v2664_v27, %s4779_s14 }
 0x2fc   : > { %2633 = vst.msk [vmem:[#allocation5 + $0x38] sm:$0xff] %vm2505_vm12, %v6215_v1  ;;  %2632 = vst.msk [vmem:[#allocation5 + $0x30] sm:$0xff] %vm2505_vm12, %v6217_v62 }
 0x2fd   : > { %v4655_v32 = vpop.f32.mrb[8].mxu0 }
 0x2fe   : > { %v2353_v39 = vadd.f32 %v4655_v32, %v2117_v30  ;;  %v2347_v3 = vpop.f32.mrb[9].mxu0  ;;  %v2092_v32 = vld [vmem:[%s7210_s4 + $0x88] sm:$0xff] }
 0x2ff   : > { %v2348_v2 = vadd.f32 %v2347_v3, %v2116_v31  ;;  %v2125_v3 = vmul.f32 %v6118_v40, %v2092_v32  ;;  %v2098_v32 = vld [vmem:[%s7210_s4 + $0xb8] sm:$0xff] }
 0x300   : > { %v2482_v42 = vadd.f32 %v6130_v44, %v2353_v39  ;;  %v2091_v39 = vld [vmem:[%s7210_s4 + $0x80] sm:$0xff] }
 0x301   : > { %v2481_v46 = vadd.f32 %v6130_v44, %v2348_v2  ;;  %v2667_v51 = vld [vmem:[#allocation3 + $0x69] sm:$0xff]  ;;  %v2124_v2 = vmul.f32 %v6118_v40, %v2091_v39  ;;  %v2097_v39 = vld [vmem:[%s7210_s4 + $0xb0] sm:$0xff] }
 0x302   : > { %2571 = vst.msk [vmem:[#allocation3 + $0x81] sm:$0xff] %vm2505_vm12, %v2482_v42  ;;  %2740 = vrot.lane.b32.xlu1 %v2667_v51, %s4779_s14  ;;  %v2666_v53 = vld [vmem:[#allocation3 + $0x61] sm:$0xff] }
 0x303   : > { %v6237_v63 = vld [vmem:[#allocation3 + $0x68] sm:$0xff]  ;;  %v6239_v11 = vld [vmem:[#allocation3 + $0x60] sm:$0xff]  ;;  %2570 = vst.msk [vmem:[#allocation3 + $0x79] sm:$0xff] %vm2505_vm12, %v2481_v46  ;;  %2738 = vrot.lane.b32.xlu0 %v2666_v53, %s4779_s14 }
 0x304   : > { %2635 = vst.msk [vmem:[#allocation5 + $0x48] sm:$0xff] %vm2505_vm12, %v6237_v63  ;;  %2634 = vst.msk [vmem:[#allocation5 + $0x40] sm:$0xff] %vm2505_vm12, %v6239_v11 }
 0x305   : > { %v4658_v15 = vpop.f32.mrb[10].mxu0 }
 0x306   : > { %v2363_v18 = vadd.f32 %v4658_v15, %v2119_v56  ;;  %v2357_v19 = vpop.f32.mrb[11].mxu0 }
 0x307   : > { %v2358_v22 = vadd.f32 %v2357_v19, %v2118_v14  ;;  %v2094_v19 = vld [vmem:[%s7210_s4 + $0x98] sm:$0xff] }
 0x308   : > { %v2484_v35 = vadd.f32 %v6130_v44, %v2363_v18 }
 0x309   : > { %v2483_v23 = vadd.f32 %v6130_v44, %v2358_v22  ;;  %v2669_v49 = vld [vmem:[#allocation3 + $0x81] sm:$0xff] }
 0x30a   : > { %2573 = vst.msk [vmem:[#allocation3 + $0x99] sm:$0xff] %vm2505_vm12, %v2484_v35  ;;  %2744 = vrot.lane.b32.xlu1 %v2669_v49, %s4779_s14  ;;  %v2668_v5 = vld [vmem:[#allocation3 + $0x79] sm:$0xff]  ;;  %v2127_v35 = vmul.f32 %v6118_v40, %v2094_v19 }
 0x30b   : > { %v6255_v4 = vld [vmem:[#allocation3 + $0x80] sm:$0xff]  ;;  %v6257_v33 = vld [vmem:[#allocation3 + $0x78] sm:$0xff]  ;;  %2572 = vst.msk [vmem:[#allocation3 + $0x91] sm:$0xff] %vm2505_vm12, %v2483_v23  ;;  %2742 = vrot.lane.b32.xlu0 %v2668_v5, %s4779_s14 }
 0x30c   : > { %2637 = vst.msk [vmem:[#allocation5 + $0x58] sm:$0xff] %vm2505_vm12, %v6255_v4  ;;  %2636 = vst.msk [vmem:[#allocation5 + $0x50] sm:$0xff] %vm2505_vm12, %v6257_v33  ;;  %v2093_v22 = vld [vmem:[%s7210_s4 + $0x90] sm:$0xff] }
 0x30d   : > { %v2126_v23 = vmul.f32 %v6118_v40, %v2093_v22 }
 0x310   : > { %v4661_v10 = vpop.f32.mrb[12].mxu0 }
 0x311   : > { %v2373_v45 = vadd.f32 %v4661_v10, %v2121_v6  ;;  %v2367_v20 = vpop.f32.mrb[13].mxu0  ;;  %v2671_v24 = vld [vmem:[#allocation3 + $0x99] sm:$0xff] }
 0x312   : > { %v2368_v17 = vadd.f32 %v2367_v20, %v2120_v9  ;;  %2748 = vrot.lane.b32.xlu1 %v2671_v24, %s4779_s14  ;;  %v2670_v36 = vld [vmem:[#allocation3 + $0x91] sm:$0xff]  ;;  %v2068_v20 = vld [vmem:[#allocation4 + $0xf0] sm:$0xff]  ;;  %v2069_v24 = vld [vmem:[#allocation4 + $0xf8] sm:$0xff] }
 0x313   : > { %v6271_v34 = vld [vmem:[#allocation3 + $0x98] sm:$0xff]  ;;  %v6273_v37 = vld [vmem:[#allocation3 + $0x90] sm:$0xff]  ;;  %v2486_v47 = vadd.f32 %v6130_v44, %v2373_v45  ;;  %2746 = vrot.lane.b32.xlu0 %v2670_v36, %s4779_s14  ;;  %4686 = vmatprep.mubr.msk.f32.mxu0 %vm2140_vm11, %v2068_v20 }
 0x314   : > { %2639 = vst.msk [vmem:[#allocation5 + $0x68] sm:$0xff] %vm2505_vm12, %v6271_v34  ;;  %2638 = vst.msk [vmem:[#allocation5 + $0x60] sm:$0xff] %vm2505_vm12, %v6273_v37  ;;  %v2485_v0 = vadd.f32 %v6130_v44, %v2368_v17  ;;  %4687 = vmatmul.mubr.msk.f32.gmra.mrb[30].mxu0 %vm2140_vm11, %v2069_v24 }
 0x315   : > { %2575 = vst.msk [vmem:[#allocation3 + $0xb1] sm:$0xff] %vm2505_vm12, %v2486_v47  ;;  %v2096_v47 = vld [vmem:[%s7210_s4 + $0xa8] sm:$0xff] }
 0x316   : > { %2574 = vst.msk [vmem:[#allocation3 + $0xa9] sm:$0xff] %vm2505_vm12, %v2485_v0  ;;  %v2095_v0 = vld [vmem:[%s7210_s4 + $0xa0] sm:$0xff]  ;;  %v2129_v38 = vmul.f32 %v6118_v40, %v2096_v47 }
 0x317   : > { %v2128_v54 = vmul.f32 %v6118_v40, %v2095_v0 }
 0x31c   : > { %v4664_v55 = vpop.f32.mrb[14].mxu0  ;;  %v2673_v59 = vld [vmem:[#allocation3 + $0xb1] sm:$0xff] }
 0x31d   : > { %v2383_v58 = vadd.f32 %v4664_v55, %v2123_v52  ;;  %2752 = vrot.lane.b32.xlu1 %v2673_v59, %s4779_s14  ;;  %v2377_v48 = vpop.f32.mrb[15].mxu0  ;;  %v2672_v26 = vld [vmem:[#allocation3 + $0xa9] sm:$0xff] }
 0x31e   : > { %v6293_v60 = vld [vmem:[#allocation3 + $0xb0] sm:$0xff]  ;;  %v6295_v61 = vld [vmem:[#allocation3 + $0xa8] sm:$0xff]  ;;  %v2378_v27 = vadd.f32 %v2377_v48, %v2122_v57  ;;  %2750 = vrot.lane.b32.xlu0 %v2672_v26, %s4779_s14 }
 0x31f   : > { %2641 = vst.msk [vmem:[#allocation5 + $0x78] sm:$0xff] %vm2505_vm12, %v6293_v60  ;;  %2640 = vst.msk [vmem:[#allocation5 + $0x70] sm:$0xff] %vm2505_vm12, %v6295_v61  ;;  %v2488_v30 = vadd.f32 %v6130_v44, %v2383_v58 }
 0x320   : > { %v2487_v31 = vadd.f32 %v6130_v44, %v2378_v27 }
 0x321   : > { %2577 = vst.msk [vmem:[#allocation3 + $0xc9] sm:$0xff] %vm2505_vm12, %v2488_v30 }
 0x322   : > { %2576 = vst.msk [vmem:[#allocation3 + $0xc1] sm:$0xff] %vm2505_vm12, %v2487_v31 }
 0x328   : > { %v4667_v41 = vpop.f32.mrb[16].mxu0  ;;  %v2675_v42 = vld [vmem:[#allocation3 + $0xc9] sm:$0xff] }
 0x329   : > { %v2393_v43 = vadd.f32 %v4667_v41, %v2125_v3  ;;  %2756 = vrot.lane.b32.xlu1 %v2675_v42, %s4779_s14  ;;  %v2387_v46 = vpop.f32.mrb[17].mxu0  ;;  %v2674_v51 = vld [vmem:[#allocation3 + $0xc1] sm:$0xff]  ;;  %v2131_v3 = vmul.f32 %v6118_v40, %v2098_v32 }
 0x32a   : > { %v6315_v53 = vld [vmem:[#allocation3 + $0xc8] sm:$0xff]  ;;  %v6317_v56 = vld [vmem:[#allocation3 + $0xc0] sm:$0xff]  ;;  %v2388_v14 = vadd.f32 %v2387_v46, %v2124_v2  ;;  %2754 = vrot.lane.b32.xlu0 %v2674_v51, %s4779_s14  ;;  %v2130_v2 = vmul.f32 %v6118_v40, %v2097_v39 }
 0x32b   : > { %2643 = vst.msk [vmem:[#allocation5 + $0x88] sm:$0xff] %vm2505_vm12, %v6315_v53  ;;  %2642 = vst.msk [vmem:[#allocation5 + $0x80] sm:$0xff] %vm2505_vm12, %v6317_v56  ;;  %v2490_v15 = vadd.f32 %v6130_v44, %v2393_v43 }
 0x32c   : > { %v2489_v18 = vadd.f32 %v6130_v44, %v2388_v14 }
 0x32d   : > { %2579 = vst.msk [vmem:[#allocation3 + $0xe1] sm:$0xff] %vm2505_vm12, %v2490_v15 }
 0x32e   : > { %2578 = vst.msk [vmem:[#allocation3 + $0xd9] sm:$0xff] %vm2505_vm12, %v2489_v18 }
 0x334   : > { %v4670_v49 = vpop.f32.mrb[18].mxu0  ;;  %v6336_v29 = vld [vmem:[#allocation3 + $0xe1] sm:$0xff] }
 0x335   : > { %v2403_v5 = vadd.f32 %v4670_v49, %v2127_v35  ;;  %2760 = vrot.lane.b32.xlu1 %v6336_v29, %s4779_s14  ;;  %v2397_v7 = vpop.f32.mrb[19].mxu0  ;;  %v6340_v6 = vld [vmem:[#allocation3 + $0xd9] sm:$0xff] }
 0x336   : > { %v6342_v9 = vld [vmem:[#allocation3 + $0xe0] sm:$0xff]  ;;  %v2398_v10 = vadd.f32 %v2397_v7, %v2126_v23  ;;  %2758 = vrot.lane.b32.xlu0 %v6340_v6, %s4779_s14  ;;  %v6348_v45 = vld [vmem:[#allocation3 + $0xd8] sm:$0xff]  ;;  %v2099_v23 = vld [vmem:[%s7210_s4 + $0xc0] sm:$0xff] }
 0x337   : > { %2645 = vst.msk [vmem:[#allocation5 + $0x98] sm:$0xff] %vm2505_vm12, %v6342_v9  ;;  %v2492_v17 = vadd.f32 %v6130_v44, %v2403_v5  ;;  %2644 = vst.msk [vmem:[#allocation5 + $0x90] sm:$0xff] %vm2505_vm12, %v6348_v45  ;;  %v2100_v35 = vld [vmem:[%s7210_s4 + $0xc8] sm:$0xff]  ;;  %v2132_v5 = vmul.f32 %v6118_v40, %v2099_v23 }
 0x338   : > { %v2491_v36 = vadd.f32 %v6130_v44, %v2398_v10  ;;  %v2133_v49 = vmul.f32 %v6118_v40, %v2100_v35 }
 0x339   : > { %2581 = vst.msk [vmem:[#allocation3 + $0xf9] sm:$0xff] %vm2505_vm12, %v2492_v17 }
 0x33a   : > { %2580 = vst.msk [vmem:[#allocation3 + $0xf1] sm:$0xff] %vm2505_vm12, %v2491_v36 }
 0x340   : > { %v4673_v52 = vpop.f32.mrb[20].mxu0  ;;  %v6366_v57 = vld [vmem:[#allocation3 + $0xf9] sm:$0xff] }
 0x341   : > { %v2413_v55 = vadd.f32 %v4673_v52, %v2129_v38  ;;  %2764 = vrot.lane.b32.xlu1 %v6366_v57, %s4779_s14  ;;  %v2407_v59 = vpop.f32.mrb[21].mxu0  ;;  %v6370_v58 = vld [vmem:[#allocation3 + $0xf1] sm:$0xff] }
 0x342   : > { %v6372_v48 = vld [vmem:[#allocation3 + $0xf8] sm:$0xff]  ;;  %v2408_v26 = vadd.f32 %v2407_v59, %v2128_v54  ;;  %2762 = vrot.lane.b32.xlu0 %v6370_v58, %s4779_s14  ;;  %v6378_v27 = vld [vmem:[#allocation3 + $0xf0] sm:$0xff]  ;;  %v2102_v59 = vld [vmem:[%s7210_s4 + $0xd8] sm:$0xff] }
 0x343   : > { %2647 = vst.msk [vmem:[#allocation5 + $0xa8] sm:$0xff] %vm2505_vm12, %v6372_v48  ;;  %v2494_v30 = vadd.f32 %v6130_v44, %v2413_v55  ;;  %2646 = vst.msk [vmem:[#allocation5 + $0xa0] sm:$0xff] %vm2505_vm12, %v6378_v27 }
 0x344   : > { %v2493_v31 = vadd.f32 %v6130_v44, %v2408_v26  ;;  %v2101_v26 = vld [vmem:[%s7210_s4 + $0xd0] sm:$0xff] }
 0x345   : > { %2583 = vst.msk [vmem:[#allocation3 + $0x111] sm:$0xff] %vm2505_vm12, %v2494_v30  ;;  %v2135_v30 = vmul.f32 %v6118_v40, %v2102_v59 }
 0x346   : > { %2582 = vst.msk [vmem:[#allocation3 + $0x109] sm:$0xff] %vm2505_vm12, %v2493_v31  ;;  %v2134_v31 = vmul.f32 %v6118_v40, %v2101_v26 }
 0x34c   : > { %v4676_v41 = vpop.f32.mrb[22].mxu0  ;;  %v6394_v42 = vld [vmem:[#allocation3 + $0x111] sm:$0xff] }
 0x34d   : > { %v2423_v43 = vadd.f32 %v4676_v41, %v2131_v3  ;;  %2768 = vrot.lane.b32.xlu1 %v6394_v42, %s4779_s14  ;;  %v2417_v46 = vpop.f32.mrb[23].mxu0  ;;  %v6398_v51 = vld [vmem:[#allocation3 + $0x109] sm:$0xff] }
 0x34e   : > { %v6400_v14 = vld [vmem:[#allocation3 + $0x110] sm:$0xff]  ;;  %v2418_v15 = vadd.f32 %v2417_v46, %v2130_v2  ;;  %2766 = vrot.lane.b32.xlu0 %v6398_v51, %s4779_s14  ;;  %v6406_v18 = vld [vmem:[#allocation3 + $0x108] sm:$0xff] }
 0x34f   : > { %2649 = vst.msk [vmem:[#allocation5 + $0xb8] sm:$0xff] %vm2505_vm12, %v6400_v14  ;;  %v2496_v19 = vadd.f32 %v6130_v44, %v2423_v43  ;;  %2648 = vst.msk [vmem:[#allocation5 + $0xb0] sm:$0xff] %vm2505_vm12, %v6406_v18 }
 0x350   : > { %v2495_v22 = vadd.f32 %v6130_v44, %v2418_v15 }
 0x351   : > { %2585 = vst.msk [vmem:[#allocation3 + $0x129] sm:$0xff] %vm2505_vm12, %v2496_v19 }
 0x352   : > { %2584 = vst.msk [vmem:[#allocation3 + $0x121] sm:$0xff] %vm2505_vm12, %v2495_v22 }
 0x358   : > { %v4679_v7 = vpop.f32.mrb[24].mxu0  ;;  %v6422_v10 = vld [vmem:[#allocation3 + $0x129] sm:$0xff] }
 0x359   : > { %v2433_v20 = vadd.f32 %v4679_v7, %v2133_v49  ;;  %2772 = vrot.lane.b32.xlu1 %v6422_v10, %s4779_s14  ;;  %v2427_v24 = vpop.f32.mrb[25].mxu0  ;;  %v6426_v17 = vld [vmem:[#allocation3 + $0x121] sm:$0xff]  ;;  %v2104_v49 = vld [vmem:[%s7210_s4 + $0xe8] sm:$0xff] }
 0x35a   : > { %v6428_v36 = vld [vmem:[#allocation3 + $0x128] sm:$0xff]  ;;  %v2428_v47 = vadd.f32 %v2427_v24, %v2132_v5  ;;  %2770 = vrot.lane.b32.xlu0 %v6426_v17, %s4779_s14  ;;  %v6434_v0 = vld [vmem:[#allocation3 + $0x120] sm:$0xff]  ;;  %v2103_v5 = vld [vmem:[%s7210_s4 + $0xe0] sm:$0xff]  ;;  %v2137_v24 = vmul.f32 %v6118_v40, %v2104_v49 }
 0x35b   : > { %2651 = vst.msk [vmem:[#allocation5 + $0xc8] sm:$0xff] %vm2505_vm12, %v6428_v36  ;;  %v2498_v38 = vadd.f32 %v6130_v44, %v2433_v20  ;;  %2650 = vst.msk [vmem:[#allocation5 + $0xc0] sm:$0xff] %vm2505_vm12, %v6434_v0  ;;  %v2851_v49 = vld [vmem:[#allocation3 + $0x2] sm:$0xff] }
 0x35c   : > { %v2497_v54 = vadd.f32 %v6130_v44, %v2428_v47  ;;  %v2729_v52 = vpop.permute.xlu1 %2728  ;;  %v2136_v47 = vmul.f32 %v6118_v40, %v2103_v5  ;;  %v6508_v5 = vld [vmem:[#allocation3 + $0x22] sm:$0xff] }
 0x35d   : > { %2587 = vst.msk [vmem:[#allocation3 + $0x141] sm:$0xff] %vm2505_vm12, %v2498_v38  ;;  %v2727_v55 = vpop.permute.xlu0 %2726 }
 0x35e   : > { %2822 = vst.msk [vmem:[#allocation5 + $0x18] sm:$0xff] %vm2818_vm14, %v2729_v52  ;;  %2821 = vst.msk [vmem:[#allocation5 + $0x10] sm:$0xff] %vm2818_vm14, %v2727_v55 }
 0x35f   : > { %2586 = vst.msk [vmem:[#allocation3 + $0x139] sm:$0xff] %vm2505_vm12, %v2497_v54 }
 0x364   : > { %v4682_v32 = vpop.f32.mrb[26].mxu0  ;;  %v2685_v39 = vld [vmem:[#allocation3 + $0x141] sm:$0xff]  ;;  %v2733_v3 = vpop.permute.xlu1 %2732 }
 0x365   : > { %v2443_v2 = vadd.f32 %v4682_v32, %v2135_v30  ;;  %2776 = vrot.lane.b32.xlu1 %v2685_v39, %s4779_s14  ;;  %v2437_v41 = vpop.f32.mrb[27].mxu0  ;;  %2824 = vst.msk [vmem:[#allocation5 + $0x28] sm:$0xff] %vm2818_vm14, %v2733_v3  ;;  %v2731_v46 = vpop.permute.xlu0 %2730 }
 0x366   : > { %v2684_v43 = vld [vmem:[#allocation3 + $0x139] sm:$0xff]  ;;  %v2438_v19 = vadd.f32 %v2437_v41, %v2134_v31  ;;  %2823 = vst.msk [vmem:[#allocation5 + $0x20] sm:$0xff] %vm2818_vm14, %v2731_v46 }
 0x367   : > { %v6454_v15 = vld [vmem:[#allocation3 + $0x140] sm:$0xff]  ;;  %2774 = vrot.lane.b32.xlu0 %v2684_v43, %s4779_s14  ;;  %v6460_v22 = vld [vmem:[#allocation3 + $0x138] sm:$0xff]  ;;  %v2500_v35 = vadd.f32 %v6130_v44, %v2443_v2 }
 0x368   : > { %2653 = vst.msk [vmem:[#allocation5 + $0xd8] sm:$0xff] %vm2505_vm12, %v6454_v15  ;;  %2652 = vst.msk [vmem:[#allocation5 + $0xd0] sm:$0xff] %vm2505_vm12, %v6460_v22  ;;  %v2499_v23 = vadd.f32 %v6130_v44, %v2438_v19 }
 0x369   : > { %2589 = vst.msk [vmem:[#allocation3 + $0x159] sm:$0xff] %vm2505_vm12, %v2500_v35 }
 0x36a   : > { %2588 = vst.msk [vmem:[#allocation3 + $0x151] sm:$0xff] %vm2505_vm12, %v2499_v23 }
 0x36c   : > { %v2737_v7 = vpop.permute.xlu1 %2736 }
 0x36d   : > { %2826 = vst.msk [vmem:[#allocation5 + $0x38] sm:$0xff] %vm2818_vm14, %v2737_v7  ;;  %v2735_v20 = vpop.permute.xlu0 %2734 }
 0x36e   : > { %2825 = vst.msk [vmem:[#allocation5 + $0x30] sm:$0xff] %vm2818_vm14, %v2735_v20  ;;  %v6513_v20 = vld [vmem:[#allocation3 + $0x1a] sm:$0xff] }
 0x370   : > { %v4685_v38 = vpop.f32.mrb[28].mxu0  ;;  %v2687_v54 = vld [vmem:[#allocation3 + $0x159] sm:$0xff] }
 0x371   : > { %v2453_v52 = vadd.f32 %v4685_v38, %v2137_v24  ;;  %2780 = vrot.lane.b32.xlu1 %v2687_v54, %s4779_s14  ;;  %v2447_v55 = vpop.f32.mrb[29].mxu0  ;;  %v2686_v59 = vld [vmem:[#allocation3 + $0x151] sm:$0xff] }
 0x372   : > { %v6479_v26 = vld [vmem:[#allocation3 + $0x158] sm:$0xff]  ;;  %v2448_v30 = vadd.f32 %v2447_v55, %v2136_v47  ;;  %2778 = vrot.lane.b32.xlu0 %v2686_v59, %s4779_s14  ;;  %v6484_v31 = vld [vmem:[#allocation3 + $0x150] sm:$0xff] }
 0x373   : > { %7316 = vst [vmem:[#allocation7_spill] sm:$0xff] %v6479_v26  ;;  %2655 = vst.msk [vmem:[#allocation5 + $0xe8] sm:$0xff] %vm2505_vm12, %v6479_v26  ;;  %v2502_v32 = vadd.f32 %v6130_v44, %v2453_v52  ;;  %v6518_v47 = vld [vmem:[#allocation3 + $0x3a] sm:$0xff]  ;;  %v6522_v38 = vld [vmem:[#allocation3 + $0x32] sm:$0xff] }
 0x374   : > { %7317 = vst [vmem:[#allocation8_spill] sm:$0xff] %v6484_v31  ;;  %2654 = vst.msk [vmem:[#allocation5 + $0xe0] sm:$0xff] %vm2505_vm12, %v6484_v31  ;;  %v2501_v39 = vadd.f32 %v6130_v44, %v2448_v30  ;;  %v2741_v3 = vpop.permute.xlu1 %2740  ;;  %v2852_v44 = vld [vmem:[#allocation3 + $0xa] sm:$0xff]  ;;  %v6526_v54 = vld [vmem:[#allocation3 + $0x52] sm:$0xff] }
 0x375   : > { %2591 = vst.msk [vmem:[#allocation3 + $0x171] sm:$0xff] %vm2505_vm12, %v2502_v32  ;;  %v2739_v2 = vpop.permute.xlu0 %2738  ;;  %v6530_v52 = vld [vmem:[#allocation3 + $0x4a] sm:$0xff]  ;;  %v6540_v32 = vld [vmem:[#allocation3 + $0x62] sm:$0xff]  ;;  %v2879_v31 = vld [vmem:[#allocation3 + $0x152] sm:$0xff] }
 0x376   : > { %2828 = vst.msk [vmem:[#allocation5 + $0x48] sm:$0xff] %vm2818_vm14, %v2741_v3  ;;  %2827 = vst.msk [vmem:[#allocation5 + $0x40] sm:$0xff] %vm2818_vm14, %v2739_v2  ;;  %v6535_v30 = vld [vmem:[#allocation3 + $0x6a] sm:$0xff]  ;;  %v6548_v3 = vld [vmem:[#allocation3 + $0x7a] sm:$0xff] }
 0x377   : > { %2590 = vst.msk [vmem:[#allocation3 + $0x169] sm:$0xff] %vm2505_vm12, %v2501_v39  ;;  %v6544_v39 = vld [vmem:[#allocation3 + $0x82] sm:$0xff]  ;;  %7320 = vst [vmem:[#allocation11_spill] sm:$0xff] %v6548_v3  ;;  %v2864_v2 = vld [vmem:[#allocation3 + $0x9a] sm:$0xff] }
 0x37c   : > { %v2689_v41 = vld [vmem:[#allocation3 + $0x171] sm:$0xff]  ;;  %v2745_v43 = vpop.permute.xlu1 %2744 }
 0x37d   : > { %2784 = vrot.lane.b32.xlu1 %v2689_v41, %s4779_s14  ;;  %2830 = vst.msk [vmem:[#allocation5 + $0x58] sm:$0xff] %vm2818_vm14, %v2745_v43  ;;  %v2743_v19 = vpop.permute.xlu0 %2742  ;;  %v2863_v41 = vld [vmem:[#allocation3 + $0x92] sm:$0xff] }
 0x37e   : > { %v2688_v46 = vld [vmem:[#allocation3 + $0x169] sm:$0xff]  ;;  %2829 = vst.msk [vmem:[#allocation5 + $0x50] sm:$0xff] %vm2818_vm14, %v2743_v19  ;;  %v2866_v19 = vld [vmem:[#allocation3 + $0xb2] sm:$0xff] }
 0x37f   : > { %v6496_v35 = vld [vmem:[#allocation3 + $0x170] sm:$0xff]  ;;  %2782 = vrot.lane.b32.xlu0 %v2688_v46, %s4779_s14  ;;  %v6502_v23 = vld [vmem:[#allocation3 + $0x168] sm:$0xff]  ;;  %s4786_s14 = smov 40  }
 0x380   : > { %7318 = vst [vmem:[#allocation9_spill] sm:$0xff] %v6496_v35  ;;  %2657 = vst.msk [vmem:[#allocation5 + $0xf8] sm:$0xff] %vm2505_vm12, %v6496_v35  ;;  %v2880_v35 = vld [vmem:[#allocation3 + $0x15a] sm:$0xff]  ;;  %v2881_v26 = vld [vmem:[#allocation3 + $0x16a] sm:$0xff] }
 0x381   : > { %7319 = vst [vmem:[#allocation10_spill] sm:$0xff] %v6502_v23  ;;  %2656 = vst.msk [vmem:[#allocation5 + $0xf0] sm:$0xff] %vm2505_vm12, %v6502_v23  ;;  %2917 = vrot.lane.b32.xlu1 %v2852_v44, %s4781_s16  ;;  %v2865_v44 = vld [vmem:[#allocation3 + $0xaa] sm:$0xff]  ;;  %v6600_v23 = vld [vmem:[#allocation3 + $0x13a] sm:$0xff] }
 0x383   : > { %2915 = vrot.lane.b32.xlu0 %v2851_v49, %s4781_s16  ;;  %v2868_v49 = vld [vmem:[#allocation3 + $0xca] sm:$0xff] }
 0x384   : > { %v2749_v7 = vpop.permute.xlu1 %2748 }
 0x385   : > { %2921 = vrot.lane.b32.xlu1 %v6508_v5, %s4781_s16  ;;  %2832 = vst.msk [vmem:[#allocation5 + $0x68] sm:$0xff] %vm2818_vm14, %v2749_v7  ;;  %v2747_v24 = vpop.permute.xlu0 %2746  ;;  %v2867_v7 = vld [vmem:[#allocation3 + $0xc2] sm:$0xff] }
 0x386   : > { %2831 = vst.msk [vmem:[#allocation5 + $0x60] sm:$0xff] %vm2818_vm14, %v2747_v24  ;;  %v6560_v24 = vld [vmem:[#allocation3 + $0xe2] sm:$0xff] }
 0x387   : > { %2919 = vrot.lane.b32.xlu0 %v6513_v20, %s4781_s16 }
 0x389   : > { %2925 = vrot.lane.b32.xlu1 %v6518_v47, %s4781_s16 }
 0x38b   : > { %2923 = vrot.lane.b32.xlu0 %v6522_v38, %s4781_s16 }
 0x38d   : > { %2929 = vrot.lane.b32.xlu1 %v6526_v54, %s4781_s16 }
 0x38f   : > { %2927 = vrot.lane.b32.xlu0 %v6530_v52, %s4781_s16  ;;  %v2753_v55 = vpop.permute.xlu1 %2752 }
 0x390   : > { %2834 = vst.msk [vmem:[#allocation5 + $0x78] sm:$0xff] %vm2818_vm14, %v2753_v55  ;;  %v2751_v59 = vpop.permute.xlu0 %2750  ;;  %v6564_v55 = vld [vmem:[#allocation3 + $0xda] sm:$0xff] }
 0x391   : > { %2833 = vst.msk [vmem:[#allocation5 + $0x70] sm:$0xff] %vm2818_vm14, %v2751_v59  ;;  %2933 = vrot.lane.b32.xlu1 %v6535_v30, %s4781_s16 }
 0x393   : > { %2931 = vrot.lane.b32.xlu0 %v6540_v32, %s4781_s16 }
 0x395   : > { %2937 = vrot.lane.b32.xlu1 %v6544_v39, %s4781_s16 }
 0x397   : > { %2935 = vrot.lane.b32.xlu0 %v6548_v3, %s4781_s16 }
 0x399   : > { %2941 = vrot.lane.b32.xlu1 %v2864_v2, %s4781_s16 }
 0x39b   : > { %2939 = vrot.lane.b32.xlu0 %v2863_v41, %s4781_s16  ;;  %v2757_v43 = vpop.permute.xlu1 %2756  ;;  %v6569_v41 = vld [vmem:[#allocation3 + $0xfa] sm:$0xff] }
 0x39c   : > { %2836 = vst.msk [vmem:[#allocation5 + $0x88] sm:$0xff] %vm2818_vm14, %v2757_v43  ;;  %v2755_v46 = vpop.permute.xlu0 %2754  ;;  %v6574_v43 = vld [vmem:[#allocation3 + $0xf2] sm:$0xff] }
 0x39d   : > { %2835 = vst.msk [vmem:[#allocation5 + $0x80] sm:$0xff] %vm2818_vm14, %v2755_v46  ;;  %2945 = vrot.lane.b32.xlu1 %v2866_v19, %s4781_s16  ;;  %v6578_v46 = vld [vmem:[#allocation3 + $0x112] sm:$0xff]  ;;  %v6582_v19 = vld [vmem:[#allocation3 + $0x10a] sm:$0xff] }
 0x39f   : > { %2943 = vrot.lane.b32.xlu0 %v2865_v44, %s4781_s16  ;;  %v6586_v44 = vld [vmem:[#allocation3 + $0x12a] sm:$0xff] }
 0x3a1   : > { %2949 = vrot.lane.b32.xlu1 %v2868_v49, %s4781_s16  ;;  %v6590_v49 = vld [vmem:[#allocation3 + $0x122] sm:$0xff] }
 0x3a3   : > { %2947 = vrot.lane.b32.xlu0 %v2867_v7, %s4781_s16 }
 0x3a5   : > { %2953 = vrot.lane.b32.xlu1 %v6560_v24, %s4781_s16 }
 0x3a7   : > { %2951 = vrot.lane.b32.xlu0 %v6564_v55, %s4781_s16  ;;  %v2761_v59 = vpop.permute.xlu1 %2760 }
 0x3a8   : > { %2838 = vst.msk [vmem:[#allocation5 + $0x98] sm:$0xff] %vm2818_vm14, %v2761_v59  ;;  %v2759_v2 = vpop.permute.xlu0 %2758 }
 0x3a9   : > { %2837 = vst.msk [vmem:[#allocation5 + $0x90] sm:$0xff] %vm2818_vm14, %v2759_v2  ;;  %2957 = vrot.lane.b32.xlu1 %v6569_v41, %s4781_s16  ;;  %v6595_v2 = vld [vmem:[#allocation3 + $0x142] sm:$0xff] }
 0x3ab   : > { %2955 = vrot.lane.b32.xlu0 %v6574_v43, %s4781_s16 }
 0x3ad   : > { %2961 = vrot.lane.b32.xlu1 %v6578_v46, %s4781_s16 }
 0x3af   : > { %2959 = vrot.lane.b32.xlu0 %v6582_v19, %s4781_s16 }
 0x3b1   : > { %2965 = vrot.lane.b32.xlu1 %v6586_v44, %s4781_s16 }
 0x3b3   : > { %2963 = vrot.lane.b32.xlu0 %v6590_v49, %s4781_s16  ;;  %v2765_v7 = vpop.permute.xlu1 %2764 }
 0x3b4   : > { %2840 = vst.msk [vmem:[#allocation5 + $0xa8] sm:$0xff] %vm2818_vm14, %v2765_v7  ;;  %v2763_v59 = vpop.permute.xlu0 %2762  ;;  %v2882_v7 = vld [vmem:[#allocation3 + $0x172] sm:$0xff] }
 0x3b5   : > { %2839 = vst.msk [vmem:[#allocation5 + $0xa0] sm:$0xff] %vm2818_vm14, %v2763_v59  ;;  %2969 = vrot.lane.b32.xlu1 %v6595_v2, %s4781_s16 }
 0x3b7   : > { %2967 = vrot.lane.b32.xlu0 %v6600_v23, %s4781_s16 }
 0x3b9   : > { %2973 = vrot.lane.b32.xlu1 %v2880_v35, %s4781_s16 }
 0x3bb   : > { %2971 = vrot.lane.b32.xlu0 %v2879_v31, %s4781_s16 }
 0x3bd   : > { %2977 = vrot.lane.b32.xlu1 %v2882_v7, %s4781_s16 }
 0x3bf   : > { %2975 = vrot.lane.b32.xlu0 %v2881_v26, %s4781_s16  ;;  %v2769_v59 = vpop.permute.xlu1 %2768  ;;  %s4787_s16 = smov 48  }
 0x3c0   : > { %2842 = vst.msk [vmem:[#allocation5 + $0xb8] sm:$0xff] %vm2818_vm14, %v2769_v59  ;;  %v2767_v3 = vpop.permute.xlu0 %2766 }
 0x3c1   : > { %2841 = vst.msk [vmem:[#allocation5 + $0xb0] sm:$0xff] %vm2818_vm14, %v2767_v3  ;;  %3110 = vrot.lane.b32.xlu1 %v6166_v13, %s4783_s18 }
 0x3c3   : > { %3108 = vrot.lane.b32.xlu0 %v6164_v16, %s4783_s18 }
 0x3c5   : > { %3114 = vrot.lane.b32.xlu1 %v6192_v50, %s4783_s18 }
 0x3c7   : > { %3112 = vrot.lane.b32.xlu0 %v6194_v25, %s4783_s18 }
 0x3c9   : > { %3118 = vrot.lane.b32.xlu1 %v6215_v1, %s4783_s18 }
 0x3cb   : > { %3116 = vrot.lane.b32.xlu0 %v6217_v62, %s4783_s18  ;;  %v2773_v26 = vpop.permute.xlu1 %2772 }
 0x3cc   : > { %2844 = vst.msk [vmem:[#allocation5 + $0xc8] sm:$0xff] %vm2818_vm14, %v2773_v26  ;;  %v2771_v31 = vpop.permute.xlu0 %2770 }
 0x3cd   : > { %2843 = vst.msk [vmem:[#allocation5 + $0xc0] sm:$0xff] %vm2818_vm14, %v2771_v31  ;;  %3122 = vrot.lane.b32.xlu1 %v6237_v63, %s4783_s18 }
 0x3cf   : > { %3120 = vrot.lane.b32.xlu0 %v6239_v11, %s4783_s18 }
 0x3d1   : > { %3126 = vrot.lane.b32.xlu1 %v6255_v4, %s4783_s18 }
 0x3d3   : > { %3124 = vrot.lane.b32.xlu0 %v6257_v33, %s4783_s18 }
 0x3d5   : > { %3130 = vrot.lane.b32.xlu1 %v6271_v34, %s4783_s18 }
 0x3d7   : > { %3128 = vrot.lane.b32.xlu0 %v6273_v37, %s4783_s18  ;;  %v2777_v16 = vpop.permute.xlu1 %2776 }
 0x3d8   : > { %2846 = vst.msk [vmem:[#allocation5 + $0xd8] sm:$0xff] %vm2818_vm14, %v2777_v16 }
 0x3d9   : > { %v2775_v13 = vpop.permute.xlu0 %2774  ;;  %3134 = vrot.lane.b32.xlu1 %v6293_v60, %s4783_s18 }
 0x3da   : > { %2845 = vst.msk [vmem:[#allocation5 + $0xd0] sm:$0xff] %vm2818_vm14, %v2775_v13  ;;  %v4768_v13 = vld [vmem:[%s7209_s3] ss:$0 sm:$0xff] }
 0x3db   : > { %3132 = vrot.lane.b32.xlu0 %v6295_v61, %s4783_s18 }
 0x3dd   : > { %3138 = vrot.lane.b32.xlu1 %v6315_v53, %s4783_s18 }
 0x3df   : > { %3136 = vrot.lane.b32.xlu0 %v6317_v56, %s4783_s18 }
 0x3e1   : > { %3142 = vrot.lane.b32.xlu1 %v6342_v9, %s4783_s18 }
 0x3e3   : > { %3140 = vrot.lane.b32.xlu0 %v6348_v45, %s4783_s18  ;;  %v2781_v34 = vpop.permute.xlu1 %2780 }
 0x3e4   : > { %2848 = vst.msk [vmem:[#allocation5 + $0xe8] sm:$0xff] %vm2818_vm14, %v2781_v34  ;;  %v2779_v37 = vpop.permute.xlu0 %2778 }
 0x3e5   : > { %2847 = vst.msk [vmem:[#allocation5 + $0xe0] sm:$0xff] %vm2818_vm14, %v2779_v37  ;;  %3335 = vrot.lane.b32.xlu1 %v6336_v29, %s4785_s9 }
 0x3e7   : > { %3333 = vrot.lane.b32.xlu0 %v6340_v6, %s4785_s9  ;;  %v4688_v3 = vpop.f32.mrb[30].mxu0 }
 0x3e8   : > { %v2457_v59 = vpop.f32.mrb[31].mxu0 }
 0x3e9   : > { %3303 = vrot.lane.b32.xlu1 %v6156_v8, %s4785_s9 }
 0x3eb   : > { %3301 = vrot.lane.b32.xlu0 %v6161_v12, %s4785_s9 }
 0x3ed   : > { %3528 = vrot.lane.b32.xlu1 %v6560_v24, %s4786_s14  ;;  %v2105_v24 = vld [vmem:[%s7210_s4 + $0xf0] sm:$0xff] }
 0x3ee   : > { %v2138_v7 = vmul.f32 %v6118_v40, %v2105_v24 }
 0x3ef   : > { %3526 = vrot.lane.b32.xlu0 %v6564_v55, %s4786_s14  ;;  %v2785_v60 = vpop.permute.xlu1 %2784 }
 0x3f0   : > { %2850 = vst.msk [vmem:[#allocation5 + $0xf8] sm:$0xff] %vm2818_vm14, %v2785_v60  ;;  %v2458_v31 = vadd.f32 %v2457_v59, %v2138_v7 }
 0x3f1   : > { %v2783_v61 = vpop.permute.xlu0 %2782  ;;  %3496 = vrot.lane.b32.xlu1 %v6508_v5, %s4786_s14 }
 0x3f2   : > { %2849 = vst.msk [vmem:[#allocation5 + $0xf0] sm:$0xff] %vm2818_vm14, %v2783_v61  ;;  %v2503_v60 = vadd.f32 %v4768_v13, %v2458_v31  ;;  %v3240_v61 = vld [vmem:[#allocation3 + $0x39] sm:$0xff] }
 0x3f3   : > { %3494 = vrot.lane.b32.xlu0 %v6513_v20, %s4786_s14  ;;  %v2918_v8 = vpop.permute.xlu1 %2917 }
 0x3f4   : > { %3013 = vst.msk [vmem:[#allocation5 + $0x8] sm:$0xff] %vm3011_vm15, %v2918_v8  ;;  %v3239_v8 = vld [vmem:[#allocation3 + $0x31] sm:$0xff] }
 0x3f5   : > { %v2916_v12 = vpop.permute.xlu0 %2915  ;;  %3722 = vrot.lane.b32.xlu1 %v6372_v48, %s4787_s16  ;;  %2592 = vst.msk [vmem:[#allocation3 + $0x181] sm:$0xff] %vm2505_vm12, %v2503_v60 }
 0x3f6   : > { %3012 = vst.msk [vmem:[#allocation5] sm:$0xff] %vm3011_vm15, %v2916_v12 }
 0x3f7   : > { %3720 = vrot.lane.b32.xlu0 %v6378_v27, %s4787_s16  ;;  %v2922_v53 = vpop.permute.xlu1 %2921 }
 0x3f8   : > { %3015 = vst.msk [vmem:[#allocation5 + $0x18] sm:$0xff] %vm3011_vm15, %v2922_v53 }
 0x3f9   : > { %v2920_v56 = vpop.permute.xlu0 %2919  ;;  %3690 = vrot.lane.b32.xlu1 %v6192_v50, %s4787_s16 }
 0x3fa   : > { %3014 = vst.msk [vmem:[#allocation5 + $0x10] sm:$0xff] %vm3011_vm15, %v2920_v56 }
 0x3fb   : > { %3688 = vrot.lane.b32.xlu0 %v6194_v25, %s4787_s16  ;;  %v2926_v29 = vpop.permute.xlu1 %2925 }
 0x3fc   : > { %3017 = vst.msk [vmem:[#allocation5 + $0x28] sm:$0xff] %vm3011_vm15, %v2926_v29 }
 0x3fd   : > { %v2924_v6 = vpop.permute.xlu0 %2923  ;;  %3915 = vrot.lane.b32.xlu1 %v6366_v57, %s4788_s25 }
 0x3fe   : > { %3016 = vst.msk [vmem:[#allocation5 + $0x20] sm:$0xff] %vm3011_vm15, %v2924_v6 }
 0x3ff   : > { %3913 = vrot.lane.b32.xlu0 %v6370_v58, %s4788_s25  ;;  %v2930_v9 = vpop.permute.xlu1 %2929 }
 0x400   : > { %3019 = vst.msk [vmem:[#allocation5 + $0x38] sm:$0xff] %vm3011_vm15, %v2930_v9 }
 0x401   : > { %v2928_v50 = vpop.permute.xlu0 %2927  ;;  %3883 = vrot.lane.b32.xlu1 %v6184_v21, %s4788_s25 }
 0x402   : > { %3018 = vst.msk [vmem:[#allocation5 + $0x30] sm:$0xff] %vm3011_vm15, %v2928_v50 }
 0x403   : > { %3881 = vrot.lane.b32.xlu0 %v6189_v28, %s4788_s25  ;;  %v2934_v25 = vpop.permute.xlu1 %2933  ;;  %v2106_v28 = vld [vmem:[%s7210_s4 + $0xf8] sm:$0xff] }
 0x404   : > { %3021 = vst.msk [vmem:[#allocation5 + $0x48] sm:$0xff] %vm3011_vm15, %v2934_v25  ;;  %v2139_v20 = vmul.f32 %v6118_v40, %v2106_v28 }
 0x405   : > { %v2932_v45 = vpop.permute.xlu0 %2931  ;;  %4108 = vrot.lane.b32.xlu1 %v6569_v41, %s4789_s26 }
 0x406   : > { %3020 = vst.msk [vmem:[#allocation5 + $0x40] sm:$0xff] %vm3011_vm15, %v2932_v45  ;;  %v2463_v26 = vadd.f32 %v4688_v3, %v2139_v20 }
 0x407   : > { %4106 = vrot.lane.b32.xlu0 %v6574_v43, %s4789_s26  ;;  %v2938_v35 = vpop.permute.xlu1 %2937 }
 0x408   : > { %3023 = vst.msk [vmem:[#allocation5 + $0x58] sm:$0xff] %vm3011_vm15, %v2938_v35  ;;  %v2504_v34 = vadd.f32 %v4768_v13, %v2463_v26  ;;  %v3822_v26 = vld [vmem:[#allocation3 + $0x69] sm:$0xff] }
 0x409   : > { %v2936_v21 = vpop.permute.xlu0 %2935  ;;  %4076 = vrot.lane.b32.xlu1 %v6518_v47, %s4789_s26 }
 0x40a   : > { %3022 = vst.msk [vmem:[#allocation5 + $0x50] sm:$0xff] %vm3011_vm15, %v2936_v21 }
 0x40b   : > { %4074 = vrot.lane.b32.xlu0 %v6522_v38, %s4789_s26  ;;  %v2942_v5 = vpop.permute.xlu1 %2941  ;;  %2593 = vst.msk [vmem:[#allocation3 + $0x189] sm:$0xff] %vm2505_vm12, %v2504_v34 }
 0x40c   : > { %3025 = vst.msk [vmem:[#allocation5 + $0x68] sm:$0xff] %vm3011_vm15, %v2942_v5 }
 0x40d   : > { %v2940_v55 = vpop.permute.xlu0 %2939  ;;  %3146 = vrot.lane.b32.xlu1 %v6372_v48, %s4783_s18 }
 0x40e   : > { %3024 = vst.msk [vmem:[#allocation5 + $0x60] sm:$0xff] %vm3011_vm15, %v2940_v55 }
 0x40f   : > { %3144 = vrot.lane.b32.xlu0 %v6378_v27, %s4783_s18  ;;  %v2946_v16 = vpop.permute.xlu1 %2945 }
 0x410   : > { %3027 = vst.msk [vmem:[#allocation5 + $0x78] sm:$0xff] %vm3011_vm15, %v2946_v16 }
 0x411   : > { %v2944_v37 = vpop.permute.xlu0 %2943  ;;  %3339 = vrot.lane.b32.xlu1 %v6366_v57, %s4785_s9 }
 0x412   : > { %3026 = vst.msk [vmem:[#allocation5 + $0x70] sm:$0xff] %vm3011_vm15, %v2944_v37 }
 0x413   : > { %3337 = vrot.lane.b32.xlu0 %v6370_v58, %s4785_s9  ;;  %v2950_v48 = vpop.permute.xlu1 %2949 }
 0x414   : > { %3029 = vst.msk [vmem:[#allocation5 + $0x88] sm:$0xff] %vm3011_vm15, %v2950_v48  ;;  %v3260_v48 = vld [vmem:[#allocation3 + $0x129] sm:$0xff] }
 0x415   : > { %v2948_v27 = vpop.permute.xlu0 %2947  ;;  %3307 = vrot.lane.b32.xlu1 %v3240_v61, %s4785_s9 }
 0x416   : > { %3028 = vst.msk [vmem:[#allocation5 + $0x80] sm:$0xff] %vm3011_vm15, %v2948_v27  ;;  %v3259_v27 = vld [vmem:[#allocation3 + $0x121] sm:$0xff] }
 0x417   : > { %3305 = vrot.lane.b32.xlu0 %v3239_v8, %s4785_s9  ;;  %v2954_v57 = vpop.permute.xlu1 %2953 }
 0x418   : > { %3031 = vst.msk [vmem:[#allocation5 + $0x98] sm:$0xff] %vm3011_vm15, %v2954_v57 }
 0x419   : > { %v2952_v12 = vpop.permute.xlu0 %2951  ;;  %3532 = vrot.lane.b32.xlu1 %v6569_v41, %s4786_s14 }
 0x41a   : > { %3030 = vst.msk [vmem:[#allocation5 + $0x90] sm:$0xff] %vm3011_vm15, %v2952_v12 }
 0x41b   : > { %3530 = vrot.lane.b32.xlu0 %v6574_v43, %s4786_s14  ;;  %v2958_v58 = vpop.permute.xlu1 %2957 }
 0x41c   : > { %3033 = vst.msk [vmem:[#allocation5 + $0xa8] sm:$0xff] %vm3011_vm15, %v2958_v58 }
 0x41d   : > { %v2956_v53 = vpop.permute.xlu0 %2955  ;;  %3500 = vrot.lane.b32.xlu1 %v6518_v47, %s4786_s14 }
 0x41e   : > { %3032 = vst.msk [vmem:[#allocation5 + $0xa0] sm:$0xff] %vm3011_vm15, %v2956_v53 }
 0x41f   : > { %3498 = vrot.lane.b32.xlu0 %v6522_v38, %s4786_s14  ;;  %v2962_v56 = vpop.permute.xlu1 %2961 }
 0x420   : > { %3035 = vst.msk [vmem:[#allocation5 + $0xb8] sm:$0xff] %vm3011_vm15, %v2962_v56 }
 0x421   : > { %v2960_v29 = vpop.permute.xlu0 %2959  ;;  %3726 = vrot.lane.b32.xlu1 %v6400_v14, %s4787_s16 }
 0x422   : > { %3034 = vst.msk [vmem:[#allocation5 + $0xb0] sm:$0xff] %vm3011_vm15, %v2960_v29  ;;  %v3840_v29 = vld [vmem:[#allocation3 + $0x141] sm:$0xff] }
 0x423   : > { %3724 = vrot.lane.b32.xlu0 %v6406_v18, %s4787_s16  ;;  %v2966_v41 = vpop.permute.xlu1 %2965 }
 0x424   : > { %3037 = vst.msk [vmem:[#allocation5 + $0xc8] sm:$0xff] %vm3011_vm15, %v2966_v41 }
 0x425   : > { %v2964_v43 = vpop.permute.xlu0 %2963  ;;  %3694 = vrot.lane.b32.xlu1 %v6215_v1, %s4787_s16  ;;  %v3820_v1 = vld [vmem:[#allocation3 + $0x51] sm:$0xff] }
 0x426   : > { %3036 = vst.msk [vmem:[#allocation5 + $0xc0] sm:$0xff] %vm3011_vm15, %v2964_v43 }
 0x427   : > { %3692 = vrot.lane.b32.xlu0 %v6217_v62, %s4787_s16  ;;  %v2970_v47 = vpop.permute.xlu1 %2969  ;;  %v3819_v62 = vld [vmem:[#allocation3 + $0x49] sm:$0xff] }
 0x428   : > { %3039 = vst.msk [vmem:[#allocation5 + $0xd8] sm:$0xff] %vm3011_vm15, %v2970_v47 }
 0x429   : > { %v2968_v38 = vpop.permute.xlu0 %2967  ;;  %3919 = vrot.lane.b32.xlu1 %v6394_v42, %s4788_s25 }
 0x42a   : > { %3038 = vst.msk [vmem:[#allocation5 + $0xd0] sm:$0xff] %vm3011_vm15, %v2968_v38 }
 0x42b   : > { %3917 = vrot.lane.b32.xlu0 %v6398_v51, %s4788_s25  ;;  %v2974_v6 = vpop.permute.xlu1 %2973 }
 0x42c   : > { %3041 = vst.msk [vmem:[#allocation5 + $0xe8] sm:$0xff] %vm3011_vm15, %v2974_v6 }
 0x42d   : > { %v2972_v9 = vpop.permute.xlu0 %2971  ;;  %3887 = vrot.lane.b32.xlu1 %v3820_v1, %s4788_s25 }
 0x42e   : > { %3040 = vst.msk [vmem:[#allocation5 + $0xe0] sm:$0xff] %vm3011_vm15, %v2972_v9  ;;  %v3824_v9 = vld [vmem:[#allocation3 + $0x81] sm:$0xff] }
 0x42f   : > { %3885 = vrot.lane.b32.xlu0 %v3819_v62, %s4788_s25  ;;  %v2978_v50 = vpop.permute.xlu1 %2977 }
 0x430   : > { %3043 = vst.msk [vmem:[#allocation5 + $0xf8] sm:$0xff] %vm3011_vm15, %v2978_v50 }
 0x431   : > { %v2976_v25 = vpop.permute.xlu0 %2975  ;;  %4112 = vrot.lane.b32.xlu1 %v6578_v46, %s4789_s26 }
 0x432   : > { %3042 = vst.msk [vmem:[#allocation5 + $0xf0] sm:$0xff] %vm3011_vm15, %v2976_v25 }
 0x433   : > { %4110 = vrot.lane.b32.xlu0 %v6582_v19, %s4789_s26  ;;  %v3111_v45 = vpop.permute.xlu1 %3110 }
 0x434   : > { %3206 = vst.msk [vmem:[#allocation5 + $0x8] sm:$0xff] %vm3204_vm0, %v3111_v45 }
 0x435   : > { %v3109_v35 = vpop.permute.xlu0 %3108  ;;  %4080 = vrot.lane.b32.xlu1 %v6526_v54, %s4789_s26 }
 0x436   : > { %3205 = vst.msk [vmem:[#allocation5] sm:$0xff] %vm3204_vm0, %v3109_v35 }
 0x437   : > { %4078 = vrot.lane.b32.xlu0 %v6530_v52, %s4789_s26  ;;  %v3115_v21 = vpop.permute.xlu1 %3114 }
 0x438   : > { %3208 = vst.msk [vmem:[#allocation5 + $0x18] sm:$0xff] %vm3204_vm0, %v3115_v21 }
 0x439   : > { %v3113_v28 = vpop.permute.xlu0 %3112  ;;  %3150 = vrot.lane.b32.xlu1 %v6400_v14, %s4783_s18 }
 0x43a   : > { %3207 = vst.msk [vmem:[#allocation5 + $0x10] sm:$0xff] %vm3204_vm0, %v3113_v28  ;;  %v7323_v28 = vld [vmem:[#allocation11_spill] sm:$0xff] }
 0x43b   : > { %3148 = vrot.lane.b32.xlu0 %v6406_v18, %s4783_s18  ;;  %v3119_v5 = vpop.permute.xlu1 %3118 }
 0x43c   : > { %3210 = vst.msk [vmem:[#allocation5 + $0x28] sm:$0xff] %vm3204_vm0, %v3119_v5 }
 0x43d   : > { %v3117_v20 = vpop.permute.xlu0 %3116  ;;  %3343 = vrot.lane.b32.xlu1 %v6394_v42, %s4785_s9 }
 0x43e   : > { %3209 = vst.msk [vmem:[#allocation5 + $0x20] sm:$0xff] %vm3204_vm0, %v3117_v20 }
 0x43f   : > { %3341 = vrot.lane.b32.xlu0 %v6398_v51, %s4785_s9  ;;  %v3123_v3 = vpop.permute.xlu1 %3122 }
 0x440   : > { %3212 = vst.msk [vmem:[#allocation5 + $0x38] sm:$0xff] %vm3204_vm0, %v3123_v3 }
 0x441   : > { %v3121_v24 = vpop.permute.xlu0 %3120  ;;  %3311 = vrot.lane.b32.xlu1 %v3820_v1, %s4785_s9 }
 0x442   : > { %3211 = vst.msk [vmem:[#allocation5 + $0x30] sm:$0xff] %vm3204_vm0, %v3121_v24 }
 0x443   : > { %3309 = vrot.lane.b32.xlu0 %v3819_v62, %s4785_s9  ;;  %v3127_v14 = vpop.permute.xlu1 %3126  ;;  %v3823_v62 = vld [vmem:[#allocation3 + $0x79] sm:$0xff] }
 0x444   : > { %3214 = vst.msk [vmem:[#allocation5 + $0x48] sm:$0xff] %vm3204_vm0, %v3127_v14 }
 0x445   : > { %v3125_v18 = vpop.permute.xlu0 %3124  ;;  %3536 = vrot.lane.b32.xlu1 %v6578_v46, %s4786_s14 }
 0x446   : > { %3213 = vst.msk [vmem:[#allocation5 + $0x40] sm:$0xff] %vm3204_vm0, %v3125_v18 }
 0x447   : > { %3534 = vrot.lane.b32.xlu0 %v6582_v19, %s4786_s14  ;;  %v3131_v42 = vpop.permute.xlu1 %3130 }
 0x448   : > { %3216 = vst.msk [vmem:[#allocation5 + $0x58] sm:$0xff] %vm3204_vm0, %v3131_v42 }
 0x449   : > { %v3129_v51 = vpop.permute.xlu0 %3128  ;;  %3504 = vrot.lane.b32.xlu1 %v6526_v54, %s4786_s14 }
 0x44a   : > { %3215 = vst.msk [vmem:[#allocation5 + $0x50] sm:$0xff] %vm3204_vm0, %v3129_v51  ;;  %v3439_v51 = vld [vmem:[#allocation3 + $0x82] sm:$0xff] }
 0x44b   : > { %3502 = vrot.lane.b32.xlu0 %v6530_v52, %s4786_s14  ;;  %v3135_v55 = vpop.permute.xlu1 %3134 }
 0x44c   : > { %3218 = vst.msk [vmem:[#allocation5 + $0x68] sm:$0xff] %vm3204_vm0, %v3135_v55  ;;  %v3438_v55 = vld [vmem:[#allocation3 + $0x7a] sm:$0xff] }
 0x44d   : > { %v3133_v7 = vpop.permute.xlu0 %3132  ;;  %3730 = vrot.lane.b32.xlu1 %v6428_v36, %s4787_s16 }
 0x44e   : > { %3217 = vst.msk [vmem:[#allocation5 + $0x60] sm:$0xff] %vm3204_vm0, %v3133_v7 }
 0x44f   : > { %3728 = vrot.lane.b32.xlu0 %v6434_v0, %s4787_s16  ;;  %v3139_v46 = vpop.permute.xlu1 %3138 }
 0x450   : > { %3220 = vst.msk [vmem:[#allocation5 + $0x78] sm:$0xff] %vm3204_vm0, %v3139_v46 }
 0x451   : > { %v3137_v19 = vpop.permute.xlu0 %3136  ;;  %3698 = vrot.lane.b32.xlu1 %v6237_v63, %s4787_s16 }
 0x452   : > { %3219 = vst.msk [vmem:[#allocation5 + $0x70] sm:$0xff] %vm3204_vm0, %v3137_v19 }
 0x453   : > { %3696 = vrot.lane.b32.xlu0 %v6239_v11, %s4787_s16  ;;  %v3143_v54 = vpop.permute.xlu1 %3142  ;;  %v3821_v11 = vld [vmem:[#allocation3 + $0x61] sm:$0xff] }
 0x454   : > { %3222 = vst.msk [vmem:[#allocation5 + $0x88] sm:$0xff] %vm3204_vm0, %v3143_v54 }
 0x455   : > { %v3141_v52 = vpop.permute.xlu0 %3140  ;;  %3923 = vrot.lane.b32.xlu1 %v6422_v10, %s4788_s25 }
 0x456   : > { %3221 = vst.msk [vmem:[#allocation5 + $0x80] sm:$0xff] %vm3204_vm0, %v3141_v52  ;;  %v3633_v52 = vld [vmem:[#allocation3 + $0x98] sm:$0xff] }
 0x457   : > { %3921 = vrot.lane.b32.xlu0 %v6426_v17, %s4788_s25  ;;  %v3336_v59 = vpop.permute.xlu1 %3335 }
 0x458   : > { %3415 = vst.msk [vmem:[#allocation5 + $0x88] sm:$0xff] %vm3397_vm1, %v3336_v59  ;;  %v3632_v59 = vld [vmem:[#allocation3 + $0x90] sm:$0xff] }
 0x459   : > { %v3334_v63 = vpop.permute.xlu0 %3333  ;;  %3891 = vrot.lane.b32.xlu1 %v3822_v26, %s4788_s25 }
 0x45a   : > { %3414 = vst.msk [vmem:[#allocation5 + $0x80] sm:$0xff] %vm3397_vm1, %v3334_v63 }
 0x45b   : > { %3889 = vrot.lane.b32.xlu0 %v3821_v11, %s4788_s25  ;;  %v3304_v31 = vpop.permute.xlu1 %3303 }
 0x45c   : > { %3399 = vst.msk [vmem:[#allocation5 + $0x8] sm:$0xff] %vm3397_vm1, %v3304_v31  ;;  %v3842_v31 = vld [vmem:[#allocation3 + $0x159] sm:$0xff] }
 0x45d   : > { %v3302_v10 = vpop.permute.xlu0 %3301  ;;  %4116 = vrot.lane.b32.xlu1 %v6586_v44, %s4789_s26 }
 0x45e   : > { %3398 = vst.msk [vmem:[#allocation5] sm:$0xff] %vm3397_vm1, %v3302_v10 }
 0x45f   : > { %4114 = vrot.lane.b32.xlu0 %v6590_v49, %s4789_s26  ;;  %v3529_v17 = vpop.permute.xlu1 %3528 }
 0x460   : > { %3608 = vst.msk [vmem:[#allocation5 + $0x88] sm:$0xff] %vm3590_vm2, %v3529_v17  ;;  %v3841_v17 = vld [vmem:[#allocation3 + $0x151] sm:$0xff] }
 0x461   : > { %v3527_v16 = vpop.permute.xlu0 %3526  ;;  %4084 = vrot.lane.b32.xlu1 %v6535_v30, %s4789_s26 }
 0x462   : > { %3607 = vst.msk [vmem:[#allocation5 + $0x80] sm:$0xff] %vm3590_vm2, %v3527_v16 }
 0x463   : > { %4082 = vrot.lane.b32.xlu0 %v6540_v32, %s4789_s26  ;;  %v3497_v13 = vpop.permute.xlu1 %3496 }
 0x464   : > { %3592 = vst.msk [vmem:[#allocation5 + $0x8] sm:$0xff] %vm3590_vm2, %v3497_v13 }
 0x465   : > { %v3495_v34 = vpop.permute.xlu0 %3494  ;;  %3154 = vrot.lane.b32.xlu1 %v6428_v36, %s4783_s18 }
 0x466   : > { %3591 = vst.msk [vmem:[#allocation5] sm:$0xff] %vm3590_vm2, %v3495_v34 }
 0x467   : > { %3152 = vrot.lane.b32.xlu0 %v6434_v0, %s4783_s18  ;;  %v3723_v37 = vpop.permute.xlu1 %3722 }
 0x468   : > { %3802 = vst.msk [vmem:[#allocation5 + $0x88] sm:$0xff] %vm3784_vm3, %v3723_v37 }
 0x469   : > { %v3721_v60 = vpop.permute.xlu0 %3720  ;;  %3347 = vrot.lane.b32.xlu1 %v3260_v48, %s4785_s9 }
 0x46a   : > { %3801 = vst.msk [vmem:[#allocation5 + $0x80] sm:$0xff] %vm3784_vm3, %v3721_v60  ;;  %v3826_v60 = vld [vmem:[#allocation3 + $0x99] sm:$0xff] }
 0x46b   : > { %3345 = vrot.lane.b32.xlu0 %v3259_v27, %s4785_s9  ;;  %v3691_v61 = vpop.permute.xlu1 %3690  ;;  %v3825_v27 = vld [vmem:[#allocation3 + $0x91] sm:$0xff] }
 0x46c   : > { %3786 = vst.msk [vmem:[#allocation5 + $0x8] sm:$0xff] %vm3784_vm3, %v3691_v61 }
 0x46d   : > { %v3689_v36 = vpop.permute.xlu0 %3688  ;;  %3315 = vrot.lane.b32.xlu1 %v3822_v26, %s4785_s9 }
 0x46e   : > { %3785 = vst.msk [vmem:[#allocation5] sm:$0xff] %vm3784_vm3, %v3689_v36 }
 0x46f   : > { %3313 = vrot.lane.b32.xlu0 %v3821_v11, %s4785_s9  ;;  %v3916_v0 = vpop.permute.xlu1 %3915 }
 0x470   : > { %3995 = vst.msk [vmem:[#allocation5 + $0x88] sm:$0xff] %vm3977_vm4, %v3916_v0 }
 0x471   : > { %v3914_v8 = vpop.permute.xlu0 %3913  ;;  %3540 = vrot.lane.b32.xlu1 %v6586_v44, %s4786_s14 }
 0x472   : > { %3994 = vst.msk [vmem:[#allocation5 + $0x80] sm:$0xff] %vm3977_vm4, %v3914_v8  ;;  %v4035_v8 = vld [vmem:[#allocation3 + $0x15a] sm:$0xff] }
 0x473   : > { %3538 = vrot.lane.b32.xlu0 %v6590_v49, %s4786_s14  ;;  %v3884_v57 = vpop.permute.xlu1 %3883 }
 0x474   : > { %3979 = vst.msk [vmem:[#allocation5 + $0x8] sm:$0xff] %vm3977_vm4, %v3884_v57  ;;  %v4034_v57 = vld [vmem:[#allocation3 + $0x152] sm:$0xff] }
 0x475   : > { %v3882_v12 = vpop.permute.xlu0 %3881  ;;  %3508 = vrot.lane.b32.xlu1 %v6535_v30, %s4786_s14 }
 0x476   : > { %3978 = vst.msk [vmem:[#allocation5] sm:$0xff] %vm3977_vm4, %v3882_v12 }
 0x477   : > { %3506 = vrot.lane.b32.xlu0 %v6540_v32, %s4786_s14  ;;  %v4109_v58 = vpop.permute.xlu1 %4108 }
 0x478   : > { %4188 = vst.msk [vmem:[#allocation5 + $0x88] sm:$0xff] %vm4170_vm5, %v4109_v58 }
 0x479   : > { %v4107_v44 = vpop.permute.xlu0 %4106  ;;  %3734 = vrot.lane.b32.xlu1 %v6454_v15, %s4787_s16 }
 0x47a   : > { %4187 = vst.msk [vmem:[#allocation5 + $0x80] sm:$0xff] %vm4170_vm5, %v4107_v44  ;;  %v4019_v44 = vld [vmem:[#allocation3 + $0x9a] sm:$0xff] }
 0x47b   : > { %3732 = vrot.lane.b32.xlu0 %v6460_v22, %s4787_s16  ;;  %v4077_v49 = vpop.permute.xlu1 %4076 }
 0x47c   : > { %4172 = vst.msk [vmem:[#allocation5 + $0x8] sm:$0xff] %vm4170_vm5, %v4077_v49  ;;  %v4018_v49 = vld [vmem:[#allocation3 + $0x92] sm:$0xff] }
 0x47d   : > { %v4075_v30 = vpop.permute.xlu0 %4074  ;;  %3702 = vrot.lane.b32.xlu1 %v6255_v4, %s4787_s16  ;;  %v3839_v4 = vld [vmem:[#allocation3 + $0x139] sm:$0xff] }
 0x47e   : > { %4171 = vst.msk [vmem:[#allocation5] sm:$0xff] %vm4170_vm5, %v4075_v30 }
 0x47f   : > { %3700 = vrot.lane.b32.xlu0 %v6257_v33, %s4787_s16  ;;  %v3147_v32 = vpop.permute.xlu1 %3146  ;;  %v4221_v53 = vld [vmem:[#allocation5 + $0x88] sm:$0xff] }
 0x480   : > { %3224 = vst.msk [vmem:[#allocation5 + $0x98] sm:$0xff] %vm3204_vm0, %v3147_v32 }
 0x481   : > { %v3145_v56 = vpop.permute.xlu0 %3144  ;;  %v4220_v41 = vld [vmem:[#allocation5 + $0x80] sm:$0xff]  ;;  %3927 = vrot.lane.b32.xlu1 %v3840_v29, %s4788_s25 }
 0x482   : > { %3223 = vst.msk [vmem:[#allocation5 + $0x90] sm:$0xff] %vm3204_vm0, %v3145_v56  ;;  %v4697_v47 = vpack.c.bf16 %v4221_v53, %v4220_v41 }
 0x483   : > { %3925 = vrot.lane.b32.xlu0 %v3839_v4, %s4788_s25  ;;  %v3340_v33 = vpop.permute.xlu1 %3339  ;;  %v4205_v38 = vld [vmem:[#allocation5 + $0x8] sm:$0xff] }
 0x484   : > { %4699 = vmatprep.subr.msk.bf16.mxu1 %vm6884_vm7, %v4697_v47  ;;  %3417 = vst.msk [vmem:[#allocation5 + $0x98] sm:$0xff] %vm3397_vm1, %v3340_v33 }
 0x485   : > { %v3338_v6 = vpop.permute.xlu0 %3337  ;;  %v4204_v1 = vld [vmem:[#allocation5] sm:$0xff]  ;;  %3895 = vrot.lane.b32.xlu1 %v3824_v9, %s4788_s25 }
 0x486   : > { %3416 = vst.msk [vmem:[#allocation5 + $0x90] sm:$0xff] %vm3397_vm1, %v3338_v6  ;;  %v4700_v50 = vpack.c.bf16 %v4205_v38, %v4204_v1  ;;  %v7326_v1 = vld [vmem:[#allocation9_spill] sm:$0xff] }
 0x487   : > { %3893 = vrot.lane.b32.xlu0 %v3823_v62, %s4788_s25  ;;  %v3308_v25 = vpop.permute.xlu1 %3307 }
 0x488   : > { %4702 = vmatpush3.bf16.xpose.msk.msra.mxu1 %vm6884_vm7, %v4700_v50  ;;  %3401 = vst.msk [vmem:[#allocation5 + $0x18] sm:$0xff] %vm3397_vm1, %v3308_v25 }
 0x489   : > { %v3306_v45 = vpop.permute.xlu0 %3305  ;;  %4120 = vrot.lane.b32.xlu1 %v6595_v2, %s4789_s26 }
 0x48a   : > { %3400 = vst.msk [vmem:[#allocation5 + $0x10] sm:$0xff] %vm3397_vm1, %v3306_v45  ;;  %v3635_v45 = vld [vmem:[#allocation3 + $0xb0] sm:$0xff] }
 0x48b   : > { %4118 = vrot.lane.b32.xlu0 %v6600_v23, %s4789_s26  ;;  %v3533_v35 = vpop.permute.xlu1 %3532 }
 0x48c   : > { %3610 = vst.msk [vmem:[#allocation5 + $0x98] sm:$0xff] %vm3590_vm2, %v3533_v35  ;;  %v3634_v35 = vld [vmem:[#allocation3 + $0xa8] sm:$0xff] }
 0x48d   : > { %v3531_v21 = vpop.permute.xlu0 %3530  ;;  %4088 = vrot.lane.b32.xlu1 %v6544_v39, %s4789_s26 }
 0x48e   : > { %3609 = vst.msk [vmem:[#allocation5 + $0x90] sm:$0xff] %vm3590_vm2, %v3531_v21 }
 0x48f   : > { %4086 = vrot.lane.b32.xlu0 %v7323_v28, %s4789_s26  ;;  %v3501_v5 = vpop.permute.xlu1 %3500 }
 0x490   : > { %3594 = vst.msk [vmem:[#allocation5 + $0x18] sm:$0xff] %vm3590_vm2, %v3501_v5 }
 0x491   : > { %v3499_v20 = vpop.permute.xlu0 %3498  ;;  %3158 = vrot.lane.b32.xlu1 %v6454_v15, %s4783_s18 }
 0x492   : > { %3593 = vst.msk [vmem:[#allocation5 + $0x10] sm:$0xff] %vm3590_vm2, %v3499_v20  ;;  %v3844_v20 = vld [vmem:[#allocation3 + $0x171] sm:$0xff] }
 0x493   : > { %3156 = vrot.lane.b32.xlu0 %v6460_v22, %s4783_s18  ;;  %v3727_v3 = vpop.permute.xlu1 %3726 }
 0x494   : > { %3804 = vst.msk [vmem:[#allocation5 + $0x98] sm:$0xff] %vm3784_vm3, %v3727_v3 }
 0x495   : > { %v3725_v24 = vpop.permute.xlu0 %3724  ;;  %3351 = vrot.lane.b32.xlu1 %v3840_v29, %s4785_s9 }
 0x496   : > { %3803 = vst.msk [vmem:[#allocation5 + $0x90] sm:$0xff] %vm3784_vm3, %v3725_v24  ;;  %v3843_v24 = vld [vmem:[#allocation3 + $0x169] sm:$0xff] }
 0x497   : > { %3349 = vrot.lane.b32.xlu0 %v3839_v4, %s4785_s9  ;;  %v3695_v39 = vpop.permute.xlu1 %3694 }
 0x498   : > { %3788 = vst.msk [vmem:[#allocation5 + $0x18] sm:$0xff] %vm3784_vm3, %v3695_v39 }
 0x499   : > { %v3693_v14 = vpop.permute.xlu0 %3692  ;;  %3319 = vrot.lane.b32.xlu1 %v3824_v9, %s4785_s9 }
 0x49a   : > { %3787 = vst.msk [vmem:[#allocation5 + $0x10] sm:$0xff] %vm3784_vm3, %v3693_v14 }
 0x49b   : > { %3317 = vrot.lane.b32.xlu0 %v3823_v62, %s4785_s9  ;;  %v3920_v15 = vpop.permute.xlu1 %3919  ;;  %v7327_v62 = vld [vmem:[#allocation10_spill] sm:$0xff] }
 0x49c   : > { %3997 = vst.msk [vmem:[#allocation5 + $0x98] sm:$0xff] %vm3977_vm4, %v3920_v15 }
 0x49d   : > { %v3918_v22 = vpop.permute.xlu0 %3917  ;;  %3544 = vrot.lane.b32.xlu1 %v6595_v2, %s4786_s14  ;;  %v7325_v2 = vld [vmem:[#allocation8_spill] sm:$0xff] }
 0x49e   : > { %3996 = vst.msk [vmem:[#allocation5 + $0x90] sm:$0xff] %vm3977_vm4, %v3918_v22 }
 0x49f   : > { %3542 = vrot.lane.b32.xlu0 %v6600_v23, %s4786_s14  ;;  %v3888_v18 = vpop.permute.xlu1 %3887  ;;  %v7324_v23 = vld [vmem:[#allocation7_spill] sm:$0xff] }
 0x4a0   : > { %3981 = vst.msk [vmem:[#allocation5 + $0x18] sm:$0xff] %vm3977_vm4, %v3888_v18  ;;  %v3828_v18 = vld [vmem:[#allocation3 + $0xb1] sm:$0xff] }
 0x4a1   : > { %v3886_v42 = vpop.permute.xlu0 %3885  ;;  %3512 = vrot.lane.b32.xlu1 %v3439_v51, %s4786_s14  ;;  %v3827_v51 = vld [vmem:[#allocation3 + $0xa9] sm:$0xff] }
 0x4a2   : > { %3980 = vst.msk [vmem:[#allocation5 + $0x10] sm:$0xff] %vm3977_vm4, %v3886_v42 }
 0x4a3   : > { %3510 = vrot.lane.b32.xlu0 %v3438_v55, %s4786_s14  ;;  %v4113_v7 = vpop.permute.xlu1 %4112 }
 0x4a4   : > { %4190 = vst.msk [vmem:[#allocation5 + $0x98] sm:$0xff] %vm4170_vm5, %v4113_v7 }
 0x4a5   : > { %v4111_v46 = vpop.permute.xlu0 %4110  ;;  %3738 = vrot.lane.b32.xlu1 %v7324_v23, %s4787_s16 }
 0x4a6   : > { %4189 = vst.msk [vmem:[#allocation5 + $0x90] sm:$0xff] %vm4170_vm5, %v4111_v46 }
 0x4a7   : > { %3736 = vrot.lane.b32.xlu0 %v7325_v2, %s4787_s16  ;;  %v4081_v19 = vpop.permute.xlu1 %4080 }
 0x4a8   : > { %4174 = vst.msk [vmem:[#allocation5 + $0x18] sm:$0xff] %vm4170_vm5, %v4081_v19 }
 0x4a9   : > { %v4079_v54 = vpop.permute.xlu0 %4078  ;;  %3706 = vrot.lane.b32.xlu1 %v3633_v52, %s4787_s16  ;;  %v4021_v52 = vld [vmem:[#allocation3 + $0xb2] sm:$0xff] }
 0x4aa   : > { %4173 = vst.msk [vmem:[#allocation5 + $0x10] sm:$0xff] %vm4170_vm5, %v4079_v54 }
 0x4ab   : > { %3704 = vrot.lane.b32.xlu0 %v3632_v59, %s4787_s16  ;;  %v3151_v63 = vpop.permute.xlu1 %3150  ;;  %v4223_v26 = vld [vmem:[#allocation5 + $0x98] sm:$0xff] }
 0x4ac   : > { %3226 = vst.msk [vmem:[#allocation5 + $0xa8] sm:$0xff] %vm3204_vm0, %v3151_v63  ;;  %v4020_v59 = vld [vmem:[#allocation3 + $0xaa] sm:$0xff] }
 0x4ad   : > { %v3149_v11 = vpop.permute.xlu0 %3148  ;;  %v4222_v10 = vld [vmem:[#allocation5 + $0x90] sm:$0xff]  ;;  %3931 = vrot.lane.b32.xlu1 %v3842_v31, %s4788_s25 }
 0x4ae   : > { %3225 = vst.msk [vmem:[#allocation5 + $0xa0] sm:$0xff] %vm3204_vm0, %v3149_v11  ;;  %v4703_v16 = vpack.c.bf16 %v4223_v26, %v4222_v10  ;;  %v3073_v11 = vld [vmem:[#allocation3 + $0x170] sm:$0xff] }
 0x4af   : > { %3929 = vrot.lane.b32.xlu0 %v3841_v17, %s4788_s25  ;;  %v3344_v13 = vpop.permute.xlu1 %3343  ;;  %v4207_v34 = vld [vmem:[#allocation5 + $0x18] sm:$0xff] }
 0x4b0   : > { %4705 = vmatprep.subr.msk.bf16.mxu1 %vm6884_vm7, %v4703_v16  ;;  %3419 = vst.msk [vmem:[#allocation5 + $0xa8] sm:$0xff] %vm3397_vm1, %v3344_v13 }
 0x4b1   : > { %v3342_v37 = vpop.permute.xlu0 %3341  ;;  %v4206_v48 = vld [vmem:[#allocation5 + $0x10] sm:$0xff]  ;;  %3899 = vrot.lane.b32.xlu1 %v3826_v60, %s4788_s25 }
 0x4b2   : > { %3418 = vst.msk [vmem:[#allocation5 + $0xa0] sm:$0xff] %vm3397_vm1, %v3342_v37  ;;  %v4706_v61 = vpack.c.bf16 %v4207_v34, %v4206_v48 }
 0x4b3   : > { %3897 = vrot.lane.b32.xlu0 %v3825_v27, %s4788_s25  ;;  %v3312_v36 = vpop.permute.xlu1 %3311 }
 0x4b4   : > { %4708 = vmatpush3.bf16.xpose.msk.msra.mxu1 %vm6884_vm7, %v4706_v61  ;;  %3403 = vst.msk [vmem:[#allocation5 + $0x28] sm:$0xff] %vm3397_vm1, %v3312_v36  ;;  %v3653_v36 = vld [vmem:[#allocation3 + $0x188] sm:$0xff] }
 0x4b5   : > { %v3310_v0 = vpop.permute.xlu0 %3309  ;;  %4124 = vrot.lane.b32.xlu1 %v4035_v8, %s4789_s26 }
 0x4b6   : > { %3402 = vst.msk [vmem:[#allocation5 + $0x20] sm:$0xff] %vm3397_vm1, %v3310_v0  ;;  %v3652_v0 = vld [vmem:[#allocation3 + $0x180] sm:$0xff] }
 0x4b7   : > { %4122 = vrot.lane.b32.xlu0 %v4034_v57, %s4789_s26  ;;  %v3537_v12 = vpop.permute.xlu1 %3536 }
 0x4b8   : > { %3612 = vst.msk [vmem:[#allocation5 + $0xa8] sm:$0xff] %vm3590_vm2, %v3537_v12  ;;  %v3637_v12 = vld [vmem:[#allocation3 + $0xc8] sm:$0xff] }
 0x4b9   : > { %v3535_v58 = vpop.permute.xlu0 %3534  ;;  %4092 = vrot.lane.b32.xlu1 %v4019_v44, %s4789_s26 }
 0x4ba   : > { %3611 = vst.msk [vmem:[#allocation5 + $0xa0] sm:$0xff] %vm3590_vm2, %v3535_v58  ;;  %v3636_v58 = vld [vmem:[#allocation3 + $0xc0] sm:$0xff] }
 0x4bb   : > { %4090 = vrot.lane.b32.xlu0 %v4018_v49, %s4789_s26  ;;  %v3505_v30 = vpop.permute.xlu1 %3504 }
 0x4bc   : > { %3596 = vst.msk [vmem:[#allocation5 + $0x28] sm:$0xff] %vm3590_vm2, %v3505_v30 }
 0x4bd   : > { %v3503_v32 = vpop.permute.xlu0 %3502  ;;  %3162 = vrot.lane.b32.xlu1 %v7324_v23, %s4783_s18  ;;  %v4037_v23 = vld [vmem:[#allocation3 + $0x172] sm:$0xff] }
 0x4be   : > { %3595 = vst.msk [vmem:[#allocation5 + $0x20] sm:$0xff] %vm3590_vm2, %v3503_v32  ;;  %v3846_v32 = vld [vmem:[#allocation3 + $0x189] sm:$0xff] }
 0x4bf   : > { %3160 = vrot.lane.b32.xlu0 %v7325_v2, %s4783_s18  ;;  %v3731_v53 = vpop.permute.xlu1 %3730  ;;  %v4036_v2 = vld [vmem:[#allocation3 + $0x16a] sm:$0xff] }
 0x4c0   : > { %3806 = vst.msk [vmem:[#allocation5 + $0xa8] sm:$0xff] %vm3784_vm3, %v3731_v53 }
 0x4c1   : > { %v3729_v56 = vpop.permute.xlu0 %3728  ;;  %3355 = vrot.lane.b32.xlu1 %v3842_v31, %s4785_s9  ;;  %v3072_v31 = vld [vmem:[#allocation3 + $0x168] sm:$0xff] }
 0x4c2   : > { %3805 = vst.msk [vmem:[#allocation5 + $0xa0] sm:$0xff] %vm3784_vm3, %v3729_v56  ;;  %v3845_v56 = vld [vmem:[#allocation3 + $0x181] sm:$0xff] }
 0x4c3   : > { %3353 = vrot.lane.b32.xlu0 %v3841_v17, %s4785_s9  ;;  %v3699_v29 = vpop.permute.xlu1 %3698 }
 0x4c4   : > { %3790 = vst.msk [vmem:[#allocation5 + $0x28] sm:$0xff] %vm3784_vm3, %v3699_v29 }
 0x4c5   : > { %v3697_v41 = vpop.permute.xlu0 %3696  ;;  %3323 = vrot.lane.b32.xlu1 %v3826_v60, %s4785_s9 }
 0x4c6   : > { %3789 = vst.msk [vmem:[#allocation5 + $0x20] sm:$0xff] %vm3784_vm3, %v3697_v41 }
 0x4c7   : > { %3321 = vrot.lane.b32.xlu0 %v3825_v27, %s4785_s9  ;;  %v3924_v4 = vpop.permute.xlu1 %3923 }
 0x4c8   : > { %3999 = vst.msk [vmem:[#allocation5 + $0xa8] sm:$0xff] %vm3977_vm4, %v3924_v4 }
 0x4c9   : > { %v3922_v47 = vpop.permute.xlu0 %3921  ;;  %3548 = vrot.lane.b32.xlu1 %v4035_v8, %s4786_s14 }
 0x4ca   : > { %3998 = vst.msk [vmem:[#allocation5 + $0xa0] sm:$0xff] %vm3977_vm4, %v3922_v47 }
 0x4cb   : > { %3546 = vrot.lane.b32.xlu0 %v4034_v57, %s4786_s14  ;;  %v3892_v33 = vpop.permute.xlu1 %3891 }
 0x4cc   : > { %3983 = vst.msk [vmem:[#allocation5 + $0x28] sm:$0xff] %vm3977_vm4, %v3892_v33  ;;  %v3830_v33 = vld [vmem:[#allocation3 + $0xc9] sm:$0xff] }
 0x4cd   : > { %v3890_v38 = vpop.permute.xlu0 %3889  ;;  %3516 = vrot.lane.b32.xlu1 %v4019_v44, %s4786_s14 }
 0x4ce   : > { %3982 = vst.msk [vmem:[#allocation5 + $0x20] sm:$0xff] %vm3977_vm4, %v3890_v38 }
 0x4cf   : > { %3514 = vrot.lane.b32.xlu0 %v4018_v49, %s4786_s14  ;;  %v4117_v6 = vpop.permute.xlu1 %4116 }
 0x4d0   : > { %4192 = vst.msk [vmem:[#allocation5 + $0xa8] sm:$0xff] %vm4170_vm5, %v4117_v6  ;;  %v3829_v6 = vld [vmem:[#allocation3 + $0xc1] sm:$0xff] }
 0x4d1   : > { %v4115_v9 = vpop.permute.xlu0 %4114  ;;  %3742 = vrot.lane.b32.xlu1 %v7326_v1, %s4787_s16 }
 0x4d2   : > { %4191 = vst.msk [vmem:[#allocation5 + $0xa0] sm:$0xff] %vm4170_vm5, %v4115_v9 }
 0x4d3   : > { %3740 = vrot.lane.b32.xlu0 %v7327_v62, %s4787_s16  ;;  %v4085_v50 = vpop.permute.xlu1 %4084 }
 0x4d4   : > { %4176 = vst.msk [vmem:[#allocation5 + $0x28] sm:$0xff] %vm4170_vm5, %v4085_v50  ;;  %v4039_v50 = vld [vmem:[#allocation3 + $0x18a] sm:$0xff] }
 0x4d5   : > { %v4083_v25 = vpop.permute.xlu0 %4082  ;;  %3710 = vrot.lane.b32.xlu1 %v3635_v45, %s4787_s16 }
 0x4d6   : > { %4175 = vst.msk [vmem:[#allocation5 + $0x20] sm:$0xff] %vm4170_vm5, %v4083_v25  ;;  %v4038_v25 = vld [vmem:[#allocation3 + $0x182] sm:$0xff] }
 0x4d7   : > { %3708 = vrot.lane.b32.xlu0 %v3634_v35, %s4787_s16  ;;  %v3155_v21 = vpop.permute.xlu1 %3154  ;;  %v4225_v28 = vld [vmem:[#allocation5 + $0xa8] sm:$0xff] }
 0x4d8   : > { %3228 = vst.msk [vmem:[#allocation5 + $0xb8] sm:$0xff] %vm3204_vm0, %v3155_v21  ;;  %v4023_v21 = vld [vmem:[#allocation3 + $0xca] sm:$0xff] }
 0x4d9   : > { %v3153_v5 = vpop.permute.xlu0 %3152  ;;  %v4224_v3 = vld [vmem:[#allocation5 + $0xa0] sm:$0xff]  ;;  %3935 = vrot.lane.b32.xlu1 %v3844_v20, %s4788_s25 }
 0x4da   : > { %3227 = vst.msk [vmem:[#allocation5 + $0xb0] sm:$0xff] %vm3204_vm0, %v3153_v5  ;;  %v4709_v39 = vpack.c.bf16 %v4225_v28, %v4224_v3  ;;  %v4022_v28 = vld [vmem:[#allocation3 + $0xc2] sm:$0xff] }
 0x4db   : > { %3933 = vrot.lane.b32.xlu0 %v3843_v24, %s4788_s25  ;;  %v3348_v14 = vpop.permute.xlu1 %3347  ;;  %v4209_v15 = vld [vmem:[#allocation5 + $0x28] sm:$0xff] }
 0x4dc   : > { %4711 = vmatprep.subr.msk.bf16.mxu1 %vm6884_vm7, %v4709_v39  ;;  %3421 = vst.msk [vmem:[#allocation5 + $0xb8] sm:$0xff] %vm3397_vm1, %v3348_v14 }
 0x4dd   : > { %v3346_v22 = vpop.permute.xlu0 %3345  ;;  %v4208_v42 = vld [vmem:[#allocation5 + $0x20] sm:$0xff]  ;;  %3903 = vrot.lane.b32.xlu1 %v3828_v18, %s4788_s25 }
 0x4de   : > { %3420 = vst.msk [vmem:[#allocation5 + $0xb0] sm:$0xff] %vm3397_vm1, %v3346_v22  ;;  %v4712_v55 = vpack.c.bf16 %v4209_v15, %v4208_v42 }
 0x4df   : > { %3901 = vrot.lane.b32.xlu0 %v3827_v51, %s4788_s25  ;;  %v3316_v7 = vpop.permute.xlu1 %3315 }
 0x4e0   : > { %4714 = vmatpush3.bf16.xpose.msk.msra.mxu1 %vm6884_vm7, %v4712_v55  ;;  %3405 = vst.msk [vmem:[#allocation5 + $0x38] sm:$0xff] %vm3397_vm1, %v3316_v7  ;;  %v3654_v7 = vld [vmem:[#allocation3 + $0x198] sm:$0xff] }
 0x4e1   : > { %v3314_v46 = vpop.permute.xlu0 %3313  ;;  %4128 = vrot.lane.b32.xlu1 %v4037_v23, %s4789_s26 }
 0x4e2   : > { %3404 = vst.msk [vmem:[#allocation5 + $0x30] sm:$0xff] %vm3397_vm1, %v3314_v46 }
 0x4e3   : > { %4126 = vrot.lane.b32.xlu0 %v4036_v2, %s4789_s26  ;;  %v3541_v19 = vpop.permute.xlu1 %3540 }
 0x4e4   : > { %3614 = vst.msk [vmem:[#allocation5 + $0xb8] sm:$0xff] %vm3590_vm2, %v3541_v19  ;;  %v3639_v19 = vld [vmem:[#allocation3 + $0xe0] sm:$0xff] }
 0x4e5   : > { %v3539_v54 = vpop.permute.xlu0 %3538  ;;  %4096 = vrot.lane.b32.xlu1 %v4021_v52, %s4789_s26 }
 0x4e6   : > { %3613 = vst.msk [vmem:[#allocation5 + $0xb0] sm:$0xff] %vm3590_vm2, %v3539_v54  ;;  %v3638_v54 = vld [vmem:[#allocation3 + $0xd8] sm:$0xff] }
 0x4e7   : > { %4094 = vrot.lane.b32.xlu0 %v4020_v59, %s4789_s26  ;;  %v3509_v63 = vpop.permute.xlu1 %3508 }
 0x4e8   : > { %3598 = vst.msk [vmem:[#allocation5 + $0x38] sm:$0xff] %vm3590_vm2, %v3509_v63  ;;  %v3847_v63 = vld [vmem:[#allocation3 + $0x199] sm:$0xff] }
 0x4e9   : > { %v3507_v26 = vpop.permute.xlu0 %3506  ;;  %3166 = vrot.lane.b32.xlu1 %v3073_v11, %s4783_s18 }
 0x4ea   : > { %3597 = vst.msk [vmem:[#allocation5 + $0x30] sm:$0xff] %vm3590_vm2, %v3507_v26 }
 0x4eb   : > { %3164 = vrot.lane.b32.xlu0 %v3072_v31, %s4783_s18  ;;  %v3735_v10 = vpop.permute.xlu1 %3734 }
 0x4ec   : > { %3808 = vst.msk [vmem:[#allocation5 + $0xb8] sm:$0xff] %vm3784_vm3, %v3735_v10 }
 0x4ed   : > { %v3733_v17 = vpop.permute.xlu0 %3732  ;;  %3359 = vrot.lane.b32.xlu1 %v3844_v20, %s4785_s9 }
 0x4ee   : > { %3807 = vst.msk [vmem:[#allocation5 + $0xb0] sm:$0xff] %vm3784_vm3, %v3733_v17 }
 0x4ef   : > { %3357 = vrot.lane.b32.xlu0 %v3843_v24, %s4785_s9  ;;  %v3703_v16 = vpop.permute.xlu1 %3702 }
 0x4f0   : > { %3792 = vst.msk [vmem:[#allocation5 + $0x38] sm:$0xff] %vm3784_vm3, %v3703_v16 }
 0x4f1   : > { %v3701_v13 = vpop.permute.xlu0 %3700  ;;  %3327 = vrot.lane.b32.xlu1 %v3828_v18, %s4785_s9 }
 0x4f2   : > { %3791 = vst.msk [vmem:[#allocation5 + $0x30] sm:$0xff] %vm3784_vm3, %v3701_v13 }
 0x4f3   : > { %3325 = vrot.lane.b32.xlu0 %v3827_v51, %s4785_s9  ;;  %v3928_v34 = vpop.permute.xlu1 %3927  ;;  %v3655_v51 = vld [vmem:[#allocation3 + $0x1a0] sm:$0xff] }
 0x4f4   : > { %4001 = vst.msk [vmem:[#allocation5 + $0xb8] sm:$0xff] %vm3977_vm4, %v3928_v34  ;;  %v3832_v34 = vld [vmem:[#allocation3 + $0xe1] sm:$0xff] }
 0x4f5   : > { %v3926_v37 = vpop.permute.xlu0 %3925  ;;  %3552 = vrot.lane.b32.xlu1 %v4037_v23, %s4786_s14 }
 0x4f6   : > { %4000 = vst.msk [vmem:[#allocation5 + $0xb0] sm:$0xff] %vm3977_vm4, %v3926_v37 }
 0x4f7   : > { %3550 = vrot.lane.b32.xlu0 %v4036_v2, %s4786_s14  ;;  %v3896_v60 = vpop.permute.xlu1 %3895 }
 0x4f8   : > { %3985 = vst.msk [vmem:[#allocation5 + $0x38] sm:$0xff] %vm3977_vm4, %v3896_v60  ;;  %v3831_v60 = vld [vmem:[#allocation3 + $0xd9] sm:$0xff] }
 0x4f9   : > { %v3894_v48 = vpop.permute.xlu0 %3893  ;;  %3520 = vrot.lane.b32.xlu1 %v4021_v52, %s4786_s14  ;;  %v3848_v52 = vld [vmem:[#allocation3 + $0x1a1] sm:$0xff] }
 0x4fa   : > { %3984 = vst.msk [vmem:[#allocation5 + $0x30] sm:$0xff] %vm3977_vm4, %v3894_v48 }
 0x4fb   : > { %3518 = vrot.lane.b32.xlu0 %v4020_v59, %s4786_s14  ;;  %v4121_v27 = vpop.permute.xlu1 %4120 }
 0x4fc   : > { %4194 = vst.msk [vmem:[#allocation5 + $0xb8] sm:$0xff] %vm4170_vm5, %v4121_v27  ;;  %v4041_v27 = vld [vmem:[#allocation3 + $0x1a2] sm:$0xff] }
 0x4fd   : > { %v4119_v61 = vpop.permute.xlu0 %4118  ;;  %3746 = vrot.lane.b32.xlu1 %v3653_v36, %s4787_s16 }
 0x4fe   : > { %4193 = vst.msk [vmem:[#allocation5 + $0xb0] sm:$0xff] %vm4170_vm5, %v4119_v61 }
 0x4ff   : > { %3744 = vrot.lane.b32.xlu0 %v3652_v0, %s4787_s16  ;;  %v4089_v8 = vpop.permute.xlu1 %4088 }
 0x500   : > { %4178 = vst.msk [vmem:[#allocation5 + $0x38] sm:$0xff] %vm4170_vm5, %v4089_v8 }
 0x501   : > { %v4087_v57 = vpop.permute.xlu0 %4086  ;;  %3714 = vrot.lane.b32.xlu1 %v3637_v12, %s4787_s16 }
 0x502   : > { %4177 = vst.msk [vmem:[#allocation5 + $0x30] sm:$0xff] %vm4170_vm5, %v4087_v57  ;;  %v7112_v57 = vld [vmem:[%s7211_s5] sm:$0xf] }
 0x503   : > { %3712 = vrot.lane.b32.xlu0 %v3636_v58, %s4787_s16  ;;  %v3159_v44 = vpop.permute.xlu1 %3158  ;;  %v4227_v49 = vld [vmem:[#allocation5 + $0xb8] sm:$0xff]  ;;  %4629 = vmatprep.mubr.msk.f32.mxu1 %vm4241_vm6, %v7112_v57 }
 0x504   : > { %3230 = vst.msk [vmem:[#allocation5 + $0xc8] sm:$0xff] %vm3204_vm0, %v3159_v44  ;;  %v4025_v58 = vld [vmem:[#allocation3 + $0xe2] sm:$0xff]  ;;  %v4024_v44 = vld [vmem:[#allocation3 + $0xda] sm:$0xff] }
 0x505   : > { %v3157_v30 = vpop.permute.xlu0 %3156  ;;  %v4226_v53 = vld [vmem:[#allocation5 + $0xb0] sm:$0xff]  ;;  %3939 = vrot.lane.b32.xlu1 %v3846_v32, %s4788_s25 }
 0x506   : > { %3229 = vst.msk [vmem:[#allocation5 + $0xc0] sm:$0xff] %vm3204_vm0, %v3157_v30  ;;  %v4715_v29 = vpack.c.bf16 %v4227_v49, %v4226_v53 }
 0x507   : > { %3937 = vrot.lane.b32.xlu0 %v3845_v56, %s4788_s25  ;;  %v3352_v41 = vpop.permute.xlu1 %3351  ;;  %v4211_v4 = vld [vmem:[#allocation5 + $0x38] sm:$0xff] }
 0x508   : > { %4717 = vmatprep.subr.msk.bf16.mxu1 %vm6884_vm7, %v4715_v29  ;;  %3423 = vst.msk [vmem:[#allocation5 + $0xc8] sm:$0xff] %vm3397_vm1, %v3352_v41 }
 0x509   : > { %v3350_v47 = vpop.permute.xlu0 %3349  ;;  %v4210_v38 = vld [vmem:[#allocation5 + $0x30] sm:$0xff]  ;;  %3907 = vrot.lane.b32.xlu1 %v3830_v33, %s4788_s25 }
 0x50a   : > { %3422 = vst.msk [vmem:[#allocation5 + $0xc0] sm:$0xff] %vm3397_vm1, %v3350_v47  ;;  %v4718_v9 = vpack.c.bf16 %v4211_v4, %v4210_v38 }
 0x50b   : > { %3905 = vrot.lane.b32.xlu0 %v3829_v6, %s4788_s25  ;;  %v3320_v1 = vpop.permute.xlu1 %3319 }
 0x50c   : > { %4720 = vmatpush3.bf16.xpose.msk.msra.mxu1 %vm6884_vm7, %v4718_v9  ;;  %3407 = vst.msk [vmem:[#allocation5 + $0x48] sm:$0xff] %vm3397_vm1, %v3320_v1 }
 0x50d   : > { %v3318_v62 = vpop.permute.xlu0 %3317  ;;  %4132 = vrot.lane.b32.xlu1 %v4039_v50, %s4789_s26 }
 0x50e   : > { %3406 = vst.msk [vmem:[#allocation5 + $0x40] sm:$0xff] %vm3397_vm1, %v3318_v62 }
 0x50f   : > { %4130 = vrot.lane.b32.xlu0 %v4038_v25, %s4789_s26  ;;  %v3545_v45 = vpop.permute.xlu1 %3544 }
 0x510   : > { %3616 = vst.msk [vmem:[#allocation5 + $0xc8] sm:$0xff] %vm3590_vm2, %v3545_v45 }
 0x511   : > { %v3543_v35 = vpop.permute.xlu0 %3542  ;;  %4100 = vrot.lane.b32.xlu1 %v4023_v21, %s4789_s26 }
 0x512   : > { %3615 = vst.msk [vmem:[#allocation5 + $0xc0] sm:$0xff] %vm3590_vm2, %v3543_v35 }
 0x513   : > { %4098 = vrot.lane.b32.xlu0 %v4022_v28, %s4789_s26  ;;  %v3513_v5 = vpop.permute.xlu1 %3512 }
 0x514   : > { %3600 = vst.msk [vmem:[#allocation5 + $0x48] sm:$0xff] %vm3590_vm2, %v3513_v5 }
 0x515   : > { %v3511_v20 = vpop.permute.xlu0 %3510  ;;  %3170 = vrot.lane.b32.xlu1 %v3653_v36, %s4783_s18  ;;  %v4040_v36 = vld [vmem:[#allocation3 + $0x19a] sm:$0xff] }
 0x516   : > { %3599 = vst.msk [vmem:[#allocation5 + $0x40] sm:$0xff] %vm3590_vm2, %v3511_v20 }
 0x517   : > { %3168 = vrot.lane.b32.xlu0 %v3652_v0, %s4783_s18  ;;  %v3739_v3 = vpop.permute.xlu1 %3738 }
 0x518   : > { %3810 = vst.msk [vmem:[#allocation5 + $0xc8] sm:$0xff] %vm3784_vm3, %v3739_v3 }
 0x519   : > { %v3737_v24 = vpop.permute.xlu0 %3736  ;;  %3363 = vrot.lane.b32.xlu1 %v3846_v32, %s4785_s9  ;;  %v4412_v32 = vld [vmem:[%s7212_s6] sm:$0xf] }
 0x51a   : > { %3809 = vst.msk [vmem:[#allocation5 + $0xc0] sm:$0xff] %vm3784_vm3, %v3737_v24 }
 0x51b   : > { %3361 = vrot.lane.b32.xlu0 %v3845_v56, %s4785_s9  ;;  %v3707_v39 = vpop.permute.xlu1 %3706  ;;  %v4790_v56 = vmov 0  }
 0x51c   : > { %3794 = vst.msk [vmem:[#allocation5 + $0x48] sm:$0xff] %vm3784_vm3, %v3707_v39  ;;  %4767 = vset.pattern.permute.xlu0 %v4790_v56 }
 0x51d   : > { %v3705_v14 = vpop.permute.xlu0 %3704  ;;  %3331 = vrot.lane.b32.xlu1 %v3830_v33, %s4785_s9 }
 0x51e   : > { %3793 = vst.msk [vmem:[#allocation5 + $0x40] sm:$0xff] %vm3784_vm3, %v3705_v14 }
 0x51f   : > { %3329 = vrot.lane.b32.xlu0 %v3829_v6, %s4785_s9  ;;  %v3932_v15 = vpop.permute.xlu1 %3931 }
 0x520   : > { %4003 = vst.msk [vmem:[#allocation5 + $0xc8] sm:$0xff] %vm3977_vm4, %v3932_v15 }
 0x521   : > { %v3930_v22 = vpop.permute.xlu0 %3929  ;;  %3556 = vrot.lane.b32.xlu1 %v4039_v50, %s4786_s14 }
 0x522   : > { %4002 = vst.msk [vmem:[#allocation5 + $0xc0] sm:$0xff] %vm3977_vm4, %v3930_v22 }
 0x523   : > { %3554 = vrot.lane.b32.xlu0 %v4038_v25, %s4786_s14  ;;  %v3900_v18 = vpop.permute.xlu1 %3899 }
 0x524   : > { %3987 = vst.msk [vmem:[#allocation5 + $0x48] sm:$0xff] %vm3977_vm4, %v3900_v18 }
 0x525   : > { %v3898_v42 = vpop.permute.xlu0 %3897  ;;  %3524 = vrot.lane.b32.xlu1 %v4023_v21, %s4786_s14 }
 0x526   : > { %3986 = vst.msk [vmem:[#allocation5 + $0x40] sm:$0xff] %vm3977_vm4, %v3898_v42 }
 0x527   : > { %3522 = vrot.lane.b32.xlu0 %v4022_v28, %s4786_s14  ;;  %v4125_v55 = vpop.permute.xlu1 %4124 }
 0x528   : > { %4196 = vst.msk [vmem:[#allocation5 + $0xc8] sm:$0xff] %vm4170_vm5, %v4125_v55 }
 0x529   : > { %v4123_v46 = vpop.permute.xlu0 %4122  ;;  %3750 = vrot.lane.b32.xlu1 %v3655_v51, %s4787_s16 }
 0x52a   : > { %4195 = vst.msk [vmem:[#allocation5 + $0xc0] sm:$0xff] %vm4170_vm5, %v4123_v46 }
 0x52b   : > { %3748 = vrot.lane.b32.xlu0 %v3654_v7, %s4787_s16  ;;  %v4093_v23 = vpop.permute.xlu1 %4092 }
 0x52c   : > { %4180 = vst.msk [vmem:[#allocation5 + $0x48] sm:$0xff] %vm4170_vm5, %v4093_v23 }
 0x52d   : > { %v4091_v2 = vpop.permute.xlu0 %4090  ;;  %3718 = vrot.lane.b32.xlu1 %v3639_v19, %s4787_s16 }
 0x52e   : > { %4179 = vst.msk [vmem:[#allocation5 + $0x40] sm:$0xff] %vm4170_vm5, %v4091_v2 }
 0x52f   : > { %3716 = vrot.lane.b32.xlu0 %v3638_v54, %s4787_s16  ;;  %v3163_v59 = vpop.permute.xlu1 %3162  ;;  %v4229_v26 = vld [vmem:[#allocation5 + $0xc8] sm:$0xff] }
 0x530   : > { %3232 = vst.msk [vmem:[#allocation5 + $0xd8] sm:$0xff] %vm3204_vm0, %v3163_v59 }
 0x531   : > { %v3161_v11 = vpop.permute.xlu0 %3160  ;;  %v4228_v31 = vld [vmem:[#allocation5 + $0xc0] sm:$0xff]  ;;  %3943 = vrot.lane.b32.xlu1 %v3848_v52, %s4788_s25 }
 0x532   : > { %3231 = vst.msk [vmem:[#allocation5 + $0xd0] sm:$0xff] %vm3204_vm0, %v3161_v11  ;;  %v4721_v10 = vpack.c.bf16 %v4229_v26, %v4228_v31 }
 0x533   : > { %3941 = vrot.lane.b32.xlu0 %v3847_v63, %s4788_s25  ;;  %v3356_v17 = vpop.permute.xlu1 %3355  ;;  %v4213_v16 = vld [vmem:[#allocation5 + $0x48] sm:$0xff] }
 0x534   : > { %4723 = vmatprep.subr.msk.bf16.mxu1 %vm6884_vm7, %v4721_v10  ;;  %3425 = vst.msk [vmem:[#allocation5 + $0xd8] sm:$0xff] %vm3397_vm1, %v3356_v17 }
 0x535   : > { %v3354_v13 = vpop.permute.xlu0 %3353  ;;  %v4212_v37 = vld [vmem:[#allocation5 + $0x40] sm:$0xff]  ;;  %3911 = vrot.lane.b32.xlu1 %v3832_v34, %s4788_s25 }
 0x536   : > { %3424 = vst.msk [vmem:[#allocation5 + $0xd0] sm:$0xff] %vm3397_vm1, %v3354_v13  ;;  %v4724_v48 = vpack.c.bf16 %v4213_v16, %v4212_v37 }
 0x537   : > { %3909 = vrot.lane.b32.xlu0 %v3831_v60, %s4788_s25  ;;  %v3324_v61 = vpop.permute.xlu1 %3323 }
 0x538   : > { %4726 = vmatpush3.bf16.xpose.msk.msra.mxu1 %vm6884_vm7, %v4724_v48  ;;  %3409 = vst.msk [vmem:[#allocation5 + $0x58] sm:$0xff] %vm3397_vm1, %v3324_v61 }
 0x539   : > { %v3322_v0 = vpop.permute.xlu0 %3321  ;;  %4136 = vrot.lane.b32.xlu1 %v4041_v27, %s4789_s26 }
 0x53a   : > { %3408 = vst.msk [vmem:[#allocation5 + $0x50] sm:$0xff] %vm3397_vm1, %v3322_v0 }
 0x53b   : > { %4134 = vrot.lane.b32.xlu0 %v4040_v36, %s4789_s26  ;;  %v3549_v8 = vpop.permute.xlu1 %3548 }
 0x53c   : > { %3618 = vst.msk [vmem:[#allocation5 + $0xd8] sm:$0xff] %vm3590_vm2, %v3549_v8 }
 0x53d   : > { %v3547_v12 = vpop.permute.xlu0 %3546  ;;  %4104 = vrot.lane.b32.xlu1 %v4025_v58, %s4789_s26 }
 0x53e   : > { %3617 = vst.msk [vmem:[#allocation5 + $0xd0] sm:$0xff] %vm3590_vm2, %v3547_v12 }
 0x53f   : > { %4102 = vrot.lane.b32.xlu0 %v4024_v44, %s4789_s26  ;;  %v3517_v49 = vpop.permute.xlu1 %3516 }
 0x540   : > { %3602 = vst.msk [vmem:[#allocation5 + $0x58] sm:$0xff] %vm3590_vm2, %v3517_v49 }
 0x541   : > { %v3515_v30 = vpop.permute.xlu0 %3514 }
 0x542   : > { %3601 = vst.msk [vmem:[#allocation5 + $0x50] sm:$0xff] %vm3590_vm2, %v3515_v30 }
 0x543   : > { %v3743_v53 = vpop.permute.xlu1 %3742  ;;  %4415 = vperm.xlu0 %4767, %v4412_v32  }
 0x544   : > { %3812 = vst.msk [vmem:[#allocation5 + $0xd8] sm:$0xff] %vm3784_vm3, %v3743_v53 }
 0x545   : > { %v3741_v29 = vpop.permute.xlu0 %3740 }
 0x546   : > { %3811 = vst.msk [vmem:[#allocation5 + $0xd0] sm:$0xff] %vm3784_vm3, %v3741_v29 }
 0x547   : > { %v3711_v41 = vpop.permute.xlu1 %3710 }
 0x548   : > { %3796 = vst.msk [vmem:[#allocation5 + $0x58] sm:$0xff] %vm3784_vm3, %v3711_v41 }
 0x549   : > { %v3709_v4 = vpop.permute.xlu0 %3708 }
 0x54a   : > { %3795 = vst.msk [vmem:[#allocation5 + $0x50] sm:$0xff] %vm3784_vm3, %v3709_v4 }
 0x54b   : > { %v3936_v47 = vpop.permute.xlu1 %3935 }
 0x54c   : > { %4005 = vst.msk [vmem:[#allocation5 + $0xd8] sm:$0xff] %vm3977_vm4, %v3936_v47 }
 0x54d   : > { %v3934_v33 = vpop.permute.xlu0 %3933 }
 0x54e   : > { %4004 = vst.msk [vmem:[#allocation5 + $0xd0] sm:$0xff] %vm3977_vm4, %v3934_v33 }
 0x54f   : > { %v3904_v38 = vpop.permute.xlu1 %3903 }
 0x550   : > { %3989 = vst.msk [vmem:[#allocation5 + $0x58] sm:$0xff] %vm3977_vm4, %v3904_v38 }
 0x551   : > { %v3902_v6 = vpop.permute.xlu0 %3901 }
 0x552   : > { %3988 = vst.msk [vmem:[#allocation5 + $0x50] sm:$0xff] %vm3977_vm4, %v3902_v6 }
 0x553   : > { %v4129_v9 = vpop.permute.xlu1 %4128 }
 0x554   : > { %4198 = vst.msk [vmem:[#allocation5 + $0xd8] sm:$0xff] %vm4170_vm5, %v4129_v9 }
 0x555   : > { %v4127_v1 = vpop.permute.xlu0 %4126 }
 0x556   : > { %4197 = vst.msk [vmem:[#allocation5 + $0xd0] sm:$0xff] %vm4170_vm5, %v4127_v1 }
 0x557   : > { %v4097_v62 = vpop.permute.xlu1 %4096 }
 0x558   : > { %4182 = vst.msk [vmem:[#allocation5 + $0x58] sm:$0xff] %vm4170_vm5, %v4097_v62 }
 0x559   : > { %v4095_v50 = vpop.permute.xlu0 %4094 }
 0x55a   : > { %4181 = vst.msk [vmem:[#allocation5 + $0x50] sm:$0xff] %vm4170_vm5, %v4095_v50 }
 0x55b   : > { %v3167_v25 = vpop.permute.xlu1 %3166  ;;  %v4231_v45 = vld [vmem:[#allocation5 + $0xd8] sm:$0xff] }
 0x55c   : > { %3234 = vst.msk [vmem:[#allocation5 + $0xe8] sm:$0xff] %vm3204_vm0, %v3167_v25 }
 0x55d   : > { %v3165_v35 = vpop.permute.xlu0 %3164  ;;  %v4230_v21 = vld [vmem:[#allocation5 + $0xd0] sm:$0xff] }
 0x55e   : > { %3233 = vst.msk [vmem:[#allocation5 + $0xe0] sm:$0xff] %vm3204_vm0, %v3165_v35  ;;  %v4727_v28 = vpack.c.bf16 %v4231_v45, %v4230_v21  ;;  %v4236_v45 = vld [vmem:[%s7213_s7] sm:$0xff] }
 0x55f   : > { %v3360_v5 = vpop.permute.xlu1 %3359  ;;  %v4215_v20 = vld [vmem:[#allocation5 + $0x58] sm:$0xff]  ;;  %v4237_v35 = vmul.f32 %v4236_v45, %v6118_v40 }
 0x560   : > { %4729 = vmatprep.subr.msk.bf16.mxu1 %vm6884_vm7, %v4727_v28  ;;  %3427 = vst.msk [vmem:[#allocation5 + $0xe8] sm:$0xff] %vm3397_vm1, %v3360_v5 }
 0x561   : > { %v3358_v3 = vpop.permute.xlu0 %3357  ;;  %v4214_v24 = vld [vmem:[#allocation5 + $0x50] sm:$0xff]  ;;  %v4239_v21 = vcombine.high %v4237_v35, %v4237_v35 }
 0x562   : > { %3426 = vst.msk [vmem:[#allocation5 + $0xe0] sm:$0xff] %vm3397_vm1, %v3358_v3  ;;  %v4730_v39 = vpack.c.bf16 %v4215_v20, %v4214_v24 }
 0x563   : > { %v3328_v14 = vpop.permute.xlu1 %3327 }
 0x564   : > { %4732 = vmatpush3.bf16.xpose.msk.msra.mxu1 %vm6884_vm7, %v4730_v39  ;;  %3411 = vst.msk [vmem:[#allocation5 + $0x68] sm:$0xff] %vm3397_vm1, %v3328_v14 }
 0x565   : > { %v3326_v15 = vpop.permute.xlu0 %3325 }
 0x566   : > { %3410 = vst.msk [vmem:[#allocation5 + $0x60] sm:$0xff] %vm3397_vm1, %v3326_v15 }
 0x567   : > { %v3553_v22 = vpop.permute.xlu1 %3552 }
 0x568   : > { %3620 = vst.msk [vmem:[#allocation5 + $0xe8] sm:$0xff] %vm3590_vm2, %v3553_v22 }
 0x569   : > { %v3551_v18 = vpop.permute.xlu0 %3550 }
 0x56a   : > { %3619 = vst.msk [vmem:[#allocation5 + $0xe0] sm:$0xff] %vm3590_vm2, %v3551_v18 }
 0x56b   : > { %v3521_v42 = vpop.permute.xlu1 %3520 }
 0x56c   : > { %3604 = vst.msk [vmem:[#allocation5 + $0x68] sm:$0xff] %vm3590_vm2, %v3521_v42 }
 0x56d   : > { %v3519_v51 = vpop.permute.xlu0 %3518 }
 0x56e   : > { %3603 = vst.msk [vmem:[#allocation5 + $0x60] sm:$0xff] %vm3590_vm2, %v3519_v51 }
 0x56f   : > { %v3747_v55 = vpop.permute.xlu1 %3746 }
 0x570   : > { %3814 = vst.msk [vmem:[#allocation5 + $0xe8] sm:$0xff] %vm3784_vm3, %v3747_v55 }
 0x571   : > { %v3745_v7 = vpop.permute.xlu0 %3744 }
 0x572   : > { %3813 = vst.msk [vmem:[#allocation5 + $0xe0] sm:$0xff] %vm3784_vm3, %v3745_v7 }
 0x573   : > { %v3715_v46 = vpop.permute.xlu1 %3714 }
 0x574   : > { %3798 = vst.msk [vmem:[#allocation5 + $0x68] sm:$0xff] %vm3784_vm3, %v3715_v46 }
 0x575   : > { %v3713_v23 = vpop.permute.xlu0 %3712 }
 0x576   : > { %3797 = vst.msk [vmem:[#allocation5 + $0x60] sm:$0xff] %vm3784_vm3, %v3713_v23 }
 0x577   : > { %v3940_v2 = vpop.permute.xlu1 %3939 }
 0x578   : > { %4007 = vst.msk [vmem:[#allocation5 + $0xe8] sm:$0xff] %vm3977_vm4, %v3940_v2 }
 0x579   : > { %v3938_v19 = vpop.permute.xlu0 %3937 }
 0x57a   : > { %4006 = vst.msk [vmem:[#allocation5 + $0xe0] sm:$0xff] %vm3977_vm4, %v3938_v19 }
 0x57b   : > { %v3908_v54 = vpop.permute.xlu1 %3907 }
 0x57c   : > { %3991 = vst.msk [vmem:[#allocation5 + $0x68] sm:$0xff] %vm3977_vm4, %v3908_v54 }
 0x57d   : > { %v3906_v52 = vpop.permute.xlu0 %3905 }
 0x57e   : > { %3990 = vst.msk [vmem:[#allocation5 + $0x60] sm:$0xff] %vm3977_vm4, %v3906_v52 }
 0x57f   : > { %v4133_v59 = vpop.permute.xlu1 %4132 }
 0x580   : > { %4200 = vst.msk [vmem:[#allocation5 + $0xe8] sm:$0xff] %vm4170_vm5, %v4133_v59 }
 0x581   : > { %v4131_v63 = vpop.permute.xlu0 %4130 }
 0x582   : > { %4199 = vst.msk [vmem:[#allocation5 + $0xe0] sm:$0xff] %vm4170_vm5, %v4131_v63 }
 0x583   : > { %v4101_v26 = vpop.permute.xlu1 %4100 }
 0x584   : > { %4184 = vst.msk [vmem:[#allocation5 + $0x68] sm:$0xff] %vm4170_vm5, %v4101_v26 }
 0x585   : > { %v4099_v11 = vpop.permute.xlu0 %4098 }
 0x586   : > { %4183 = vst.msk [vmem:[#allocation5 + $0x60] sm:$0xff] %vm4170_vm5, %v4099_v11 }
 0x587   : > { %v3171_v31 = vpop.permute.xlu1 %3170  ;;  %v4233_v10 = vld [vmem:[#allocation5 + $0xe8] sm:$0xff] }
 0x588   : > { %3236 = vst.msk [vmem:[#allocation5 + $0xf8] sm:$0xff] %vm3204_vm0, %v3171_v31 }
 0x589   : > { %v3169_v17 = vpop.permute.xlu0 %3168  ;;  %v4232_v16 = vld [vmem:[#allocation5 + $0xe0] sm:$0xff] }
 0x58a   : > { %3235 = vst.msk [vmem:[#allocation5 + $0xf0] sm:$0xff] %vm3204_vm0, %v3169_v17  ;;  %v4733_v13 = vpack.c.bf16 %v4233_v10, %v4232_v16 }
 0x58b   : > { %v3364_v34 = vpop.permute.xlu1 %3363  ;;  %v4217_v37 = vld [vmem:[#allocation5 + $0x68] sm:$0xff] }
 0x58c   : > { %4735 = vmatprep.subr.msk.bf16.mxu1 %vm6884_vm7, %v4733_v13  ;;  %3429 = vst.msk [vmem:[#allocation5 + $0xf8] sm:$0xff] %vm3397_vm1, %v3364_v34 }
 0x58d   : > { %v3362_v60 = vpop.permute.xlu0 %3361  ;;  %v4216_v48 = vld [vmem:[#allocation5 + $0x60] sm:$0xff] }
 0x58e   : > { %3428 = vst.msk [vmem:[#allocation5 + $0xf0] sm:$0xff] %vm3397_vm1, %v3362_v60  ;;  %v4736_v27 = vpack.c.bf16 %v4217_v37, %v4216_v48 }
 0x58f   : > { %v3332_v61 = vpop.permute.xlu1 %3331 }
 0x590   : > { %4738 = vmatpush3.bf16.xpose.msk.msra.mxu1 %vm6884_vm7, %v4736_v27  ;;  %3413 = vst.msk [vmem:[#allocation5 + $0x78] sm:$0xff] %vm3397_vm1, %v3332_v61 }
 0x591   : > { %v3330_v36 = vpop.permute.xlu0 %3329 }
 0x592   : > { %3412 = vst.msk [vmem:[#allocation5 + $0x70] sm:$0xff] %vm3397_vm1, %v3330_v36 }
 0x593   : > { %v3557_v0 = vpop.permute.xlu1 %3556 }
 0x594   : > { %3622 = vst.msk [vmem:[#allocation5 + $0xf8] sm:$0xff] %vm3590_vm2, %v3557_v0 }
 0x595   : > { %v3555_v8 = vpop.permute.xlu0 %3554 }
 0x596   : > { %3621 = vst.msk [vmem:[#allocation5 + $0xf0] sm:$0xff] %vm3590_vm2, %v3555_v8 }
 0x597   : > { %v3525_v12 = vpop.permute.xlu1 %3524 }
 0x598   : > { %3606 = vst.msk [vmem:[#allocation5 + $0x78] sm:$0xff] %vm3590_vm2, %v3525_v12 }
 0x599   : > { %v3523_v58 = vpop.permute.xlu0 %3522 }
 0x59a   : > { %3605 = vst.msk [vmem:[#allocation5 + $0x70] sm:$0xff] %vm3590_vm2, %v3523_v58 }
 0x59b   : > { %v3751_v44 = vpop.permute.xlu1 %3750 }
 0x59c   : > { %3816 = vst.msk [vmem:[#allocation5 + $0xf8] sm:$0xff] %vm3784_vm3, %v3751_v44 }
 0x59d   : > { %v3749_v49 = vpop.permute.xlu0 %3748 }
 0x59e   : > { %3815 = vst.msk [vmem:[#allocation5 + $0xf0] sm:$0xff] %vm3784_vm3, %v3749_v49 }
 0x59f   : > { %v3719_v30 = vpop.permute.xlu1 %3718 }
 0x5a0   : > { %3800 = vst.msk [vmem:[#allocation5 + $0x78] sm:$0xff] %vm3784_vm3, %v3719_v30 }
 0x5a1   : > { %v3717_v32 = vpop.permute.xlu0 %3716 }
 0x5a2   : > { %3799 = vst.msk [vmem:[#allocation5 + $0x70] sm:$0xff] %vm3784_vm3, %v3717_v32 }
 0x5a3   : > { %v3944_v53 = vpop.permute.xlu1 %3943 }
 0x5a4   : > { %4009 = vst.msk [vmem:[#allocation5 + $0xf8] sm:$0xff] %vm3977_vm4, %v3944_v53 }
 0x5a5   : > { %v3942_v56 = vpop.permute.xlu0 %3941 }
 0x5a6   : > { %4008 = vst.msk [vmem:[#allocation5 + $0xf0] sm:$0xff] %vm3977_vm4, %v3942_v56 }
 0x5a7   : > { %v3912_v29 = vpop.permute.xlu1 %3911 }
 0x5a8   : > { %3993 = vst.msk [vmem:[#allocation5 + $0x78] sm:$0xff] %vm3977_vm4, %v3912_v29 }
 0x5a9   : > { %v3910_v41 = vpop.permute.xlu0 %3909 }
 0x5aa   : > { %3992 = vst.msk [vmem:[#allocation5 + $0x70] sm:$0xff] %vm3977_vm4, %v3910_v41 }
 0x5ab   : > { %v4137_v4 = vpop.permute.xlu1 %4136 }
 0x5ac   : > { %4202 = vst.msk [vmem:[#allocation5 + $0xf8] sm:$0xff] %vm4170_vm5, %v4137_v4 }
 0x5ad   : > { %v4135_v47 = vpop.permute.xlu0 %4134 }
 0x5ae   : > { %4201 = vst.msk [vmem:[#allocation5 + $0xf0] sm:$0xff] %vm4170_vm5, %v4135_v47 }
 0x5af   : > { %v4105_v33 = vpop.permute.xlu1 %4104 }
 0x5b0   : > { %4186 = vst.msk [vmem:[#allocation5 + $0x78] sm:$0xff] %vm4170_vm5, %v4105_v33 }
 0x5b1   : > { %v4103_v38 = vpop.permute.xlu0 %4102 }
 0x5b2   : > { %4185 = vst.msk [vmem:[#allocation5 + $0x70] sm:$0xff] %vm4170_vm5, %v4103_v38 }
 0x5b3   : > { %v4235_v6 = vld [vmem:[#allocation5 + $0xf8] sm:$0xff] }
 0x5b5   : > { %v4234_v9 = vld [vmem:[#allocation5 + $0xf0] sm:$0xff] }
 0x5b6   : > { %v4739_v1 = vpack.c.bf16 %v4235_v6, %v4234_v9 }
 0x5b7   : > { %v4219_v62 = vld [vmem:[#allocation5 + $0x78] sm:$0xff] }
 0x5b8   : > { %4741 = vmatprep.subr.msk.bf16.mxu1 %vm6884_vm7, %v4739_v1 }
 0x5b9   : > { %v4218_v50 = vld [vmem:[#allocation5 + $0x70] sm:$0xff] }
 0x5ba   : > { %v4742_v25 = vpack.c.bf16 %v4219_v62, %v4218_v50 }
 0x5bc   : > { %4744 = vmatpush3.bf16.xpose.msk.msra.mxu1 %vm6884_vm7, %v4742_v25 }
 0x5c2   : > { %v4416_v5 = vpop.permute.xlu0 %4415 }
 0x5c3   : > { %4630 = vmatmul.mubr.msk.f32.vlgmr.msra.gmra.mrb[0].mxu1 %vm4241_vm6, %v7112_v57 }
 0x696   : > { %v4407_v28 = vpop.f32.mrb[0].mxu1 }
 0x697   : > { %v4408_v20 = vadd.f32 %v4407_v28, %v4237_v35  ;;  %v4409_v3 = vpop.f32.mrb[1].mxu1 }
 0x698   : > { %v4410_v24 = vadd.f32 %v4409_v3, %v4239_v21 }
 0x699   : > { %v4418_v39 = vadd.f32 %v4416_v5, %v4408_v20 }
 0x69a   : > { %v4419_v14 = vadd.f32 %v4416_v5, %v4410_v24 }
 0x69c   : > { %v4422_v43 = vcombine.low %v4418_v39, %v4419_v14 }
 0x69e   : > { %4424 = vst [vmem:[%s306_s23] sm:$0xff] %v4422_v43 }
 0x69f PF: > { %s19_s29 = sadd.s32 1, %s4775_s29  }
 0x6a0   : > { %p16_p4 = scmp.ge.s32.totalorder %s19_s29, 4  }
 0x6a2   :  { %18 = sbr.rel (!%p16_p4) target bundleno = 2 (0x2), region = 86 }

</bundles_post_ra>
